<compile_context>
chip_gen: v5e
topology: v5e:2x2
jax: 0.10.0
libtpu: 0.0.40
codegen_flags: <defaults>
</compile_context>

<pallas_src>
import jax
import jax.numpy as jnp
from jax.experimental import pallas as pl
from jax.experimental.pallas import tpu as pltpu


def _round_up(x, m):
    return (x + m - 1) // m * m


def _physical_vmem_bytes():
    try:
        return int(pltpu.get_tpu_info().vmem_capacity_bytes)
    except Exception:
        return 64 * 2**20  # conservative (v7x per-TC) fallback


# ------------------------- fused Pallas kernel -------------------------

def _sppelan_fused_kernel(x_ref, w1_ref, s1_ref, b1_ref,
                          w5_ref, s5_ref, b5_ref, o_ref,
                          fpad_ref, acc_ref):
    """One batch element per grid step; all intermediates resident in VMEM.

    x_ref   : (1, H, W, Cin)   input activations (f32)
    w1_ref  : (Cin, Cn)        conv1 1x1 weight (bf16)
    s1/b1   : (1, Cn)          folded BN scale / bias for conv1 (f32)
    w5_ref  : (4, Cn, Co)      conv5 weight split into 4 branch slabs (bf16)
    s5/b5   : (1, Co)          folded BN scale / bias for conv5 (f32)
    o_ref   : (1, H, W, Co)
    fpad_ref: (H+4, W+10, Cn)  f32 scratch; -inf border, interior at (2, 8)
    acc_ref : (H*W, Co)        f32 conv5 accumulator
    """
    H, W = o_ref.shape[1], o_ref.shape[2]
    Cin = x_ref.shape[3]
    Cn = w1_ref.shape[1]
    Co = o_ref.shape[3]
    f32 = jnp.float32
    bf16 = jnp.bfloat16

    def silu(y):
        # exp and the divide both live on the EUP slot (free when MXU/VPU-bound)
        return y * pl.reciprocal(1.0 + jnp.exp(-y), approx=True)

    # ---- conv1: 1x1 conv (bf16 MXU) + folded BN + SiLU ----
    x2d = x_ref[0].reshape(H * W, Cin).astype(bf16)
    y1 = jnp.dot(x2d, w1_ref[...], preferred_element_type=f32)
    y1 = y1 * s1_ref[...] + b1_ref[...]
    f1 = silu(y1)                                       # (H*W, Cn) f32

    # ---- conv5 accumulator: branch 0 is f1 (concat eliminated) ----
    acc_ref[...] = jnp.dot(f1.astype(bf16), w5_ref[0],
                           preferred_element_type=f32)

    # ---- -inf border of the pool scratch (written once per image) ----
    Hp = fpad_ref.shape[0]                               # H + 4
    Wp = fpad_ref.shape[1]                               # W + 10
    ninf_rows = jnp.full((2, Wp, Cn), -jnp.inf, f32)
    ninf_cols = jnp.full((Hp, 2, Cn), -jnp.inf, f32)
    fpad_ref[pl.ds(0, 2), :, :] = ninf_rows              # top 2 rows
    fpad_ref[pl.ds(H + 2, 2), :, :] = ninf_rows          # bottom 2 rows
    fpad_ref[:, pl.ds(6, 2), :] = ninf_cols               # 2 cols left of interior
    fpad_ref[:, pl.ds(W + 8, 2), :] = ninf_cols            # 2 cols right of interior

    cur = f1.reshape(H, W, Cn)
    for stage in range(1, 4):                            # 3 chained 5x5 max pools
        # Sublane-aligned interior store (W-offset 8); leading-dim H offset free.
        fpad_ref[pl.ds(2, H), pl.ds(8, W), :] = cur
        # 5-tap max along W, read directly from the ref (vld slots, no spill).
        v = fpad_ref[:, pl.ds(6, W), :]                  # (H+4, W, Cn)
        for dw in range(1, 5):
            v = jnp.maximum(v, fpad_ref[:, pl.ds(6 + dw, W), :])
        # 5-tap max along H: leading-dim value slices are pure vreg selects.
        g = v[0:H]
        for dh in range(1, 5):
            g = jnp.maximum(g, v[dh:dh + H])             # (H, W, Cn) f32
        acc_ref[...] += jnp.dot(g.reshape(H * W, Cn).astype(bf16),
                                w5_ref[stage], preferred_element_type=f32)
        cur = g

    # ---- conv5 epilogue: folded BN + SiLU ----
    y5 = acc_ref[...] * s5_ref[...] + b5_ref[...]
    o_ref[...] = silu(y5).reshape(1, H, W, Co).astype(o_ref.dtype)


# ------------------------- wrapper -------------------------

def sppelan_forward(x_nchw, params):
    """SPPELAN forward. Input/output are NCHW to mirror the PyTorch module."""
    # TODO(synk): add an H-tiled grid axis with a 6-row halo (manual DMA) so
    # very large feature maps fit v7x's 64 MiB VMEM and use both TensorCores
    # at batch=1.
    x = jnp.transpose(x_nchw, (0, 2, 3, 1))              # -> NHWC
    N, H, W, Cin = x.shape

    f32, bf16 = jnp.float32, jnp.bfloat16
    w1 = params["w1"].astype(bf16)                        # (Cin, Cn)
    Cn = w1.shape[1]
    w5 = params["w5"]                                     # (4*Cn, Co)
    Co = w5.shape[1]
    w5b = w5.reshape(4, Cn, Co).astype(bf16)              # concat -> 4 branch slabs
    s1 = params["scale1"].astype(f32).reshape(1, Cn)
    b1 = params["bias1"].astype(f32).reshape(1, Cn)
    s5 = params["scale5"].astype(f32).reshape(1, Co)
    b5 = params["bias5"].astype(f32).reshape(1, Co)

    Wp = W + 10                                           # interior at col 8, +2 border

    # ---- VMEM budget: per-image working set, capped at 85% of physical ----
    lane = 128
    cn_l, co_l, cin_l = _round_up(Cn, lane), _round_up(Co, lane), _round_up(Cin, lane)
    in_blk = H * W * cin_l * x.dtype.itemsize
    out_blk = H * W * co_l * x.dtype.itemsize
    w_bytes = (Cin * cn_l + 4 * Cn * co_l) * 2 + (cn_l + co_l) * 2 * 4
    fpad_b = (H + 4) * _round_up(Wp, 8) * cn_l * 4
    acc_b = _round_up(H * W, 8) * co_l * 4
    temps = 6 * H * W * cn_l * 4
    need = 2 * (in_blk + out_blk) + 2 * w_bytes + fpad_b + acc_b + temps
    vmem_limit = int(min(max(need, 32 * 2**20),
                         int(0.85 * _physical_vmem_bytes())))

    cost = pl.CostEstimate(
        flops=2 * N * H * W * (Cin * Cn + 4 * Cn * Co) + 3 * 8 * N * H * W * Cn,
        transcendentals=2 * N * H * W * (Cn + Co),
        bytes_accessed=N * (H * W * Cin + H * W * Co) * 4 + w_bytes,
    )

    grid_spec = pltpu.PrefetchScalarGridSpec(
        num_scalar_prefetch=0,
        grid=(N,),
        in_specs=[
            pl.BlockSpec((1, H, W, Cin), lambda n: (n, 0, 0, 0)),
            pl.BlockSpec((Cin, Cn), lambda n: (0, 0)),
            pl.BlockSpec((1, Cn), lambda n: (0, 0)),
            pl.BlockSpec((1, Cn), lambda n: (0, 0)),
            pl.BlockSpec((4, Cn, Co), lambda n: (0, 0, 0)),
            pl.BlockSpec((1, Co), lambda n: (0, 0)),
            pl.BlockSpec((1, Co), lambda n: (0, 0)),
        ],
        out_specs=pl.BlockSpec((1, H, W, Co), lambda n: (n, 0, 0, 0)),
        scratch_shapes=[
            pltpu.VMEM((H + 4, Wp, Cn), jnp.float32),     # pool pad buffer
            pltpu.VMEM((H * W, Co), jnp.float32),         # conv5 accumulator
        ],
    )

    out = pl.pallas_call(
        _sppelan_fused_kernel,
        out_shape=jax.ShapeDtypeStruct((N, H, W, Co), x.dtype),
        grid_spec=grid_spec,
        compiler_params=pltpu.CompilerParams(
            dimension_semantics=("parallel",),
            vmem_limit_bytes=vmem_limit),
        cost_estimate=cost,
    )(x, w1, s1, b1, w5b, s5, b5)

    return jnp.transpose(out, (0, 3, 1, 2))               # -> NCHW


# ------------------------- parameter setup -------------------------

def make_params(key, in_channels, out_channels, neck_channels=None,
                dtype=jnp.float32):
    neck = neck_channels or out_channels // 2
    ks = jax.random.split(key, 10)
    eps = 1e-3

    def bn_fold(kg, kb, km, kv, c):
        gamma = 1.0 + 0.1 * jax.random.normal(kg, (c,), dtype)
        beta = 0.1 * jax.random.normal(kb, (c,), dtype)
        mean = 0.1 * jax.random.normal(km, (c,), dtype)
        var = jnp.abs(jax.random.normal(kv, (c,), dtype)) + 0.5
        scale = gamma / jnp.sqrt(var + eps)
        bias = beta - mean * scale
        return scale, bias

    # conv1: PyTorch weight (neck, in, 1, 1) -> matmul weight (in, neck)
    w1 = 0.1 * jax.random.normal(ks[0], (in_channels, neck), dtype)
    scale1, bias1 = bn_fold(ks[1], ks[2], ks[3], ks[4], neck)
    # conv5: PyTorch weight (out, 4*neck, 1, 1) -> matmul weight (4*neck, out)
    w5 = 0.1 * jax.random.normal(ks[5], (4 * neck, out_channels), dtype)
    scale5, bias5 = bn_fold(ks[6], ks[7], ks[8], ks[9], out_channels)

    return dict(w1=w1, scale1=scale1, bias1=bias1,
                w5=w5, scale5=scale5, bias5=bias5)


# ------------------------- pure-JAX reference -------------------------

def ref_forward(x_nchw, params):
    x = jnp.transpose(x_nchw, (0, 2, 3, 1))

    def conv(x, w, s, b):
        y = jnp.einsum("nhwc,cd->nhwd", x, w) * s + b
        return y * jax.nn.sigmoid(y)

    def pool(x):
        return jax.lax.reduce_window(
            x, -jnp.inf, jax.lax.max,
            window_dimensions=(1, 5, 5, 1), window_strides=(1, 1, 1, 1),
            padding=[(0, 0), (2, 2), (2, 2), (0, 0)])

    f1 = conv(x, params["w1"], params["scale1"], params["bias1"])
    f2 = pool(f1)
    f3 = pool(f2)
    f4 = pool(f3)
    cat = jnp.concatenate([f1, f2, f3, f4], axis=-1)
    out = conv(cat, params["w5"], params["scale5"], params["bias5"])
    return jnp.transpose(out, (0, 3, 1, 2))


# ------------------------- main -------------------------

if __name__ == "__main__":
    key = jax.random.PRNGKey(0)
    k_x, k_p = jax.random.split(key)

    N, Cin, H, W = 2, 8, 16, 16
    Cout = 16                                  # neck = 8, concat channels = 32

    x = jax.random.normal(k_x, (N, Cin, H, W), jnp.float32)
    params = make_params(k_p, Cin, Cout)

    fwd = jax.jit(sppelan_forward)
    out = jax.block_until_ready(fwd(x, params))
    ref = jax.block_until_ready(ref_forward(x, params))

    assert out.shape == (N, Cout, H, W), out.shape
    # bf16 MXU operands + approx-reciprocal SiLU -> bf16-level tolerance.
    assert jnp.allclose(out, ref, atol=3e-2, rtol=3e-2), "mismatch vs reference"
    print("KERNEL_OK")
</pallas_src>

<mosaic_0001>
module attributes {stable_mosaic.version = 11 : i64} {
  func.func @_sppelan_fused_kernel(%arg0: i32, %arg1: memref<1x16x16x8xf32, #tpu.memory_space<vmem>>, %arg2: memref<8x8xbf16, #tpu.memory_space<vmem>>, %arg3: memref<1x8xf32, #tpu.memory_space<vmem>>, %arg4: memref<1x8xf32, #tpu.memory_space<vmem>>, %arg5: memref<4x8x16xbf16, #tpu.memory_space<vmem>>, %arg6: memref<1x16xf32, #tpu.memory_space<vmem>>, %arg7: memref<1x16xf32, #tpu.memory_space<vmem>>, %arg8: memref<1x16x16x16xf32, #tpu.memory_space<vmem>>, %arg9: memref<20x26x8xf32, #tpu.memory_space<vmem>>, %arg10: memref<256x16xf32, #tpu.memory_space<vmem>>) attributes {dimension_semantics = [#tpu.dimension_semantics<parallel>], iteration_bounds = array<i64: 2>, scalar_prefetch = 0 : i64, scratch_operands = 2 : i64, tpu.core_type = #tpu.core_type<tc>, window_params = [{transform_indices = @transform_0, window_bounds = array<i64: 1, 16, 16, 8>}, {pipeline_mode = #tpu.pipeline_mode<synchronous>, transform_indices = @transform_1, window_bounds = array<i64: 8, 8>}, {pipeline_mode = #tpu.pipeline_mode<synchronous>, transform_indices = @transform_2, window_bounds = array<i64: 1, 8>}, {pipeline_mode = #tpu.pipeline_mode<synchronous>, transform_indices = @transform_3, window_bounds = array<i64: 1, 8>}, {pipeline_mode = #tpu.pipeline_mode<synchronous>, transform_indices = @transform_4, window_bounds = array<i64: 4, 8, 16>}, {pipeline_mode = #tpu.pipeline_mode<synchronous>, transform_indices = @transform_5, window_bounds = array<i64: 1, 16>}, {pipeline_mode = #tpu.pipeline_mode<synchronous>, transform_indices = @transform_6, window_bounds = array<i64: 1, 16>}, {transform_indices = @transform_7, window_bounds = array<i64: 1, 16, 16, 16>}]} {
    %c0 = arith.constant 0 : index
    %c0_0 = arith.constant 0 : index
    %c0_1 = arith.constant 0 : index
    %c0_2 = arith.constant 0 : index
    %0 = vector.load %arg1[%c0, %c0_0, %c0_1, %c0_2] : memref<1x16x16x8xf32, #tpu.memory_space<vmem>>, vector<1x16x16x8xf32>
    %1 = vector.shape_cast %0 : vector<1x16x16x8xf32> to vector<16x16x8xf32>
    %2 = vector.shape_cast %1 : vector<16x16x8xf32> to vector<256x8xf32>
    %3 = arith.truncf %2 : vector<256x8xf32> to vector<256x8xbf16>
    %c0_3 = arith.constant 0 : index
    %c0_4 = arith.constant 0 : index
    %4 = vector.load %arg2[%c0_3, %c0_4] : memref<8x8xbf16, #tpu.memory_space<vmem>>, vector<8x8xbf16>
    %cst = arith.constant dense<0.000000e+00> : vector<256x8xf32>
    %5 = tpu.matmul %3, %4, %cst {dimension_numbers = #tpu.dot_dimension_numbers<[1], [0], [0], [1], [0, 0, 1, 1], [], []>} : vector<256x8xbf16>, vector<8x8xbf16>, vector<256x8xf32> -> vector<256x8xf32>
    %c0_5 = arith.constant 0 : index
    %c0_6 = arith.constant 0 : index
    %6 = vector.load %arg3[%c0_5, %c0_6] : memref<1x8xf32, #tpu.memory_space<vmem>>, vector<1x8xf32>
    %7 = vector.broadcast %6 : vector<1x8xf32> to vector<256x8xf32>
    %8 = arith.mulf %5, %7 : vector<256x8xf32>
    %c0_7 = arith.constant 0 : index
    %c0_8 = arith.constant 0 : index
    %9 = vector.load %arg4[%c0_7, %c0_8] : memref<1x8xf32, #tpu.memory_space<vmem>>, vector<1x8xf32>
    %10 = vector.broadcast %9 : vector<1x8xf32> to vector<256x8xf32>
    %11 = arith.addf %8, %10 : vector<256x8xf32>
    %cst_9 = arith.constant 0.000000e+00 : f32
    %12 = vector.broadcast %cst_9 : f32 to vector<256x8xf32>
    %13 = arith.subf %12, %11 : vector<256x8xf32>
    %14 = math.exp %13 : vector<256x8xf32>
    %cst_10 = arith.constant 1.000000e+00 : f32
    %15 = vector.broadcast %cst_10 : f32 to vector<256x8xf32>
    %16 = arith.addf %15, %14 : vector<256x8xf32>
    %17 = tpu.reciprocal %16 {approx = true} : vector<256x8xf32> -> vector<256x8xf32>
    %18 = arith.mulf %11, %17 : vector<256x8xf32>
    %19 = arith.truncf %18 : vector<256x8xf32> to vector<256x8xbf16>
    %c0_11 = arith.constant 0 : index
    %c0_12 = arith.constant 0 : index
    %c0_13 = arith.constant 0 : index
    %20 = vector.load %arg5[%c0_11, %c0_12, %c0_13] : memref<4x8x16xbf16, #tpu.memory_space<vmem>>, vector<1x8x16xbf16>
    %21 = vector.shape_cast %20 : vector<1x8x16xbf16> to vector<8x16xbf16>
    %cst_14 = arith.constant dense<0.000000e+00> : vector<256x16xf32>
    %22 = tpu.matmul %19, %21, %cst_14 {dimension_numbers = #tpu.dot_dimension_numbers<[1], [0], [0], [1], [0, 0, 1, 1], [], []>} : vector<256x8xbf16>, vector<8x16xbf16>, vector<256x16xf32> -> vector<256x16xf32>
    %c0_15 = arith.constant 0 : index
    %c0_16 = arith.constant 0 : index
    %23 = vector.load %arg10[%c0_15, %c0_16] : memref<256x16xf32, #tpu.memory_space<vmem>>, vector<256x16xf32>
    tpu.vector_store %arg10[%c0_15, %c0_16], %22 {strides = array<i32>} : memref<256x16xf32, #tpu.memory_space<vmem>>, vector<256x16xf32>,
    %cst_17 = arith.constant 0xFF800000 : f32
    %24 = vector.broadcast %cst_17 : f32 to vector<2x26x8xf32>
    %cst_18 = arith.constant 0xFF800000 : f32
    %25 = vector.broadcast %cst_18 : f32 to vector<20x2x8xf32>
    %c0_19 = arith.constant 0 : index
    %c0_20 = arith.constant 0 : index
    %c0_21 = arith.constant 0 : index
    %26 = vector.load %arg9[%c0_19, %c0_20, %c0_21] : memref<20x26x8xf32, #tpu.memory_space<vmem>>, vector<2x26x8xf32>
    tpu.vector_store %arg9[%c0_19, %c0_20, %c0_21], %24 {strides = array<i32>} : memref<20x26x8xf32, #tpu.memory_space<vmem>>, vector<2x26x8xf32>,
    %c18 = arith.constant 18 : index
    %c0_22 = arith.constant 0 : index
    %c0_23 = arith.constant 0 : index
    %27 = vector.load %arg9[%c18, %c0_22, %c0_23] : memref<20x26x8xf32, #tpu.memory_space<vmem>>, vector<2x26x8xf32>
    tpu.vector_store %arg9[%c18, %c0_22, %c0_23], %24 {strides = array<i32>} : memref<20x26x8xf32, #tpu.memory_space<vmem>>, vector<2x26x8xf32>,
    %c0_24 = arith.constant 0 : index
    %c6 = arith.constant 6 : index
    %c0_25 = arith.constant 0 : index
    %28 = vector.load %arg9[%c0_24, %c6, %c0_25] : memref<20x26x8xf32, #tpu.memory_space<vmem>>, vector<20x2x8xf32>
    tpu.vector_store %arg9[%c0_24, %c6, %c0_25], %25 {strides = array<i32>} : memref<20x26x8xf32, #tpu.memory_space<vmem>>, vector<20x2x8xf32>,
    %c0_26 = arith.constant 0 : index
    %c24 = arith.constant 24 : index
    %c0_27 = arith.constant 0 : index
    %29 = vector.load %arg9[%c0_26, %c24, %c0_27] : memref<20x26x8xf32, #tpu.memory_space<vmem>>, vector<20x2x8xf32>
    tpu.vector_store %arg9[%c0_26, %c24, %c0_27], %25 {strides = array<i32>} : memref<20x26x8xf32, #tpu.memory_space<vmem>>, vector<20x2x8xf32>,
    %30 = vector.shape_cast %18 : vector<256x8xf32> to vector<16x16x8xf32>
    %c2 = arith.constant 2 : index
    %c8 = arith.constant 8 : index
    %c0_28 = arith.constant 0 : index
    %31 = vector.load %arg9[%c2, %c8, %c0_28] : memref<20x26x8xf32, #tpu.memory_space<vmem>>, vector<16x16x8xf32>
    tpu.vector_store %arg9[%c2, %c8, %c0_28], %30 {strides = array<i32>} : memref<20x26x8xf32, #tpu.memory_space<vmem>>, vector<16x16x8xf32>,
    %c0_29 = arith.constant 0 : index
    %c6_30 = arith.constant 6 : index
    %c0_31 = arith.constant 0 : index
    %32 = vector.load %arg9[%c0_29, %c6_30, %c0_31] : memref<20x26x8xf32, #tpu.memory_space<vmem>>, vector<20x16x8xf32>
    %c0_32 = arith.constant 0 : index
    %c7 = arith.constant 7 : index
    %c0_33 = arith.constant 0 : index
    %33 = vector.load %arg9[%c0_32, %c7, %c0_33] : memref<20x26x8xf32, #tpu.memory_space<vmem>>, vector<20x16x8xf32>
    %34 = arith.maximumf %32, %33 : vector<20x16x8xf32>
    %c0_34 = arith.constant 0 : index
    %c8_35 = arith.constant 8 : index
    %c0_36 = arith.constant 0 : index
    %35 = vector.load %arg9[%c0_34, %c8_35, %c0_36] : memref<20x26x8xf32, #tpu.memory_space<vmem>>, vector<20x16x8xf32>
    %36 = arith.maximumf %34, %35 : vector<20x16x8xf32>
    %c0_37 = arith.constant 0 : index
    %c9 = arith.constant 9 : index
    %c0_38 = arith.constant 0 : index
    %37 = vector.load %arg9[%c0_37, %c9, %c0_38] : memref<20x26x8xf32, #tpu.memory_space<vmem>>, vector<20x16x8xf32>
    %38 = arith.maximumf %36, %37 : vector<20x16x8xf32>
    %c0_39 = arith.constant 0 : index
    %c10 = arith.constant 10 : index
    %c0_40 = arith.constant 0 : index
    %39 = vector.load %arg9[%c0_39, %c10, %c0_40] : memref<20x26x8xf32, #tpu.memory_space<vmem>>, vector<20x16x8xf32>
    %40 = arith.maximumf %38, %39 : vector<20x16x8xf32>
    %41 = vector.extract_strided_slice %40 {offsets = [0, 0, 0], sizes = [16, 16, 8], strides = [1, 1, 1]} : vector<20x16x8xf32> to vector<16x16x8xf32>
    %42 = vector.extract_strided_slice %40 {offsets = [1, 0, 0], sizes = [16, 16, 8], strides = [1, 1, 1]} : vector<20x16x8xf32> to vector<16x16x8xf32>
    %43 = arith.maximumf %41, %42 : vector<16x16x8xf32>
    %44 = vector.extract_strided_slice %40 {offsets = [2, 0, 0], sizes = [16, 16, 8], strides = [1, 1, 1]} : vector<20x16x8xf32> to vector<16x16x8xf32>
    %45 = arith.maximumf %43, %44 : vector<16x16x8xf32>
    %46 = vector.extract_strided_slice %40 {offsets = [3, 0, 0], sizes = [16, 16, 8], strides = [1, 1, 1]} : vector<20x16x8xf32> to vector<16x16x8xf32>
    %47 = arith.maximumf %45, %46 : vector<16x16x8xf32>
    %48 = vector.extract_strided_slice %40 {offsets = [4, 0, 0], sizes = [16, 16, 8], strides = [1, 1, 1]} : vector<20x16x8xf32> to vector<16x16x8xf32>
    %49 = arith.maximumf %47, %48 : vector<16x16x8xf32>
    %c0_41 = arith.constant 0 : index
    %c0_42 = arith.constant 0 : index
    %50 = vector.load %arg10[%c0_41, %c0_42] : memref<256x16xf32, #tpu.memory_space<vmem>>, vector<256x16xf32>
    %51 = vector.shape_cast %49 : vector<16x16x8xf32> to vector<256x8xf32>
    %52 = arith.truncf %51 : vector<256x8xf32> to vector<256x8xbf16>
    %c1 = arith.constant 1 : index
    %c0_43 = arith.constant 0 : index
    %c0_44 = arith.constant 0 : index
    %53 = vector.load %arg5[%c1, %c0_43, %c0_44] : memref<4x8x16xbf16, #tpu.memory_space<vmem>>, vector<1x8x16xbf16>
    %54 = vector.shape_cast %53 : vector<1x8x16xbf16> to vector<8x16xbf16>
    %cst_45 = arith.constant dense<0.000000e+00> : vector<256x16xf32>
    %55 = tpu.matmul %52, %54, %cst_45 {dimension_numbers = #tpu.dot_dimension_numbers<[1], [0], [0], [1], [0, 0, 1, 1], [], []>} : vector<256x8xbf16>, vector<8x16xbf16>, vector<256x16xf32> -> vector<256x16xf32>
    %56 = arith.addf %50, %55 : vector<256x16xf32>
    %c0_46 = arith.constant 0 : index
    %c0_47 = arith.constant 0 : index
    %57 = vector.load %arg10[%c0_46, %c0_47] : memref<256x16xf32, #tpu.memory_space<vmem>>, vector<256x16xf32>
    tpu.vector_store %arg10[%c0_46, %c0_47], %56 {strides = array<i32>} : memref<256x16xf32, #tpu.memory_space<vmem>>, vector<256x16xf32>,
    %c2_48 = arith.constant 2 : index
    %c8_49 = arith.constant 8 : index
    %c0_50 = arith.constant 0 : index
    %58 = vector.load %arg9[%c2_48, %c8_49, %c0_50] : memref<20x26x8xf32, #tpu.memory_space<vmem>>, vector<16x16x8xf32>
    tpu.vector_store %arg9[%c2_48, %c8_49, %c0_50], %49 {strides = array<i32>} : memref<20x26x8xf32, #tpu.memory_space<vmem>>, vector<16x16x8xf32>,
    %c0_51 = arith.constant 0 : index
    %c6_52 = arith.constant 6 : index
    %c0_53 = arith.constant 0 : index
    %59 = vector.load %arg9[%c0_51, %c6_52, %c0_53] : memref<20x26x8xf32, #tpu.memory_space<vmem>>, vector<20x16x8xf32>
    %c0_54 = arith.constant 0 : index
    %c7_55 = arith.constant 7 : index
    %c0_56 = arith.constant 0 : index
    %60 = vector.load %arg9[%c0_54, %c7_55, %c0_56] : memref<20x26x8xf32, #tpu.memory_space<vmem>>, vector<20x16x8xf32>
    %61 = arith.maximumf %59, %60 : vector<20x16x8xf32>
    %c0_57 = arith.constant 0 : index
    %c8_58 = arith.constant 8 : index
    %c0_59 = arith.constant 0 : index
    %62 = vector.load %arg9[%c0_57, %c8_58, %c0_59] : memref<20x26x8xf32, #tpu.memory_space<vmem>>, vector<20x16x8xf32>
    %63 = arith.maximumf %61, %62 : vector<20x16x8xf32>
    %c0_60 = arith.constant 0 : index
    %c9_61 = arith.constant 9 : index
    %c0_62 = arith.constant 0 : index
    %64 = vector.load %arg9[%c0_60, %c9_61, %c0_62] : memref<20x26x8xf32, #tpu.memory_space<vmem>>, vector<20x16x8xf32>
    %65 = arith.maximumf %63, %64 : vector<20x16x8xf32>
    %c0_63 = arith.constant 0 : index
    %c10_64 = arith.constant 10 : index
    %c0_65 = arith.constant 0 : index
    %66 = vector.load %arg9[%c0_63, %c10_64, %c0_65] : memref<20x26x8xf32, #tpu.memory_space<vmem>>, vector<20x16x8xf32>
    %67 = arith.maximumf %65, %66 : vector<20x16x8xf32>
    %68 = vector.extract_strided_slice %67 {offsets = [0, 0, 0], sizes = [16, 16, 8], strides = [1, 1, 1]} : vector<20x16x8xf32> to vector<16x16x8xf32>
    %69 = vector.extract_strided_slice %67 {offsets = [1, 0, 0], sizes = [16, 16, 8], strides = [1, 1, 1]} : vector<20x16x8xf32> to vector<16x16x8xf32>
    %70 = arith.maximumf %68, %69 : vector<16x16x8xf32>
    %71 = vector.extract_strided_slice %67 {offsets = [2, 0, 0], sizes = [16, 16, 8], strides = [1, 1, 1]} : vector<20x16x8xf32> to vector<16x16x8xf32>
    %72 = arith.maximumf %70, %71 : vector<16x16x8xf32>
    %73 = vector.extract_strided_slice %67 {offsets = [3, 0, 0], sizes = [16, 16, 8], strides = [1, 1, 1]} : vector<20x16x8xf32> to vector<16x16x8xf32>
    %74 = arith.maximumf %72, %73 : vector<16x16x8xf32>
    %75 = vector.extract_strided_slice %67 {offsets = [4, 0, 0], sizes = [16, 16, 8], strides = [1, 1, 1]} : vector<20x16x8xf32> to vector<16x16x8xf32>
    %76 = arith.maximumf %74, %75 : vector<16x16x8xf32>
    %c0_66 = arith.constant 0 : index
    %c0_67 = arith.constant 0 : index
    %77 = vector.load %arg10[%c0_66, %c0_67] : memref<256x16xf32, #tpu.memory_space<vmem>>, vector<256x16xf32>
    %78 = vector.shape_cast %76 : vector<16x16x8xf32> to vector<256x8xf32>
    %79 = arith.truncf %78 : vector<256x8xf32> to vector<256x8xbf16>
    %c2_68 = arith.constant 2 : index
    %c0_69 = arith.constant 0 : index
    %c0_70 = arith.constant 0 : index
    %80 = vector.load %arg5[%c2_68, %c0_69, %c0_70] : memref<4x8x16xbf16, #tpu.memory_space<vmem>>, vector<1x8x16xbf16>
    %81 = vector.shape_cast %80 : vector<1x8x16xbf16> to vector<8x16xbf16>
    %cst_71 = arith.constant dense<0.000000e+00> : vector<256x16xf32>
    %82 = tpu.matmul %79, %81, %cst_71 {dimension_numbers = #tpu.dot_dimension_numbers<[1], [0], [0], [1], [0, 0, 1, 1], [], []>} : vector<256x8xbf16>, vector<8x16xbf16>, vector<256x16xf32> -> vector<256x16xf32>
    %83 = arith.addf %77, %82 : vector<256x16xf32>
    %c0_72 = arith.constant 0 : index
    %c0_73 = arith.constant 0 : index
    %84 = vector.load %arg10[%c0_72, %c0_73] : memref<256x16xf32, #tpu.memory_space<vmem>>, vector<256x16xf32>
    tpu.vector_store %arg10[%c0_72, %c0_73], %83 {strides = array<i32>} : memref<256x16xf32, #tpu.memory_space<vmem>>, vector<256x16xf32>,
    %c2_74 = arith.constant 2 : index
    %c8_75 = arith.constant 8 : index
    %c0_76 = arith.constant 0 : index
    %85 = vector.load %arg9[%c2_74, %c8_75, %c0_76] : memref<20x26x8xf32, #tpu.memory_space<vmem>>, vector<16x16x8xf32>
    tpu.vector_store %arg9[%c2_74, %c8_75, %c0_76], %76 {strides = array<i32>} : memref<20x26x8xf32, #tpu.memory_space<vmem>>, vector<16x16x8xf32>,
    %c0_77 = arith.constant 0 : index
    %c6_78 = arith.constant 6 : index
    %c0_79 = arith.constant 0 : index
    %86 = vector.load %arg9[%c0_77, %c6_78, %c0_79] : memref<20x26x8xf32, #tpu.memory_space<vmem>>, vector<20x16x8xf32>
    %c0_80 = arith.constant 0 : index
    %c7_81 = arith.constant 7 : index
    %c0_82 = arith.constant 0 : index
    %87 = vector.load %arg9[%c0_80, %c7_81, %c0_82] : memref<20x26x8xf32, #tpu.memory_space<vmem>>, vector<20x16x8xf32>
    %88 = arith.maximumf %86, %87 : vector<20x16x8xf32>
    %c0_83 = arith.constant 0 : index
    %c8_84 = arith.constant 8 : index
    %c0_85 = arith.constant 0 : index
    %89 = vector.load %arg9[%c0_83, %c8_84, %c0_85] : memref<20x26x8xf32, #tpu.memory_space<vmem>>, vector<20x16x8xf32>
    %90 = arith.maximumf %88, %89 : vector<20x16x8xf32>
    %c0_86 = arith.constant 0 : index
    %c9_87 = arith.constant 9 : index
    %c0_88 = arith.constant 0 : index
    %91 = vector.load %arg9[%c0_86, %c9_87, %c0_88] : memref<20x26x8xf32, #tpu.memory_space<vmem>>, vector<20x16x8xf32>
    %92 = arith.maximumf %90, %91 : vector<20x16x8xf32>
    %c0_89 = arith.constant 0 : index
    %c10_90 = arith.constant 10 : index
    %c0_91 = arith.constant 0 : index
    %93 = vector.load %arg9[%c0_89, %c10_90, %c0_91] : memref<20x26x8xf32, #tpu.memory_space<vmem>>, vector<20x16x8xf32>
    %94 = arith.maximumf %92, %93 : vector<20x16x8xf32>
    %95 = vector.extract_strided_slice %94 {offsets = [0, 0, 0], sizes = [16, 16, 8], strides = [1, 1, 1]} : vector<20x16x8xf32> to vector<16x16x8xf32>
    %96 = vector.extract_strided_slice %94 {offsets = [1, 0, 0], sizes = [16, 16, 8], strides = [1, 1, 1]} : vector<20x16x8xf32> to vector<16x16x8xf32>
    %97 = arith.maximumf %95, %96 : vector<16x16x8xf32>
    %98 = vector.extract_strided_slice %94 {offsets = [2, 0, 0], sizes = [16, 16, 8], strides = [1, 1, 1]} : vector<20x16x8xf32> to vector<16x16x8xf32>
    %99 = arith.maximumf %97, %98 : vector<16x16x8xf32>
    %100 = vector.extract_strided_slice %94 {offsets = [3, 0, 0], sizes = [16, 16, 8], strides = [1, 1, 1]} : vector<20x16x8xf32> to vector<16x16x8xf32>
    %101 = arith.maximumf %99, %100 : vector<16x16x8xf32>
    %102 = vector.extract_strided_slice %94 {offsets = [4, 0, 0], sizes = [16, 16, 8], strides = [1, 1, 1]} : vector<20x16x8xf32> to vector<16x16x8xf32>
    %103 = arith.maximumf %101, %102 : vector<16x16x8xf32>
    %c0_92 = arith.constant 0 : index
    %c0_93 = arith.constant 0 : index
    %104 = vector.load %arg10[%c0_92, %c0_93] : memref<256x16xf32, #tpu.memory_space<vmem>>, vector<256x16xf32>
    %105 = vector.shape_cast %103 : vector<16x16x8xf32> to vector<256x8xf32>
    %106 = arith.truncf %105 : vector<256x8xf32> to vector<256x8xbf16>
    %c3 = arith.constant 3 : index
    %c0_94 = arith.constant 0 : index
    %c0_95 = arith.constant 0 : index
    %107 = vector.load %arg5[%c3, %c0_94, %c0_95] : memref<4x8x16xbf16, #tpu.memory_space<vmem>>, vector<1x8x16xbf16>
    %108 = vector.shape_cast %107 : vector<1x8x16xbf16> to vector<8x16xbf16>
    %cst_96 = arith.constant dense<0.000000e+00> : vector<256x16xf32>
    %109 = tpu.matmul %106, %108, %cst_96 {dimension_numbers = #tpu.dot_dimension_numbers<[1], [0], [0], [1], [0, 0, 1, 1], [], []>} : vector<256x8xbf16>, vector<8x16xbf16>, vector<256x16xf32> -> vector<256x16xf32>
    %110 = arith.addf %104, %109 : vector<256x16xf32>
    %c0_97 = arith.constant 0 : index
    %c0_98 = arith.constant 0 : index
    %111 = vector.load %arg10[%c0_97, %c0_98] : memref<256x16xf32, #tpu.memory_space<vmem>>, vector<256x16xf32>
    tpu.vector_store %arg10[%c0_97, %c0_98], %110 {strides = array<i32>} : memref<256x16xf32, #tpu.memory_space<vmem>>, vector<256x16xf32>,
    %c0_99 = arith.constant 0 : index
    %c0_100 = arith.constant 0 : index
    %112 = vector.load %arg10[%c0_99, %c0_100] : memref<256x16xf32, #tpu.memory_space<vmem>>, vector<256x16xf32>
    %c0_101 = arith.constant 0 : index
    %c0_102 = arith.constant 0 : index
    %113 = vector.load %arg6[%c0_101, %c0_102] : memref<1x16xf32, #tpu.memory_space<vmem>>, vector<1x16xf32>
    %114 = vector.broadcast %113 : vector<1x16xf32> to vector<256x16xf32>
    %115 = arith.mulf %112, %114 : vector<256x16xf32>
    %c0_103 = arith.constant 0 : index
    %c0_104 = arith.constant 0 : index
    %116 = vector.load %arg7[%c0_103, %c0_104] : memref<1x16xf32, #tpu.memory_space<vmem>>, vector<1x16xf32>
    %117 = vector.broadcast %116 : vector<1x16xf32> to vector<256x16xf32>
    %118 = arith.addf %115, %117 : vector<256x16xf32>
    %cst_105 = arith.constant 0.000000e+00 : f32
    %119 = vector.broadcast %cst_105 : f32 to vector<256x16xf32>
    %120 = arith.subf %119, %118 : vector<256x16xf32>
    %121 = math.exp %120 : vector<256x16xf32>
    %cst_106 = arith.constant 1.000000e+00 : f32
    %122 = vector.broadcast %cst_106 : f32 to vector<256x16xf32>
    %123 = arith.addf %122, %121 : vector<256x16xf32>
    %124 = tpu.reciprocal %123 {approx = true} : vector<256x16xf32> -> vector<256x16xf32>
    %125 = arith.mulf %118, %124 : vector<256x16xf32>
    %126 = vector.shape_cast %125 : vector<256x16xf32> to vector<1x16x16x16xf32>
    %c0_107 = arith.constant 0 : index
    %c0_108 = arith.constant 0 : index
    %c0_109 = arith.constant 0 : index
    %c0_110 = arith.constant 0 : index
    %127 = vector.load %arg8[%c0_107, %c0_108, %c0_109, %c0_110] : memref<1x16x16x16xf32, #tpu.memory_space<vmem>>, vector<1x16x16x16xf32>
    tpu.vector_store %arg8[%c0_107, %c0_108, %c0_109, %c0_110], %126 {strides = array<i32>} : memref<1x16x16x16xf32, #tpu.memory_space<vmem>>, vector<1x16x16x16xf32>,
    return
  }
  func.func @transform_0(%arg0: i32) -> (i32, i32, i32, i32) {
    %c0_i32 = arith.constant 0 : i32
    %c0_i32_0 = arith.constant 0 : i32
    %c0_i32_1 = arith.constant 0 : i32
    %c0_i32_2 = arith.constant 0 : i32
    return %arg0, %c0_i32, %c0_i32_0, %c0_i32_1 : i32, i32, i32, i32
  }
  func.func @transform_1(%arg0: i32) -> (i32, i32) {
    %c0_i32 = arith.constant 0 : i32
    %c0_i32_0 = arith.constant 0 : i32
    %c0_i32_1 = arith.constant 0 : i32
    return %c0_i32, %c0_i32_0 : i32, i32
  }
  func.func @transform_2(%arg0: i32) -> (i32, i32) {
    %c0_i32 = arith.constant 0 : i32
    %c0_i32_0 = arith.constant 0 : i32
    %c0_i32_1 = arith.constant 0 : i32
    return %c0_i32, %c0_i32_0 : i32, i32
  }
  func.func @transform_3(%arg0: i32) -> (i32, i32) {
    %c0_i32 = arith.constant 0 : i32
    %c0_i32_0 = arith.constant 0 : i32
    %c0_i32_1 = arith.constant 0 : i32
    return %c0_i32, %c0_i32_0 : i32, i32
  }
  func.func @transform_4(%arg0: i32) -> (i32, i32, i32) {
    %c0_i32 = arith.constant 0 : i32
    %c0_i32_0 = arith.constant 0 : i32
    %c0_i32_1 = arith.constant 0 : i32
    %c0_i32_2 = arith.constant 0 : i32
    return %c0_i32, %c0_i32_0, %c0_i32_1 : i32, i32, i32
  }
  func.func @transform_5(%arg0: i32) -> (i32, i32) {
    %c0_i32 = arith.constant 0 : i32
    %c0_i32_0 = arith.constant 0 : i32
    %c0_i32_1 = arith.constant 0 : i32
    return %c0_i32, %c0_i32_0 : i32, i32
  }
  func.func @transform_6(%arg0: i32) -> (i32, i32) {
    %c0_i32 = arith.constant 0 : i32
    %c0_i32_0 = arith.constant 0 : i32
    %c0_i32_1 = arith.constant 0 : i32
    return %c0_i32, %c0_i32_0 : i32, i32
  }
  func.func @transform_7(%arg0: i32) -> (i32, i32, i32, i32) {
    %c0_i32 = arith.constant 0 : i32
    %c0_i32_0 = arith.constant 0 : i32
    %c0_i32_1 = arith.constant 0 : i32
    %c0_i32_2 = arith.constant 0 : i32
    return %arg0, %c0_i32, %c0_i32_0, %c0_i32_1 : i32, i32, i32, i32
  }
}

</mosaic_0001>

<bundles_post_ra>
// kernel: sppelan_forward.1
= control target key start
LH: loop header
LB: loop body
LE: loop exit
PB: predicated region body
PF: predicated region fallthrough
CT: control target
= control target key end

     0   :  { %s4108_s24 = smov 0   ;;  %s6419_s0 = inlined_call_operand.vmem [shape: f32[2,16,16,8], index: 0, kind: input, shape index: {}]   ;;  %s6420_s1 = inlined_call_operand.vmem [shape: bf16[8,8], index: 1, kind: input, shape index: {}]   ;;  %s6421_s2 = inlined_call_operand.vmem [shape: f32[1,8], index: 2, kind: input, shape index: {}]   ;;  %s6422_s3 = inlined_call_operand.vmem [shape: f32[1,8], index: 3, kind: input, shape index: {}]   ;;  %s6423_s4 = inlined_call_operand.vmem [shape: bf16[4,8,16], index: 4, kind: input, shape index: {}]   ;;  %s6424_s5 = inlined_call_operand.vmem [shape: f32[1,16], index: 5, kind: input, shape index: {}]   ;;  %s6425_s6 = inlined_call_operand.vmem [shape: f32[1,16], index: 6, kind: input, shape index: {}]   ;;  %s6426_s7 = inlined_call_operand.vmem [shape: f32[2,16,16,16], index: 7, kind: output, shape index: {}]  }
   0x1 LB: > { %s3689_s25 = sadd.s32 4294967295, %s4065_s24   ;;  %p3693_p0 = scmp.ge.s32.totalorder %s4065_s24, 1  ;;  %s4065_s24 = sphi %s4108_s24, %s17_s24  }
   0x2   : > { %p237_p1 = scmp.lt.s32.totalorder %s4065_s24, 3 }
   0x4   : > { %p238_p2 = pnand %p3693_p0, %p237_p1 }
   0x6   : > { %241 = sbr.rel (%p238_p2) target bundleno = 889 (0x379), region = 48 }
   0xb   : > { %v328_v0 = vld [vmem:[%s6420_s1] sm:$0xf]  ;;  %vm378_vm0 = vcmask 1043456   ;;  %p269_p3 = scmp.lt.s32.totalorder %s3689_s25, 1  ;;  %vm329_vm1 = vcmask 64512   ;;  %vm928_vm2 = vcmask 58368  }
   0xc   : > { %v380_v1 = vsel %vm378_vm0, %v328_v0, 0  ;;  %v4067_v50 = vmov -inf   ;;  %v4183_v51 = vld [vmem:[%s6421_s2] ss:$0 sm:$0xff]  ;;  %vm892_vm3 = vcmask 130048  }
   0xd   : > { %389 = vmatpush.bf16.msra.mxu0 %v380_v1  ;;  %3785 = vmatpush.bf16.msra.mxu1 %v380_v1  ;;  %s6611_s25 = smov (!%p269_p3, %s3689_s25), 1  ;;  %953 = vst.msk [vmem:[#allocation2 + $0x146] sm:$0x3] %vm928_vm2, %v4067_v50  ;;  %v4192_v52 = vld [vmem:[%s6422_s3] ss:$0 sm:$0xff] }
   0xe   : > { %3786 = vmatpush.bf16.msra.mxu2 %v380_v1  ;;  %3787 = vmatpush.bf16.msra.mxu3 %v380_v1  ;;  %s3783_s28 = sshll.u32 %s6611_s25, 8  ;;  %925 = vst.msk [vmem:[#allocation2] sm:$0xff] %vm329_vm1, %v4067_v50 }
   0xf   : > { %s4128_s8 = scalar_lea.vmem %s6419_s0, %s3783_s28  ;;  %926 = vst.msk [vmem:[#allocation2 + $0x8] sm:$0xff] %vm329_vm1, %v4067_v50  ;;  %s6038_s30 = scalar_lea.vmem %s6426_s7, %s3783_s28 }
  0x10   : > { %v280_v2 = vld [vmem:[%s4128_s8] sm:$0xff]  ;;  %v281_v3 = vld [vmem:[%s4128_s8 + $0x8] sm:$0xff]  ;;  %v282_v14 = vld [vmem:[%s4128_s8 + $0x10] sm:$0xff]  ;;  %927 = vst.msk [vmem:[#allocation2 + $0x10] sm:$0xff] %vm329_vm1, %v4067_v50 }
  0x11   : > { %v288_v4 = vld [vmem:[%s4128_s8 + $0x40] sm:$0xff]  ;;  %v312_v5 = vpack.c.bf16 %v281_v3, %v280_v2  ;;  %v289_v6 = vld [vmem:[%s4128_s8 + $0x48] sm:$0xff]  ;;  %v283_v15 = vld [vmem:[%s4128_s8 + $0x18] sm:$0xff]  ;;  %929 = vst.msk [vmem:[#allocation2 + $0x18] sm:$0x3] %vm928_vm2, %v4067_v50 }
  0x12   : > { %v296_v7 = vld [vmem:[%s4128_s8 + $0x80] sm:$0xff]  ;;  %v297_v8 = vld [vmem:[%s4128_s8 + $0x88] sm:$0xff]  ;;  %v316_v9 = vpack.c.bf16 %v289_v6, %v288_v4  ;;  %v290_v16 = vld [vmem:[%s4128_s8 + $0x50] sm:$0xff]  ;;  %v313_v22 = vpack.c.bf16 %v283_v15, %v282_v14  ;;  %930 = vst.msk [vmem:[#allocation2 + $0x20] sm:$0xff] %vm329_vm1, %v4067_v50 }
  0x13   : > { %v320_v10 = vpack.c.bf16 %v297_v8, %v296_v7  ;;  %v304_v11 = vld [vmem:[%s4128_s8 + $0xc0] sm:$0xff]  ;;  %v305_v12 = vld [vmem:[%s4128_s8 + $0xc8] sm:$0xff]  ;;  %3698 = vmatmul.msk.bf16.vlgmr.msra.gmra.mxu0 %vm329_vm1, %v312_v5  ;;  %v291_v17 = vld [vmem:[%s4128_s8 + $0x58] sm:$0xff]  ;;  %931 = vst.msk [vmem:[#allocation2 + $0x28] sm:$0xff] %vm329_vm1, %v4067_v50 }
  0x14   : > { %v324_v13 = vpack.c.bf16 %v305_v12, %v304_v11  ;;  %3702 = vmatmul.msk.bf16.vlgmr.msra.gmra.mxu1 %vm329_vm1, %v316_v9  ;;  %v298_v18 = vld [vmem:[%s4128_s8 + $0x90] sm:$0xff]  ;;  %v299_v19 = vld [vmem:[%s4128_s8 + $0x98] sm:$0xff]  ;;  %v317_v23 = vpack.c.bf16 %v291_v17, %v290_v16  ;;  %v284_v26 = vld [vmem:[%s4128_s8 + $0x20] sm:$0xff]  ;;  %932 = vst.msk [vmem:[#allocation2 + $0x30] sm:$0xff] %vm329_vm1, %v4067_v50 }
  0x15   : > { %3706 = vmatmul.msk.bf16.vlgmr.msra.gmra.mxu2 %vm329_vm1, %v320_v10  ;;  %v306_v20 = vld [vmem:[%s4128_s8 + $0xd0] sm:$0xff]  ;;  %v307_v21 = vld [vmem:[%s4128_s8 + $0xd8] sm:$0xff]  ;;  %v321_v24 = vpack.c.bf16 %v299_v19, %v298_v18  ;;  %v285_v27 = vld [vmem:[%s4128_s8 + $0x28] sm:$0xff]  ;;  %933 = vst.msk [vmem:[#allocation2 + $0x38] sm:$0x3] %vm928_vm2, %v4067_v50 }
  0x16   : > { %3710 = vmatmul.msk.bf16.vlgmr.msra.gmra.mxu3 %vm329_vm1, %v324_v13  ;;  %v325_v25 = vpack.c.bf16 %v307_v21, %v306_v20  ;;  %v292_v28 = vld [vmem:[%s4128_s8 + $0x60] sm:$0xff]  ;;  %v293_v29 = vld [vmem:[%s4128_s8 + $0x68] sm:$0xff]  ;;  %v314_v34 = vpack.c.bf16 %v285_v27, %v284_v26  ;;  %v286_v38 = vld [vmem:[%s4128_s8 + $0x30] sm:$0xff]  ;;  %935 = vst.msk [vmem:[#allocation2 + $0x240] sm:$0xff] %vm329_vm1, %v4067_v50 }
  0x17   : > { %v300_v30 = vld [vmem:[%s4128_s8 + $0xa0] sm:$0xff]  ;;  %v301_v31 = vld [vmem:[%s4128_s8 + $0xa8] sm:$0xff]  ;;  %v318_v35 = vpack.c.bf16 %v293_v29, %v292_v28  ;;  %v287_v39 = vld [vmem:[%s4128_s8 + $0x38] sm:$0xff]  ;;  %936 = vst.msk [vmem:[#allocation2 + $0x248] sm:$0xff] %vm329_vm1, %v4067_v50 }
  0x18   : > { %v308_v32 = vld [vmem:[%s4128_s8 + $0xe0] sm:$0xff]  ;;  %v309_v33 = vld [vmem:[%s4128_s8 + $0xe8] sm:$0xff]  ;;  %v322_v36 = vpack.c.bf16 %v301_v31, %v300_v30  ;;  %v294_v40 = vld [vmem:[%s4128_s8 + $0x70] sm:$0xff]  ;;  %v315_v46 = vpack.c.bf16 %v287_v39, %v286_v38  ;;  %937 = vst.msk [vmem:[#allocation2 + $0x250] sm:$0xff] %vm329_vm1, %v4067_v50 }
  0x19   : > { %v326_v37 = vpack.c.bf16 %v309_v33, %v308_v32  ;;  %v295_v41 = vld [vmem:[%s4128_s8 + $0x78] sm:$0xff]  ;;  %v302_v42 = vld [vmem:[%s4128_s8 + $0xb0] sm:$0xff]  ;;  %938 = vst.msk [vmem:[#allocation2 + $0x258] sm:$0x3] %vm928_vm2, %v4067_v50  ;;  %v751_v28 = vld [vmem:[%s6423_s4] sm:$0xf] }
  0x1a   : > { %v303_v43 = vld [vmem:[%s4128_s8 + $0xb8] sm:$0xff]  ;;  %v310_v44 = vld [vmem:[%s4128_s8 + $0xf0] sm:$0xff]  ;;  %v319_v47 = vpack.c.bf16 %v295_v41, %v294_v40  ;;  %939 = vst.msk [vmem:[#allocation2 + $0x260] sm:$0xff] %vm329_vm1, %v4067_v50  ;;  %v801_v31 = vsel %vm378_vm0, %v751_v28, 0 }
  0x1b   : > { %v311_v45 = vld [vmem:[%s4128_s8 + $0xf8] sm:$0xff]  ;;  %v323_v48 = vpack.c.bf16 %v303_v43, %v302_v42  ;;  %940 = vst.msk [vmem:[#allocation2 + $0x268] sm:$0xff] %vm329_vm1, %v4067_v50  ;;  %810 = vmatpush.bf16.msrb.mxu1 %v801_v31 }
  0x1c   : > { %v327_v49 = vpack.c.bf16 %v311_v45, %v310_v44  ;;  %941 = vst.msk [vmem:[#allocation2 + $0x270] sm:$0xff] %vm329_vm1, %v4067_v50 }
  0x1d   : > { %942 = vst.msk [vmem:[#allocation2 + $0x278] sm:$0x3] %vm928_vm2, %v4067_v50 }
  0x1e   : > { %945 = vst.msk [vmem:[#allocation2 + $0x46] sm:$0x3] %vm928_vm2, %v4067_v50 }
  0x1f   : > { %946 = vst.msk [vmem:[#allocation2 + $0x66] sm:$0x3] %vm928_vm2, %v4067_v50 }
  0x20   : > { %947 = vst.msk [vmem:[#allocation2 + $0x86] sm:$0x3] %vm928_vm2, %v4067_v50 }
  0x21   : > { %948 = vst.msk [vmem:[#allocation2 + $0xa6] sm:$0x3] %vm928_vm2, %v4067_v50 }
  0x22   : > { %949 = vst.msk [vmem:[#allocation2 + $0xc6] sm:$0x3] %vm928_vm2, %v4067_v50 }
  0x23   : > { %3699 = vmatmul.msk.bf16.gmra.mxu0 %vm329_vm1, %v313_v22  ;;  %950 = vst.msk [vmem:[#allocation2 + $0xe6] sm:$0x3] %vm928_vm2, %v4067_v50 }
  0x24   : > { %3703 = vmatmul.msk.bf16.gmra.mxu1 %vm329_vm1, %v317_v23  ;;  %951 = vst.msk [vmem:[#allocation2 + $0x106] sm:$0x3] %vm928_vm2, %v4067_v50 }
  0x25   : > { %3707 = vmatmul.msk.bf16.gmra.mxu2 %vm329_vm1, %v321_v24  ;;  %952 = vst.msk [vmem:[#allocation2 + $0x126] sm:$0x3] %vm928_vm2, %v4067_v50 }
  0x26   : > { %3711 = vmatmul.msk.bf16.gmra.mxu3 %vm329_vm1, %v325_v25  ;;  %954 = vst.msk [vmem:[#allocation2 + $0x166] sm:$0x3] %vm928_vm2, %v4067_v50 }
  0x27   : > { %955 = vst.msk [vmem:[#allocation2 + $0x186] sm:$0x3] %vm928_vm2, %v4067_v50 }
  0x28   : > { %956 = vst.msk [vmem:[#allocation2 + $0x1a6] sm:$0x3] %vm928_vm2, %v4067_v50 }
  0x29   : > { %957 = vst.msk [vmem:[#allocation2 + $0x1c6] sm:$0x3] %vm928_vm2, %v4067_v50 }
  0x2a   : > { %958 = vst.msk [vmem:[#allocation2 + $0x1e6] sm:$0x3] %vm928_vm2, %v4067_v50 }
  0x2b   : > { %959 = vst.msk [vmem:[#allocation2 + $0x206] sm:$0x3] %vm928_vm2, %v4067_v50 }
  0x2c   : > { %960 = vst.msk [vmem:[#allocation2 + $0x226] sm:$0x3] %vm928_vm2, %v4067_v50 }
  0x2d   : > { %965 = vst.msk [vmem:[#allocation2 + $0x58] sm:$0x3] %vm928_vm2, %v4067_v50 }
  0x2e   : > { %966 = vst.msk [vmem:[#allocation2 + $0x78] sm:$0x3] %vm928_vm2, %v4067_v50 }
  0x2f   : > { %967 = vst.msk [vmem:[#allocation2 + $0x98] sm:$0x3] %vm928_vm2, %v4067_v50 }
  0x30   : > { %968 = vst.msk [vmem:[#allocation2 + $0xb8] sm:$0x3] %vm928_vm2, %v4067_v50 }
  0x31   : > { %969 = vst.msk [vmem:[#allocation2 + $0xd8] sm:$0x3] %vm928_vm2, %v4067_v50 }
  0x32   : > { %970 = vst.msk [vmem:[#allocation2 + $0xf8] sm:$0x3] %vm928_vm2, %v4067_v50 }
  0x33   : > { %3700 = vmatmul.msk.bf16.gmra.mxu0 %vm329_vm1, %v314_v34  ;;  %971 = vst.msk [vmem:[#allocation2 + $0x118] sm:$0x3] %vm928_vm2, %v4067_v50 }
  0x34   : > { %3704 = vmatmul.msk.bf16.gmra.mxu1 %vm329_vm1, %v318_v35  ;;  %972 = vst.msk [vmem:[#allocation2 + $0x138] sm:$0x3] %vm928_vm2, %v4067_v50 }
  0x35   : > { %3708 = vmatmul.msk.bf16.gmra.mxu2 %vm329_vm1, %v322_v36  ;;  %973 = vst.msk [vmem:[#allocation2 + $0x158] sm:$0x3] %vm928_vm2, %v4067_v50 }
  0x36   : > { %3712 = vmatmul.msk.bf16.gmra.mxu3 %vm329_vm1, %v326_v37  ;;  %974 = vst.msk [vmem:[#allocation2 + $0x178] sm:$0x3] %vm928_vm2, %v4067_v50 }
  0x37   : > { %975 = vst.msk [vmem:[#allocation2 + $0x198] sm:$0x3] %vm928_vm2, %v4067_v50 }
  0x38   : > { %976 = vst.msk [vmem:[#allocation2 + $0x1b8] sm:$0x3] %vm928_vm2, %v4067_v50 }
  0x39   : > { %977 = vst.msk [vmem:[#allocation2 + $0x1d8] sm:$0x3] %vm928_vm2, %v4067_v50 }
  0x3a   : > { %978 = vst.msk [vmem:[#allocation2 + $0x1f8] sm:$0x3] %vm928_vm2, %v4067_v50 }
  0x3b   : > { %979 = vst.msk [vmem:[#allocation2 + $0x218] sm:$0x3] %vm928_vm2, %v4067_v50 }
  0x3c   : > { %980 = vst.msk [vmem:[#allocation2 + $0x238] sm:$0x3] %vm928_vm2, %v4067_v50 }
  0x3d   : > { %943 = vst.msk [vmem:[#allocation2 + $0x6] sm:$0x3] %vm928_vm2, %v4067_v50 }
  0x3e   : > { %944 = vst.msk [vmem:[#allocation2 + $0x26] sm:$0x3] %vm928_vm2, %v4067_v50 }
  0x3f   : > { %961 = vst.msk [vmem:[#allocation2 + $0x246] sm:$0x3] %vm928_vm2, %v4067_v50 }
  0x40   : > { %962 = vst.msk [vmem:[#allocation2 + $0x266] sm:$0x3] %vm928_vm2, %v4067_v50 }
  0x41   : > { %963 = vst.msk [vmem:[#allocation2 + $0x18] sm:$0x3] %vm928_vm2, %v4067_v50 }
  0x42   : > { %964 = vst.msk [vmem:[#allocation2 + $0x38] sm:$0x3] %vm928_vm2, %v4067_v50 }
  0x43   : > { %3701 = vmatmul.msk.bf16.gmra.mxu0 %vm329_vm1, %v315_v46  ;;  %981 = vst.msk [vmem:[#allocation2 + $0x258] sm:$0x3] %vm928_vm2, %v4067_v50 }
  0x44   : > { %3705 = vmatmul.msk.bf16.gmra.mxu1 %vm329_vm1, %v319_v47  ;;  %982 = vst.msk [vmem:[#allocation2 + $0x278] sm:$0x3] %vm928_vm2, %v4067_v50 }
  0x45   : > { %3709 = vmatmul.msk.bf16.gmra.mxu2 %vm329_vm1, %v323_v48 }
  0x46   : > { %3713 = vmatmul.msk.bf16.gmra.mxu3 %vm329_vm1, %v327_v49 }
  0x90   : > { %v391_v53 = vpop.f32.mrf.mxu0 }
  0x91   : > { %v475_v54 = vmul.f32 %v4183_v51, %v391_v53  ;;  %v411_v55 = vpop.f32.mrf.mxu1 }
  0x92   : > { %v483_v56 = vmul.f32 %v4183_v51, %v411_v55 }
  0x93   : > { %v4205_v57 = vadd.f32 %v4192_v52, %v475_v54 }
  0x94   : > { %v4210_v58 = vadd.f32 %v4192_v52, %v483_v56 }
  0x95   : > { %v543_v59 = vsub.f32 0.0, %v4205_v57 }
  0x96   : > { %v551_v60 = vsub.f32 0.0, %v4210_v58 }
  0x97   : > { %v575_v61 = vmul.f32 1.442695, %v543_v59 }
  0x98   : > { %v431_v62 = vpop.f32.mrf.mxu2  ;;  %v591_v63 = vmul.f32 1.442695, %v551_v60  ;;  %v393_v1 = vpop.f32.mrf.mxu0 }
  0x99   : > { %v491_v0 = vmul.f32 %v4183_v51, %v431_v62  ;;  %3801 = vpow2.f32 %v575_v61  ;;  %v476_v2 = vmul.f32 %v4183_v51, %v393_v1  ;;  %v413_v3 = vpop.f32.mrf.mxu1  ;;  %v4239_v7 = vpop.f32.mrf.mxu3 }
  0x9a   : > { %3803 = vpow2.f32 %v591_v63  ;;  %v484_v5 = vmul.f32 %v4183_v51, %v413_v3 }
  0x9b   : > { %v4229_v4 = vadd.f32 %v4192_v52, %v491_v0  ;;  %v4237_v6 = vadd.f32 %v4192_v52, %v476_v2 }
  0x9c   : > { %v4245_v9 = vadd.f32 %v4192_v52, %v484_v5 }
  0x9d   : > { %v559_v8 = vsub.f32 0.0, %v4229_v4  ;;  %v544_v10 = vsub.f32 0.0, %v4237_v6 }
  0x9e   : > { %v552_v12 = vsub.f32 0.0, %v4245_v9 }
  0x9f   : > { %v607_v11 = vmul.f32 1.442695, %v559_v8  ;;  %v3802_v13 = vpop.eup %3801  ;;  %v577_v14 = vmul.f32 1.442695, %v544_v10 }
  0xa0   : > { %v433_v15 = vpop.f32.mrf.mxu2  ;;  %v3804_v16 = vpop.eup %3803  ;;  %v639_v17 = vadd.f32 1.0, %v3802_v13  ;;  %v593_v22 = vmul.f32 1.442695, %v552_v12 }
  0xa1   : > { %3805 = vpow2.f32 %v607_v11  ;;  %v396_v18 = vpop.f32.mrf.mxu0  ;;  %v647_v19 = vadd.f32 1.0, %v3804_v16  ;;  %v416_v21 = vpop.f32.mrf.mxu1  ;;  %v492_v38 = vmul.f32 %v4183_v51, %v433_v15 }
  0xa2   : > { %3807 = vpow2.f32 %v577_v14  ;;  %v477_v20 = vmul.f32 %v4183_v51, %v396_v18  ;;  %v485_v23 = vmul.f32 %v4183_v51, %v416_v21  ;;  %v4276_v27 = vpop.f32.mrf.mxu3  ;;  %v499_v21 = vmul.f32 %v4183_v51, %v4239_v7 }
  0xa3   : > { %3809 = vrcp.f32 %v639_v17  ;;  %v4302_v46 = vadd.f32 %v4192_v52, %v492_v38 }
  0xa4   : > { %3811 = vrcp.f32 %v647_v19  ;;  %v4266_v24 = vadd.f32 %v4192_v52, %v477_v20  ;;  %v4271_v25 = vadd.f32 %v4192_v52, %v485_v23 }
  0xa5   : > { %3813 = vpow2.f32 %v593_v22  ;;  %v560_v53 = vsub.f32 0.0, %v4302_v46 }
  0xa6   : > { %v545_v26 = vsub.f32 0.0, %v4266_v24  ;;  %v553_v30 = vsub.f32 0.0, %v4271_v25 }
  0xa7   : > { %v3806_v29 = vpop.eup %3805  ;;  %v609_v56 = vmul.f32 1.442695, %v560_v53 }
  0xa8   : > { %v3808_v32 = vpop.eup %3807  ;;  %v655_v33 = vadd.f32 1.0, %v3806_v29  ;;  %v579_v34 = vmul.f32 1.442695, %v545_v26  ;;  %v4287_v35 = vpop.f32.mrf.mxu2  ;;  %v595_v39 = vmul.f32 1.442695, %v553_v30 }
  0xa9   : > { %v3810_v36 = vpop.eup %3809  ;;  %v640_v37 = vadd.f32 1.0, %v3808_v32  ;;  %v398_v40 = vpop.f32.mrf.mxu0  ;;  %v4368_v32 = vadd.f32 %v4192_v52, %v499_v21 }
  0xaa   : > { %v3812_v41 = vpop.eup %3811  ;;  %v703_v42 = vmul.f32 %v3810_v36, %v4205_v57  ;;  %3815 = vrcp.f32 %v655_v33  ;;  %v478_v43 = vmul.f32 %v4183_v51, %v398_v40  ;;  %v418_v44 = vpop.f32.mrf.mxu1 }
  0xab   : > { %v4297_v45 = vmul.f32 %v3812_v41, %v4210_v58  ;;  %3817 = vrcp.f32 %v640_v37  ;;  %v486_v47 = vmul.f32 %v4183_v51, %v418_v44  ;;  %v3814_v49 = vpop.eup %3813  ;;  %v4325_v62 = vpop.f32.mrf.mxu3  ;;  %v567_v40 = vsub.f32 0.0, %v4368_v32 }
  0xac   : > { %984 = vst.msk [vmem:[#allocation2 + $0x48] sm:$0xff] %vm329_vm1, %v703_v42  ;;  %3819 = vpow2.f32 %v579_v34  ;;  %v4307_v48 = vadd.f32 %v4192_v52, %v478_v43  ;;  %v648_v59 = vadd.f32 1.0, %v3814_v49  ;;  %v493_v41 = vmul.f32 %v4183_v51, %v4287_v35 }
  0xad   : > { %992 = vst.msk [vmem:[#allocation2 + $0xc8] sm:$0xff] %vm329_vm1, %v4297_v45  ;;  %3821 = vpow2.f32 %v595_v39  ;;  %v4313_v54 = vadd.f32 %v4192_v52, %v486_v47  ;;  %v623_v44 = vmul.f32 1.442695, %v567_v40 }
  0xae   : > { %v546_v55 = vsub.f32 0.0, %v4307_v48  ;;  %3823 = vpow2.f32 %v609_v56  ;;  %v4392_v47 = vadd.f32 %v4192_v52, %v493_v41 }
  0xaf   : > { %v554_v57 = vsub.f32 0.0, %v4313_v54 }
  0xb0   : > { %v3816_v58 = vpop.eup %3815  ;;  %v581_v60 = vmul.f32 1.442695, %v546_v55  ;;  %v4323_v61 = vpop.f32.mrf.mxu2 }
  0xb1   : > { %v3818_v63 = vpop.eup %3817  ;;  %v4328_v0 = vmul.f32 %v3816_v58, %v4229_v4  ;;  %v597_v1 = vmul.f32 1.442695, %v554_v57  ;;  %v401_v2 = vpop.f32.mrf.mxu0  ;;  %v561_v57 = vsub.f32 0.0, %v4392_v47  ;;  %v500_v58 = vmul.f32 %v4183_v51, %v4276_v27 }
  0xb2   : > { %v3820_v3 = vpop.eup %3819  ;;  %v4335_v5 = vmul.f32 %v3818_v63, %v4237_v6  ;;  %3825 = vpow2.f32 %v581_v60  ;;  %v479_v8 = vmul.f32 %v4183_v51, %v401_v2  ;;  %v421_v10 = vpop.f32.mrf.mxu1  ;;  %v494_v60 = vmul.f32 %v4183_v51, %v4323_v61 }
  0xb3   : > { %6482 = vst [vmem:[#allocation4_spill] sm:$0xff] %v4328_v0  ;;  %v3822_v11 = vpop.eup %3821  ;;  %v641_v4 = vadd.f32 1.0, %v3820_v3  ;;  %3827 = vpow2.f32 %v597_v1  ;;  %v487_v12 = vmul.f32 %v4183_v51, %v421_v10  ;;  %v4370_v34 = vpop.f32.mrf.mxu3  ;;  %v611_v27 = vmul.f32 1.442695, %v561_v57 }
  0xb4   : > { %1000 = vst.msk [vmem:[#allocation2 + $0x148] sm:$0xff] %vm329_vm1, %v4328_v0  ;;  %3829 = vrcp.f32 %v648_v59  ;;  %v649_v13 = vadd.f32 1.0, %v3822_v11  ;;  %v4344_v6 = vadd.f32 %v4192_v52, %v479_v8  ;;  %v735_v14 = vpack.c.bf16 %v4335_v5, %v703_v42  ;;  %v3824_v17 = vpop.eup %3823 }
  0xb5   : > { %3831 = vrcp.f32 %v641_v4  ;;  %v4350_v15 = vadd.f32 %v4192_v52, %v487_v12  ;;  %v656_v20 = vadd.f32 1.0, %v3824_v17  ;;  %985 = vst.msk [vmem:[#allocation2 + $0x50] sm:$0xff] %vm329_vm1, %v4335_v5  ;;  %v4426_v3 = vadd.f32 %v4192_v52, %v500_v58 }
  0xb6   : > { %3833 = vrcp.f32 %v649_v13  ;;  %v547_v16 = vsub.f32 0.0, %v4344_v6  ;;  %3714 = vmatmul.msk.bf16.vlgmr.msrb.gmra.mxu1 %vm329_vm1, %v735_v14  ;;  %v4439_v10 = vadd.f32 %v4192_v52, %v494_v60 }
  0xb7   : > { %v555_v18 = vsub.f32 0.0, %v4350_v15  ;;  %3835 = vrcp.f32 %v656_v20 }
  0xb8   : > { %v3826_v19 = vpop.eup %3825  ;;  %v583_v22 = vmul.f32 1.442695, %v547_v16  ;;  %v441_v29 = vpop.f32.mrf.mxu2  ;;  %v562_v17 = vsub.f32 0.0, %v4439_v10 }
  0xb9   : > { %v3828_v23 = vpop.eup %3827  ;;  %v642_v26 = vadd.f32 1.0, %v3826_v19  ;;  %v599_v28 = vmul.f32 1.442695, %v555_v18  ;;  %v403_v30 = vpop.f32.mrf.mxu0  ;;  %v495_v53 = vmul.f32 %v4183_v51, %v441_v29  ;;  %v501_v18 = vmul.f32 %v4183_v51, %v4325_v62 }
  0xba   : > { %v3830_v31 = vpop.eup %3829  ;;  %v650_v33 = vadd.f32 1.0, %v3828_v23  ;;  %v480_v7 = vmul.f32 %v4183_v51, %v403_v30  ;;  %v423_v36 = vpop.f32.mrf.mxu1  ;;  %v613_v30 = vmul.f32 1.442695, %v562_v17 }
  0xbb   : > { %v3832_v37 = vpop.eup %3831  ;;  %3837 = vrcp.f32 %v642_v26  ;;  %v488_v38 = vmul.f32 %v4183_v51, %v423_v36  ;;  %v4384_v42 = vmul.f32 %v3830_v31, %v4245_v9  ;;  %v4421_v63 = vadd.f32 %v4192_v52, %v495_v53  ;;  %v4480_v53 = vld [vmem:[#allocation2 + $0x146] sm:$0xff] }
  0xbc   : > { %v3834_v39 = vpop.eup %3833  ;;  %3839 = vrcp.f32 %v650_v33  ;;  %v4387_v43 = vadd.f32 %v4192_v52, %v480_v7  ;;  %v4400_v9 = vmul.f32 %v3832_v37, %v4266_v24  ;;  %v4460_v62 = vadd.f32 %v4192_v52, %v501_v18 }
  0xbd   : > { %3841 = vpow2.f32 %v583_v22  ;;  %v4395_v35 = vadd.f32 %v4192_v52, %v488_v38  ;;  %v4403_v49 = vmul.f32 %v3834_v39, %v4271_v25  ;;  %v3836_v56 = vpop.eup %3835  ;;  %v563_v11 = vsub.f32 0.0, %v4421_v63  ;;  %993 = vst.msk [vmem:[#allocation2 + $0xd0] sm:$0xff] %vm329_vm1, %v4384_v42 }
  0xbe   : > { %3843 = vpow2.f32 %v599_v28  ;;  %v548_v55 = vsub.f32 0.0, %v4387_v43  ;;  %v4416_v25 = vmul.f32 %v3836_v56, %v4302_v46  ;;  %v569_v37 = vsub.f32 0.0, %v4460_v62  ;;  %986 = vst.msk [vmem:[#allocation2 + $0x68] sm:$0xff] %vm329_vm1, %v4400_v9 }
  0xbf   : > { %3845 = vpow2.f32 %v623_v44  ;;  %v556_v24 = vsub.f32 0.0, %v4395_v35  ;;  %v615_v20 = vmul.f32 1.442695, %v563_v11  ;;  %v502_v38 = vmul.f32 %v4183_v51, %v4370_v34  ;;  %994 = vst.msk [vmem:[#allocation2 + $0xe8] sm:$0xff] %vm329_vm1, %v4403_v49 }
  0xc0   : > { %6483 = vst [vmem:[#allocation5_spill] sm:$0xff] %v4416_v25  ;;  %v585_v1 = vmul.f32 1.442695, %v548_v55  ;;  %v443_v4 = vpop.f32.mrf.mxu2  ;;  %v4482_v55 = vld [vmem:[#allocation2 + $0x147] sm:$0xff]  ;;  %v627_v56 = vmul.f32 1.442695, %v569_v37 }
  0xc1   : > { %v3838_v59 = vpop.eup %3837  ;;  %v4431_v46 = vmul.f32 1.442695, %v556_v24  ;;  %v406_v12 = vpop.f32.mrf.mxu0  ;;  %v496_v16 = vmul.f32 %v4183_v51, %v443_v4  ;;  %1001 = vst.msk [vmem:[#allocation2 + $0x150] sm:$0xff] %vm329_vm1, %v4416_v25  ;;  %v4487_v57 = vadd.f32 %v4192_v52, %v502_v38  ;;  %v1116_v4 = vmax.f32 %v4480_v53, %v4482_v55 }
  0xc2   : > { %v3840_v2 = vpop.eup %3839  ;;  %v4429_v5 = vmul.f32 %v3838_v59, %v4307_v48  ;;  %3847 = vpow2.f32 %v585_v1  ;;  %v568_v48 = vsub.f32 0.0, %v4426_v3  ;;  %v481_v26 = vmul.f32 %v4183_v51, %v406_v12  ;;  %v426_v28 = vpop.f32.mrf.mxu1 }
  0xc3   : > { %v3842_v8 = vpop.eup %3841  ;;  %v4436_v61 = vmul.f32 %v3840_v2, %v4313_v54  ;;  %3849 = vpow2.f32 %v611_v27  ;;  %v461_v54 = vpop.f32.mrf.mxu3  ;;  %v4454_v23 = vadd.f32 %v4192_v52, %v496_v16  ;;  %v489_v50 = vmul.f32 %v4183_v51, %v426_v28 }
  0xc4   : > { %v3844_v13 = vpop.eup %3843  ;;  %v643_v14 = vadd.f32 1.0, %v3842_v8  ;;  %v625_v22 = vmul.f32 1.442695, %v568_v48  ;;  %v503_v33 = vmul.f32 %v4183_v51, %v461_v54  ;;  %v4467_v7 = vadd.f32 %v4192_v52, %v481_v26  ;;  %987 = vst.msk [vmem:[#allocation2 + $0x70] sm:$0xff] %vm329_vm1, %v4429_v5 }
  0xc5   : > { %6484 = vst [vmem:[#allocation6_spill] sm:$0xff] %v4436_v61  ;;  %v651_v19 = vadd.f32 1.0, %v3844_v13  ;;  %v3846_v21 = vpop.eup %3845  ;;  %v564_v31 = vsub.f32 0.0, %v4454_v23  ;;  %v4494_v60 = vadd.f32 %v4192_v52, %v489_v50  ;;  %v570_v27 = vsub.f32 0.0, %v4487_v57  ;;  %v4758_v25 = vld [vmem:[#allocation2 + $0x66] sm:$0xff] }
  0xc6   : > { %3851 = vrcp.f32 %v643_v14  ;;  %v663_v29 = vadd.f32 1.0, %v3846_v21  ;;  %v4478_v44 = vadd.f32 %v4192_v52, %v503_v33  ;;  %v549_v59 = vsub.f32 0.0, %v4467_v7  ;;  %995 = vst.msk [vmem:[#allocation2 + $0xf0] sm:$0xff] %vm329_vm1, %v4436_v61 }
  0xc7   : > { %3853 = vrcp.f32 %v651_v19  ;;  %v617_v41 = vmul.f32 1.442695, %v564_v31  ;;  %v736_v8 = vpack.c.bf16 %v4429_v5, %v4400_v9  ;;  %v629_v14 = vmul.f32 1.442695, %v570_v27 }
  0xc8   : > { %3855 = vpow2.f32 %v625_v22  ;;  %v3848_v36 = vpop.eup %3847  ;;  %v571_v24 = vsub.f32 0.0, %v4478_v44  ;;  %v446_v5 = vpop.f32.mrf.mxu2  ;;  %v587_v22 = vmul.f32 1.442695, %v549_v59  ;;  %v557_v26 = vsub.f32 0.0, %v4494_v60  ;;  %v4548_v27 = vld [vmem:[#allocation2 + $0x151] sm:$0xff] }
  0xc9   : > { %3857 = vrcp.f32 %v663_v29  ;;  %v3850_v39 = vpop.eup %3849  ;;  %v644_v40 = vadd.f32 1.0, %v3848_v36  ;;  %3715 = vmatmul.msk.bf16.gmra.mxu1 %vm329_vm1, %v736_v8  ;;  %v408_v18 = vpop.f32.mrf.mxu0  ;;  %v1157_v36 = vld [vmem:[#allocation2 + $0x150] sm:$0xff] }
  0xca   : > { %3859 = vpow2.f32 %v613_v30  ;;  %v657_v34 = vadd.f32 1.0, %v3850_v39  ;;  %v631_v9 = vmul.f32 1.442695, %v571_v24  ;;  %v482_v50 = vmul.f32 %v4183_v51, %v408_v18 }
  0xcb   : > { %3861 = vpow2.f32 %v615_v20  ;;  %v463_v13 = vpop.f32.mrf.mxu3  ;;  %v1037_v20 = vld [vmem:[#allocation2 + $0x14e] sm:$0xff]  ;;  %v603_v24 = vmul.f32 1.442695, %v557_v26 }
  0xcc   : > { %v3852_v58 = vpop.eup %3851  ;;  %3863 = vrcp.f32 %v644_v40  ;;  %v504_v17 = vmul.f32 %v4183_v51, %v463_v13  ;;  %v4760_v0 = vld [vmem:[#allocation2 + $0x6e] sm:$0xff] }
  0xcd   : > { %v3854_v1 = vpop.eup %3853  ;;  %3865 = vrcp.f32 %v657_v34  ;;  %v4499_v2 = vmul.f32 %v3852_v58, %v4344_v6 }
  0xce   : > { %v3856_v11 = vpop.eup %3855  ;;  %3867 = vpow2.f32 %v627_v56  ;;  %v4509_v12 = vmul.f32 %v3854_v1, %v4350_v15  ;;  %v497_v15 = vmul.f32 %v4183_v51, %v446_v5  ;;  %v4532_v38 = vadd.f32 %v4192_v52, %v504_v17  ;;  %v1236_v1 = vld [vmem:[#allocation2 + $0x149] sm:$0xff] }
  0xcf   : > { %v3858_v48 = vpop.eup %3857  ;;  %v664_v6 = vadd.f32 1.0, %v3856_v11  ;;  %988 = vst.msk [vmem:[#allocation2 + $0x88] sm:$0xff] %vm329_vm1, %v4499_v2  ;;  %3869 = vpow2.f32 %v4431_v46  ;;  %v1077_v46 = vld [vmem:[#allocation2 + $0x14f] sm:$0xff]  ;;  %v4551_v11 = vadd.f32 %v4192_v52, %v482_v50 }
  0xd0   : > { %6485 = vst [vmem:[#allocation7_spill] sm:$0xff] %v4509_v12  ;;  %v3860_v16 = vpop.eup %3859  ;;  %v4516_v54 = vmul.f32 %v3858_v48, %v4368_v32  ;;  %3871 = vpow2.f32 %v617_v41  ;;  %v1156_v32 = vld [vmem:[#allocation2 + $0x148] sm:$0xff]  ;;  %v1117_v29 = vmax.f32 %v1037_v20, %v1077_v46  ;;  %v4526_v31 = vadd.f32 %v4192_v52, %v497_v15  ;;  %v448_v20 = vpop.f32.mrf.mxu2 }
  0xd1   : > { %996 = vst.msk [vmem:[#allocation2 + $0x108] sm:$0xff] %vm329_vm1, %v4509_v12  ;;  %v3862_v19 = vpop.eup %3861  ;;  %3873 = vrcp.f32 %v664_v6  ;;  %v658_v21 = vadd.f32 1.0, %v3860_v16  ;;  %v4539_v55 = vmax.f32 %v1116_v4, %v1156_v32  ;;  %v498_v50 = vmul.f32 %v4183_v51, %v448_v20  ;;  %v4849_v12 = vld [vmem:[#allocation2 + $0x49] sm:$0xff] }
  0xd2   : > { %6486 = vst [vmem:[#allocation8_spill] sm:$0xff] %v4516_v54  ;;  %v3864_v28 = vpop.eup %3863  ;;  %v659_v30 = vadd.f32 1.0, %v3862_v19  ;;  %3875 = vpow2.f32 %v629_v14  ;;  %v565_v41 = vsub.f32 0.0, %v4526_v31  ;;  %v4544_v58 = vmax.f32 %v1117_v29, %v1157_v36  ;;  %v3730_v14 = vld [vmem:[%s6423_s4 + $0x4] sm:$0xf] }
  0xd3   : > { %1008 = vst.msk [vmem:[#allocation2 + $0x1c8] sm:$0xff] %vm329_vm1, %v4516_v54  ;;  %v3866_v33 = vpop.eup %3865  ;;  %3877 = vrcp.f32 %v658_v21  ;;  %v4529_v37 = vmul.f32 %v3864_v28, %v4387_v43  ;;  %v572_v43 = vsub.f32 0.0, %v4532_v38  ;;  %v466_v5 = vpop.f32.mrf.mxu3  ;;  %v1603_v19 = vsel %vm378_vm0, %v3730_v14, 0 }
  0xd4   : > { %v3868_v39 = vpop.eup %3867  ;;  %v4536_v40 = vmul.f32 %v3866_v33, %v4392_v47  ;;  %3879 = vrcp.f32 %v659_v30  ;;  %v619_v48 = vmul.f32 1.442695, %v565_v41  ;;  %v1276_v21 = vmax.f32 %v4539_v55, %v1236_v1  ;;  %1612 = vmatpush.bf16.msrb.mxu2 %v1603_v19  ;;  %v1316_v41 = vld [vmem:[#allocation2 + $0x14a] sm:$0xff] }
  0xd5   : > { %v3870_v53 = vpop.eup %3869  ;;  %v665_v34 = vadd.f32 1.0, %v3868_v39  ;;  %989 = vst.msk [vmem:[#allocation2 + $0x90] sm:$0xff] %vm329_vm1, %v4529_v37  ;;  %3881 = vpow2.f32 %v631_v9  ;;  %v633_v6 = vmul.f32 1.442695, %v572_v43  ;;  %v428_v9 = vpop.f32.mrf.mxu1  ;;  %v505_v43 = vmul.f32 %v4183_v51, %v466_v5 }
  0xd6   : > { %6487 = vst [vmem:[#allocation9_spill] sm:$0xff] %v4536_v40  ;;  %v3872_v56 = vpop.eup %3871  ;;  %v652_v47 = vadd.f32 1.0, %v3870_v53  ;;  %3883 = vpow2.f32 %v587_v22  ;;  %v1277_v22 = vmax.f32 %v4544_v58, %v4548_v27  ;;  %v490_v30 = vmul.f32 %v4183_v51, %v428_v9  ;;  %v1317_v58 = vld [vmem:[#allocation2 + $0x152] sm:$0xff] }
  0xd7   : > { %1002 = vst.msk [vmem:[#allocation2 + $0x168] sm:$0xff] %vm329_vm1, %v4536_v40  ;;  %v3874_v59 = vpop.eup %3873  ;;  %3885 = vrcp.f32 %v665_v34  ;;  %v660_v8 = vadd.f32 1.0, %v3872_v56  ;;  %v4592_v1 = vadd.f32 %v4192_v52, %v498_v50  ;;  %v4601_v14 = vmax.f32 %v1276_v21, %v1316_v41  ;;  %v1332_v40 = vld [vmem:[#allocation2 + $0x24a] sm:$0xff] }
  0xd8   : > { %v3876_v4 = vpop.eup %3875  ;;  %v4554_v13 = vmul.f32 %v3874_v59, %v4426_v3  ;;  %3887 = vrcp.f32 %v652_v47  ;;  %v550_v3 = vsub.f32 0.0, %v4551_v11  ;;  %v4585_v34 = vadd.f32 %v4192_v52, %v490_v30 }
  0xd9   : > { %v3878_v16 = vpop.eup %3877  ;;  %v666_v18 = vadd.f32 1.0, %v3876_v4  ;;  %3889 = vrcp.f32 %v660_v8  ;;  %6493 = vst [vmem:[#allocation15_spill] sm:$0xff] %v4601_v14  ;;  %v737_v20 = vpack.c.bf16 %v4529_v37, %v4499_v2 }
  0xda   : > { %6488 = vst [vmem:[#allocation10_spill] sm:$0xff] %v4554_v13  ;;  %v4559_v15 = vld [vmem:[#allocation2 + $0x1c6] sm:$0xff]  ;;  %v3880_v46 = vpop.eup %3879  ;;  %v4571_v26 = vmul.f32 %v3878_v16, %v4439_v10  ;;  %3891 = vpow2.f32 %v603_v24  ;;  %v589_v10 = vmul.f32 1.442695, %v550_v3  ;;  %v558_v4 = vsub.f32 0.0, %v4585_v34 }
  0xdb   : > { %v4561_v17 = vld [vmem:[#allocation2 + $0x1c7] sm:$0xff]  ;;  %1009 = vst.msk [vmem:[#allocation2 + $0x1d0] sm:$0xff] %vm329_vm1, %v4554_v13  ;;  %v3882_v28 = vpop.eup %3881  ;;  %v4576_v29 = vmul.f32 %v3880_v46, %v4421_v63  ;;  %3893 = vrcp.f32 %v666_v18  ;;  %v4609_v16 = vmax.f32 %v1277_v22, %v1317_v58  ;;  %v468_v30 = vpop.f32.mrf.mxu3  ;;  %3716 = vmatmul.msk.bf16.gmra.mxu1 %vm329_vm1, %v737_v20 }
  0xdc   : > { %6489 = vst [vmem:[#allocation11_spill] sm:$0xff] %v4571_v26  ;;  %v1124_v32 = vmax.f32 %v4559_v15, %v4561_v17  ;;  %v3884_v33 = vpop.eup %3883  ;;  %v667_v36 = vadd.f32 1.0, %v3882_v28  ;;  %3895 = vpow2.f32 %v619_v48  ;;  %v4599_v48 = vadd.f32 %v4192_v52, %v505_v43  ;;  %v1164_v9 = vld [vmem:[#allocation2 + $0x1c8] sm:$0xff] }
  0xdd   : > { %6490 = vst [vmem:[#allocation12_spill] sm:$0xff] %v4576_v29  ;;  %v3886_v39 = vpop.eup %3885  ;;  %v645_v63 = vadd.f32 1.0, %v3884_v33  ;;  %3897 = vpow2.f32 %v633_v6  ;;  %v605_v22 = vmul.f32 1.442695, %v558_v4  ;;  %v4623_v33 = vld [vmem:[#allocation2 + $0x6] sm:$0xff] }
  0xde   : > { %1003 = vst.msk [vmem:[#allocation2 + $0x170] sm:$0xff] %vm329_vm1, %v4571_v26  ;;  %v1038_v53 = vld [vmem:[#allocation2 + $0x166] sm:$0xff]  ;;  %v3888_v56 = vpop.eup %3887  ;;  %v4589_v59 = vmul.f32 %v3886_v39, %v4460_v62  ;;  %3899 = vrcp.f32 %v667_v36  ;;  %v573_v28 = vsub.f32 0.0, %v4599_v48  ;;  %v4627_v50 = vmax.f32 %v1124_v32, %v1164_v9 }
  0xdf   : > { %v1078_v55 = vld [vmem:[#allocation2 + $0x167] sm:$0xff]  ;;  %1004 = vst.msk [vmem:[#allocation2 + $0x188] sm:$0xff] %vm329_vm1, %v4576_v29  ;;  %v3890_v27 = vpop.eup %3889  ;;  %v4595_v8 = vmul.f32 %v3888_v56, %v4395_v35  ;;  %3901 = vrcp.f32 %v645_v63  ;;  %v566_v35 = vsub.f32 0.0, %v4592_v1 }
  0xe0   : > { %v1118_v47 = vmax.f32 %v1038_v53, %v1078_v55  ;;  %v1158_v24 = vld [vmem:[#allocation2 + $0x168] sm:$0xff]  ;;  %6491 = vst [vmem:[#allocation13_spill] sm:$0xff] %v4589_v59  ;;  %v3892_v6 = vpop.eup %3891  ;;  %v4606_v62 = vmul.f32 %v3890_v27, %v4454_v23  ;;  %3903 = vpow2.f32 %v589_v10 }
  0xe1   : > { %6492 = vst [vmem:[#allocation14_spill] sm:$0xff] %v4595_v8  ;;  %v3894_v5 = vpop.eup %3893  ;;  %v653_v3 = vadd.f32 1.0, %v3892_v6  ;;  %v4625_v36 = vld [vmem:[#allocation2 + $0x7] sm:$0xff]  ;;  %v621_v41 = vmul.f32 1.442695, %v566_v35  ;;  %v506_v35 = vmul.f32 %v4183_v51, %v468_v30 }
  0xe2   : > { %1010 = vst.msk [vmem:[#allocation2 + $0x1e8] sm:$0xff] %vm329_vm1, %v4589_v59  ;;  %v4611_v15 = vmax.f32 %v1118_v47, %v1158_v24  ;;  %v1045_v17 = vld [vmem:[#allocation2 + $0x1ce] sm:$0xff]  ;;  %v3896_v23 = vpop.eup %3895  ;;  %v4618_v21 = vmul.f32 %v3894_v5, %v4487_v57  ;;  %v1054_v59 = vld [vmem:[#allocation2 + $0x266] sm:$0xff] }
  0xe3   : > { %6494 = vst [vmem:[#allocation16_spill] sm:$0xff] %v4606_v62  ;;  %v1085_v18 = vld [vmem:[#allocation2 + $0x1cf] sm:$0xff]  ;;  %v3898_v10 = vpop.eup %3897  ;;  %3905 = vrcp.f32 %v653_v3  ;;  %v661_v57 = vadd.f32 1.0, %v3896_v23  ;;  %v1094_v29 = vld [vmem:[#allocation2 + $0x267] sm:$0xff] }
  0xe4   : > { %v1165_v19 = vld [vmem:[#allocation2 + $0x1d0] sm:$0xff]  ;;  %997 = vst.msk [vmem:[#allocation2 + $0x110] sm:$0xff] %vm329_vm1, %v4595_v8  ;;  %v1125_v46 = vmax.f32 %v1045_v17, %v1085_v18  ;;  %v3900_v53 = vpop.eup %3899  ;;  %v668_v32 = vadd.f32 1.0, %v3898_v10  ;;  %3907 = vpow2.f32 %v605_v22 }
  0xe5   : > { %6495 = vst [vmem:[#allocation17_spill] sm:$0xff] %v4618_v21  ;;  %v4629_v2 = vld [vmem:[#allocation2 + $0x1c9] sm:$0xff]  ;;  %v4634_v63 = vld [vmem:[#allocation2 + $0x1d1] sm:$0xff]  ;;  %v3902_v47 = vpop.eup %3901  ;;  %v4640_v9 = vmul.f32 %v3900_v53, %v4478_v44  ;;  %3909 = vrcp.f32 %v661_v57 }
  0xe6   : > { %1005 = vst.msk [vmem:[#allocation2 + $0x190] sm:$0xff] %vm329_vm1, %v4606_v62  ;;  %v1039_v37 = vld [vmem:[#allocation2 + $0x16e] sm:$0xff]  ;;  %v4632_v55 = vmax.f32 %v1125_v46, %v1165_v19  ;;  %v1040_v6 = vld [vmem:[#allocation2 + $0x186] sm:$0xff]  ;;  %v3904_v5 = vpop.eup %3903  ;;  %v4644_v20 = vmul.f32 %v3902_v47, %v4467_v7  ;;  %3911 = vrcp.f32 %v668_v32  ;;  %v1284_v23 = vmax.f32 %v4627_v50, %v4629_v2 }
  0xe7   : > { %v1079_v39 = vld [vmem:[#allocation2 + $0x16f] sm:$0xff]  ;;  %1011 = vst.msk [vmem:[#allocation2 + $0x1f0] sm:$0xff] %vm329_vm1, %v4618_v21  ;;  %v1080_v19 = vld [vmem:[#allocation2 + $0x187] sm:$0xff]  ;;  %v646_v51 = vadd.f32 1.0, %v3904_v5  ;;  %3913 = vpow2.f32 %v621_v41  ;;  %v635_v50 = vmul.f32 1.442695, %v573_v28 }
  0xe8   : > { %v1119_v43 = vmax.f32 %v1039_v37, %v1079_v39  ;;  %v1159_v56 = vld [vmem:[#allocation2 + $0x170] sm:$0xff]  ;;  %6496 = vst [vmem:[#allocation18_spill] sm:$0xff] %v4640_v9  ;;  %v1160_v3 = vld [vmem:[#allocation2 + $0x188] sm:$0xff]  ;;  %v1120_v10 = vmax.f32 %v1040_v6, %v1080_v19  ;;  %v1285_v7 = vmax.f32 %v4632_v55, %v4634_v63 }
  0xe9   : > { %v1238_v58 = vld [vmem:[#allocation2 + $0x169] sm:$0xff]  ;;  %v1239_v24 = vld [vmem:[#allocation2 + $0x171] sm:$0xff]  ;;  %1012 = vst.msk [vmem:[#allocation2 + $0x208] sm:$0xff] %vm329_vm1, %v4640_v9  ;;  %v3906_v2 = vpop.eup %3905  ;;  %3915 = vrcp.f32 %v646_v51 }
  0xea   : > { %v1278_v27 = vmax.f32 %v4611_v15, %v1238_v58  ;;  %v1318_v4 = vld [vmem:[#allocation2 + $0x16a] sm:$0xff]  ;;  %v1199_v17 = vmax.f32 %v1119_v43, %v1159_v56  ;;  %v1319_v18 = vld [vmem:[#allocation2 + $0x172] sm:$0xff]  ;;  %990 = vst.msk [vmem:[#allocation2 + $0xa8] sm:$0xff] %vm329_vm1, %v4644_v20  ;;  %v4658_v58 = vmax.f32 %v1120_v10, %v1160_v3  ;;  %v3908_v41 = vpop.eup %3907  ;;  %v4665_v5 = vmul.f32 %v3906_v2, %v4494_v60 }
  0xeb   : > { %v1046_v44 = vld [vmem:[#allocation2 + $0x1e6] sm:$0xff]  ;;  %v1033_v39 = vld [vmem:[#allocation2 + $0x10e] sm:$0xff]  ;;  %3917 = vpow2.f32 %v635_v50 }
  0xec   : > { %v1086_v46 = vld [vmem:[#allocation2 + $0x1e7] sm:$0xff]  ;;  %v1279_v30 = vmax.f32 %v1199_v17, %v1239_v24  ;;  %v1073_v57 = vld [vmem:[#allocation2 + $0x10f] sm:$0xff]  ;;  %v4656_v56 = vmax.f32 %v1278_v27, %v1318_v4  ;;  %6498 = vst [vmem:[#allocation20_spill] sm:$0xff] %v4665_v5  ;;  %v3910_v4 = vpop.eup %3909 }
  0xed   : > { %v1166_v22 = vld [vmem:[#allocation2 + $0x1e8] sm:$0xff]  ;;  %v1126_v37 = vmax.f32 %v1046_v44, %v1086_v46  ;;  %v1325_v43 = vld [vmem:[#allocation2 + $0x1d2] sm:$0xff]  ;;  %v1113_v32 = vmax.f32 %v1033_v39, %v1073_v57  ;;  %v654_v46 = vadd.f32 1.0, %v3908_v41  ;;  %v3912_v10 = vpop.eup %3911  ;;  %998 = vst.msk [vmem:[#allocation2 + $0x128] sm:$0xff] %vm329_vm1, %v4665_v5  ;;  %v4681_v50 = vmul.f32 %v3910_v4, %v4526_v31 }
  0xee   : > { %v1324_v53 = vld [vmem:[#allocation2 + $0x1ca] sm:$0xff]  ;;  %v4660_v47 = vmax.f32 %v1279_v30, %v1319_v18  ;;  %v4676_v60 = vmax.f32 %v1285_v7, %v1325_v43  ;;  %v3914_v2 = vpop.eup %3913  ;;  %v4685_v7 = vmul.f32 %v3912_v10, %v4532_v38  ;;  %v1396_v38 = vmax.f32 %v4601_v14, %v4656_v56  ;;  %v1313_v10 = vld [vmem:[#allocation2 + $0x112] sm:$0xff] }
  0xef   : > { %v4662_v55 = vmax.f32 %v1126_v37, %v1166_v22  ;;  %v1153_v63 = vld [vmem:[#allocation2 + $0x110] sm:$0xff]  ;;  %v4672_v22 = vadd.f32 %v4192_v52, %v506_v35  ;;  %v4674_v51 = vmax.f32 %v1284_v23, %v1324_v53  ;;  %6499 = vst [vmem:[#allocation21_spill] sm:$0xff] %v4681_v50  ;;  %3919 = vrcp.f32 %v654_v46  ;;  %v4687_v53 = vld [vmem:[#allocation2 + $0x26] sm:$0xff] }
  0xf0   : > { %6497 = vst [vmem:[#allocation19_spill] sm:$0xff] %v4660_v47  ;;  %v1041_v24 = vld [vmem:[#allocation2 + $0x18e] sm:$0xff]  ;;  %v1193_v44 = vmax.f32 %v1113_v32, %v1153_v63  ;;  %v1397_v46 = vmax.f32 %v4609_v16, %v4660_v47  ;;  %v1052_v9 = vld [vmem:[#allocation2 + $0x246] sm:$0xff] }
  0xf1   : > { %v1081_v6 = vld [vmem:[#allocation2 + $0x18f] sm:$0xff]  ;;  %6500 = vst [vmem:[#allocation22_spill] sm:$0xff] %v4685_v7  ;;  %v4689_v43 = vld [vmem:[#allocation2 + $0x27] sm:$0xff] }
  0xf2   : > { %v4667_v28 = vld [vmem:[#allocation2 + $0xe] sm:$0xff]  ;;  %v1121_v18 = vmax.f32 %v1041_v24, %v1081_v6  ;;  %1006 = vst.msk [vmem:[#allocation2 + $0x1a8] sm:$0xff] %vm329_vm1, %v4681_v50 }
  0xf3   : > { %v4669_v27 = vld [vmem:[#allocation2 + $0xf] sm:$0xff]  ;;  %1013 = vst.msk [vmem:[#allocation2 + $0x210] sm:$0xff] %vm329_vm1, %v4685_v7  ;;  %v1092_v50 = vld [vmem:[#allocation2 + $0x247] sm:$0xff] }
  0xf4   : > { %v1047_v17 = vld [vmem:[#allocation2 + $0x1ee] sm:$0xff] }
  0xf5   : > { %v1087_v19 = vld [vmem:[#allocation2 + $0x1ef] sm:$0xff]  ;;  %v1064_v14 = vld [vmem:[#allocation2 + $0x87] sm:$0xff] }
  0xf6   : > { %v1167_v3 = vld [vmem:[#allocation2 + $0x1f0] sm:$0xff]  ;;  %v1127_v30 = vmax.f32 %v1047_v17, %v1087_v19  ;;  %v662_v19 = vadd.f32 1.0, %v3914_v2 }
  0xf7   : > { %v1246_v37 = vld [vmem:[#allocation2 + $0x1e9] sm:$0xff]  ;;  %v1247_v39 = vld [vmem:[#allocation2 + $0x1f1] sm:$0xff] }
  0xf8   : > { %v1233_v57 = vld [vmem:[#allocation2 + $0x111] sm:$0xff]  ;;  %v1286_v32 = vmax.f32 %v4662_v55, %v1246_v37  ;;  %v1240_v23 = vld [vmem:[#allocation2 + $0x189] sm:$0xff]  ;;  %v1207_v63 = vmax.f32 %v1127_v30, %v1167_v3  ;;  %3921 = vrcp.f32 %v662_v19  ;;  %v1132_v19 = vmax.f32 %v1052_v9, %v1092_v50 }
  0xf9   : > { %v1326_v52 = vld [vmem:[#allocation2 + $0x1ea] sm:$0xff]  ;;  %v1273_v35 = vmax.f32 %v1193_v44, %v1233_v57  ;;  %v1327_v24 = vld [vmem:[#allocation2 + $0x1f2] sm:$0xff]  ;;  %v1280_v4 = vmax.f32 %v4658_v58, %v1240_v23  ;;  %v3916_v44 = vpop.eup %3915  ;;  %v574_v58 = vsub.f32 0.0, %v4672_v22 }
  0xfa   : > { %v1161_v41 = vld [vmem:[#allocation2 + $0x190] sm:$0xff]  ;;  %v1048_v3 = vld [vmem:[#allocation2 + $0x206] sm:$0xff]  ;;  %v3918_v57 = vpop.eup %3917  ;;  %v1287_v2 = vmax.f32 %v1207_v63, %v1247_v39  ;;  %v4706_v13 = vmul.f32 %v3916_v44, %v4551_v11  ;;  %v4708_v26 = vmax.f32 %v1286_v32, %v1326_v52 }
  0xfb   : > { %v1201_v6 = vmax.f32 %v1121_v18, %v1161_v41  ;;  %v1241_v31 = vld [vmem:[#allocation2 + $0x191] sm:$0xff]  ;;  %v1088_v30 = vld [vmem:[#allocation2 + $0x207] sm:$0xff]  ;;  %v669_v54 = vadd.f32 1.0, %v3918_v57  ;;  %v637_v7 = vmul.f32 1.442695, %v574_v58  ;;  %v4710_v37 = vmax.f32 %v1273_v35, %v1313_v10  ;;  %v3920_v11 = vpop.eup %3919 }
  0xfc   : > { %v1320_v17 = vld [vmem:[#allocation2 + $0x18a] sm:$0xff]  ;;  %v1321_v55 = vld [vmem:[#allocation2 + $0x192] sm:$0xff]  ;;  %v1128_v15 = vmax.f32 %v1048_v3, %v1088_v30  ;;  %991 = vst.msk [vmem:[#allocation2 + $0xb0] sm:$0xff] %vm329_vm1, %v4706_v13  ;;  %v4726_v44 = vmul.f32 %v3920_v11, %v4585_v34 }
  0xfd   : > { %v1168_v18 = vld [vmem:[#allocation2 + $0x208] sm:$0xff]  ;;  %v1281_v41 = vmax.f32 %v1201_v6, %v1241_v31  ;;  %v4703_v23 = vmax.f32 %v1280_v4, %v1320_v17  ;;  %v4716_v17 = vmax.f32 %v1287_v2, %v1327_v24  ;;  %3923 = vrcp.f32 %v669_v54  ;;  %v1173_v10 = vld [vmem:[#allocation2 + $0x250] sm:$0xff] }
  0xfe   : > { %v1053_v21 = vld [vmem:[#allocation2 + $0x24e] sm:$0xff]  ;;  %6502 = vst [vmem:[#allocation24_spill] sm:$0xff] %v4726_v44  ;;  %v1042_v30 = vld [vmem:[#allocation2 + $0x1a6] sm:$0xff]  ;;  %3925 = vpow2.f32 %v637_v7  ;;  %v1134_v54 = vmax.f32 %v1054_v59, %v1094_v29  ;;  %v3922_v29 = vpop.eup %3921 }
  0xff   : > { %6501 = vst [vmem:[#allocation23_spill] sm:$0xff] %v4703_v23  ;;  %v1093_v62 = vld [vmem:[#allocation2 + $0x24f] sm:$0xff]  ;;  %v4712_v39 = vmax.f32 %v1281_v41, %v1321_v55  ;;  %v4723_v35 = vmax.f32 %v1396_v38, %v4703_v23  ;;  %v1208_v55 = vmax.f32 %v1128_v15, %v1168_v18  ;;  %v1082_v58 = vld [vmem:[#allocation2 + $0x1a7] sm:$0xff] }
 0x100   : > { %v1055_v63 = vld [vmem:[#allocation2 + $0x26e] sm:$0xff]  ;;  %v1133_v32 = vmax.f32 %v1053_v21, %v1093_v62  ;;  %v1122_v15 = vmax.f32 %v1042_v30, %v1082_v58  ;;  %999 = vst.msk [vmem:[#allocation2 + $0x130] sm:$0xff] %vm329_vm1, %v4726_v44  ;;  %v4741_v30 = vld [vmem:[#allocation2 + $0x46] sm:$0xff] }
 0x101   : > { %v1095_v6 = vld [vmem:[#allocation2 + $0x26f] sm:$0xff]  ;;  %v4731_v50 = vmax.f32 %v1397_v46, %v4712_v39  ;;  %v4743_v58 = vld [vmem:[#allocation2 + $0x47] sm:$0xff] }
 0x102   : > { %v1172_v31 = vld [vmem:[#allocation2 + $0x248] sm:$0xff]  ;;  %v1175_v24 = vld [vmem:[#allocation2 + $0x270] sm:$0xff]  ;;  %v1135_v9 = vmax.f32 %v1055_v63, %v1095_v6  ;;  %v1213_v2 = vmax.f32 %v1133_v32, %v1173_v10  ;;  %v4746_v10 = vmul.f32 %v3922_v29, %v4592_v1 }
 0x103   : > { %v1174_v3 = vld [vmem:[#allocation2 + $0x268] sm:$0xff]  ;;  %v1212_v62 = vmax.f32 %v1132_v19, %v1172_v31  ;;  %v1169_v18 = vld [vmem:[#allocation2 + $0x210] sm:$0xff] }
 0x104   : > { %v1162_v57 = vld [vmem:[#allocation2 + $0x1a8] sm:$0xff]  ;;  %v1249_v6 = vld [vmem:[#allocation2 + $0x211] sm:$0xff]  ;;  %v1214_v11 = vmax.f32 %v1134_v54, %v1174_v3  ;;  %v1215_v46 = vmax.f32 %v1135_v9, %v1175_v24  ;;  %6503 = vst [vmem:[#allocation25_spill] sm:$0xff] %v4746_v10  ;;  %v738_v3 = vpack.c.bf16 %v4706_v13, %v4644_v20  ;;  %v3924_v9 = vpop.eup %3923 }
 0x105   : > { %v1049_v38 = vld [vmem:[#allocation2 + $0x20e] sm:$0xff]  ;;  %1007 = vst.msk [vmem:[#allocation2 + $0x1b0] sm:$0xff] %vm329_vm1, %v4746_v10  ;;  %v4769_v20 = vmul.f32 %v3924_v9, %v4599_v48 }
 0x106   : > { %v1089_v34 = vld [vmem:[#allocation2 + $0x20f] sm:$0xff]  ;;  %v4762_v44 = vld [vmem:[#allocation2 + $0x67] sm:$0xff]  ;;  %3717 = vmatmul.msk.bf16.gmra.mxu1 %vm329_vm1, %v738_v3 }
 0x107   : > { %v4735_v41 = vld [vmem:[#allocation2 + $0x2e] sm:$0xff]  ;;  %v1129_v59 = vmax.f32 %v1049_v38, %v1089_v34  ;;  %v1405_v38 = vmax.f32 %v4676_v60, %v4716_v17  ;;  %v4756_v34 = vmax.f32 %v1122_v15, %v1162_v57  ;;  %6504 = vst [vmem:[#allocation26_spill] sm:$0xff] %v4769_v20 }
 0x108   : > { %v4737_v7 = vld [vmem:[#allocation2 + $0x2f] sm:$0xff]  ;;  %1014 = vst.msk [vmem:[#allocation2 + $0x228] sm:$0xff] %vm329_vm1, %v4769_v20 }
 0x109   : > { %v1248_v63 = vld [vmem:[#allocation2 + $0x209] sm:$0xff]  ;;  %v1329_v32 = vld [vmem:[#allocation2 + $0x212] sm:$0xff]  ;;  %v1099_v48 = vmax.f32 %v4735_v41, %v4737_v7 }
 0x10a   : > { %v1328_v31 = vld [vmem:[#allocation2 + $0x20a] sm:$0xff]  ;;  %v1288_v21 = vmax.f32 %v1208_v55, %v1248_v63  ;;  %v1209_v55 = vmax.f32 %v1129_v59, %v1169_v18  ;;  %v1333_v18 = vld [vmem:[#allocation2 + $0x252] sm:$0xff] }
 0x10b   : > { %v1252_v52 = vld [vmem:[#allocation2 + $0x249] sm:$0xff]  ;;  %v1253_v4 = vld [vmem:[#allocation2 + $0x251] sm:$0xff] }
 0x10c   : > { %v4752_v24 = vld [vmem:[#allocation2 + $0x4e] sm:$0xff]  ;;  %v1292_v1 = vmax.f32 %v1212_v62, %v1252_v52  ;;  %v1293_v29 = vmax.f32 %v1213_v2, %v1253_v4  ;;  %v4764_v13 = vmax.f32 %v1288_v21, %v1328_v31  ;;  %v3926_v62 = vpop.eup %3925  ;;  %v1289_v2 = vmax.f32 %v1209_v55, %v1249_v6  ;;  %v1024_v21 = vld [vmem:[#allocation2 + $0x86] sm:$0xff] }
 0x10d   : > { %v4754_v54 = vld [vmem:[#allocation2 + $0x4f] sm:$0xff]  ;;  %v670_v6 = vadd.f32 1.0, %v3926_v62 }
 0x10e   : > { %v1254_v63 = vld [vmem:[#allocation2 + $0x269] sm:$0xff]  ;;  %v1255_v19 = vld [vmem:[#allocation2 + $0x271] sm:$0xff]  ;;  %v4771_v59 = vmax.f32 %v1292_v1, %v1332_v40  ;;  %v4773_v5 = vmax.f32 %v1293_v29, %v1333_v18  ;;  %v4789_v55 = vmax.f32 %v1289_v2, %v1329_v32  ;;  %v1101_v29 = vmax.f32 %v4752_v24, %v4754_v54 }
 0x10f   : > { %v1294_v57 = vmax.f32 %v1214_v11, %v1254_v63  ;;  %v1295_v15 = vmax.f32 %v1215_v46, %v1255_v19  ;;  %v1334_v52 = vld [vmem:[#allocation2 + $0x26a] sm:$0xff]  ;;  %v1335_v4 = vld [vmem:[#allocation2 + $0x272] sm:$0xff]  ;;  %v1100_v19 = vmax.f32 %v4741_v30, %v4743_v58  ;;  %3927 = vrcp.f32 %v670_v6 }
 0x110   : > { %v1063_v31 = vld [vmem:[#allocation2 + $0x6f] sm:$0xff]  ;;  %v3747_v11 = vld [vmem:[%s6423_s4 + $0x8] sm:$0xf]  ;;  %v1102_v58 = vmax.f32 %v4758_v25, %v4762_v44  ;;  %v6505_v54 = vmax.f32 %v4674_v51, %v4708_v26  ;;  %v1104_v25 = vmax.f32 %v1024_v21, %v1064_v14  ;;  %v6507_v24 = vmax.f32 %v4667_v28, %v4669_v27 }
 0x111   : > { %v4783_v40 = vmax.f32 %v1294_v57, %v1334_v52  ;;  %v4785_v46 = vmax.f32 %v1295_v15, %v1335_v4  ;;  %v1136_v3 = vld [vmem:[#allocation2 + $0x8] sm:$0xff]  ;;  %v2377_v63 = vsel %vm378_vm0, %v3747_v11, 0  ;;  %v1137_v57 = vld [vmem:[#allocation2 + $0x10] sm:$0xff]  ;;  %v1103_v32 = vmax.f32 %v4760_v0, %v1063_v31 }
 0x112   : > { %v1138_v9 = vld [vmem:[#allocation2 + $0x28] sm:$0xff]  ;;  %2386 = vmatpush.bf16.msrb.mxu3 %v2377_v63  ;;  %v1139_v52 = vld [vmem:[#allocation2 + $0x30] sm:$0xff]  ;;  %v4809_v6 = vmax.f32 %v6505_v54, %v4764_v13  ;;  %v6506_v63 = vmax.f32 %v4623_v33, %v4625_v36  ;;  %v4824_v10 = vmax.f32 %v6507_v24, %v1137_v57 }
 0x113   : > { %v1035_v41 = vld [vmem:[#allocation2 + $0x12e] sm:$0xff] }
 0x114   : > { %v1075_v7 = vld [vmem:[#allocation2 + $0x12f] sm:$0xff]  ;;  %v4819_v20 = vmax.f32 %v6506_v63, %v1136_v3  ;;  %v4837_v63 = vmax.f32 %v1099_v48, %v1139_v52  ;;  %v1050_v52 = vld [vmem:[#allocation2 + $0x226] sm:$0xff] }
 0x115   : > { %v1115_v15 = vmax.f32 %v1035_v41, %v1075_v7  ;;  %v4796_v18 = vld [vmem:[#allocation2 + $0x8e] sm:$0xff]  ;;  %v4812_v41 = vmax.f32 %v1405_v38, %v4789_v55  ;;  %v6508_v38 = vmax.f32 %v4687_v53, %v4689_v43 }
 0x116   : > { %v4798_v30 = vld [vmem:[#allocation2 + $0x8f] sm:$0xff] }
 0x117   : > { %v1140_v4 = vld [vmem:[#allocation2 + $0x48] sm:$0xff]  ;;  %v1141_v62 = vld [vmem:[#allocation2 + $0x50] sm:$0xff]  ;;  %v4829_v54 = vmax.f32 %v6508_v38, %v1138_v9 }
 0x118   : > { %v1142_v2 = vld [vmem:[#allocation2 + $0x68] sm:$0xff]  ;;  %v1155_v11 = vld [vmem:[#allocation2 + $0x130] sm:$0xff]  ;;  %v4839_v28 = vmax.f32 %v1100_v19, %v1140_v4  ;;  %v4841_v27 = vmax.f32 %v1101_v29, %v1141_v62 }
 0x119   : > { %v1235_v1 = vld [vmem:[#allocation2 + $0x131] sm:$0xff]  ;;  %v1144_v44 = vld [vmem:[#allocation2 + $0x88] sm:$0xff]  ;;  %v1195_v7 = vmax.f32 %v1115_v15, %v1155_v11  ;;  %v4843_v57 = vmax.f32 %v1102_v58, %v1142_v2 }
 0x11a   : > { %v1143_v0 = vld [vmem:[#allocation2 + $0x70] sm:$0xff]  ;;  %v4847_v8 = vmax.f32 %v1104_v25, %v1144_v44  ;;  %v1090_v19 = vld [vmem:[#allocation2 + $0x227] sm:$0xff] }
 0x11b   : > { %v4814_v31 = vld [vmem:[#allocation2 + $0x9] sm:$0xff]  ;;  %v4831_v14 = vld [vmem:[#allocation2 + $0x11] sm:$0xff]  ;;  %v1275_v53 = vmax.f32 %v1195_v7, %v1235_v1  ;;  %v4845_v38 = vmax.f32 %v1103_v32, %v1143_v0  ;;  %v3928_v32 = vpop.eup %3927  ;;  %v1130_v2 = vmax.f32 %v1050_v52, %v1090_v19 }
 0x11c   : > { %v4833_v21 = vld [vmem:[#allocation2 + $0x29] sm:$0xff]  ;;  %v4835_v15 = vld [vmem:[#allocation2 + $0x31] sm:$0xff]  ;;  %v4865_v7 = vmul.f32 %v3928_v32, %v4672_v22  ;;  %v6511_v22 = vmax.f32 %v4656_v56, %v4703_v23 }
 0x11d   : > { %v1315_v11 = vld [vmem:[#allocation2 + $0x132] sm:$0xff]  ;;  %v1242_v9 = vld [vmem:[#allocation2 + $0x1a9] sm:$0xff] }
 0x11e   : > { %v1043_v33 = vld [vmem:[#allocation2 + $0x1ae] sm:$0xff]  ;;  %v1282_v48 = vmax.f32 %v4756_v34, %v1242_v9  ;;  %v4858_v4 = vmax.f32 %v1275_v53, %v1315_v11  ;;  %6510 = vst [vmem:[#allocation28_spill] sm:$0xff] %v4865_v7 }
 0x11f   : > { %v1083_v36 = vld [vmem:[#allocation2 + $0x1af] sm:$0xff]  ;;  %1015 = vst.msk [vmem:[#allocation2 + $0x230] sm:$0xff] %vm329_vm1, %v4865_v7 }
 0x120   : > { %v1163_v3 = vld [vmem:[#allocation2 + $0x1b0] sm:$0xff]  ;;  %v1123_v43 = vmax.f32 %v1043_v33, %v1083_v36  ;;  %v1170_v25 = vld [vmem:[#allocation2 + $0x228] sm:$0xff]  ;;  %v1393_v11 = vmax.f32 %v4710_v37, %v4858_v4 }
 0x121   : > { %v1322_v24 = vld [vmem:[#allocation2 + $0x1aa] sm:$0xff]  ;;  %v1323_v0 = vld [vmem:[#allocation2 + $0x1b2] sm:$0xff] }
 0x122   : > { %v1243_v61 = vld [vmem:[#allocation2 + $0x1b1] sm:$0xff]  ;;  %v1203_v62 = vmax.f32 %v1123_v43, %v1163_v3  ;;  %v4862_v44 = vmax.f32 %v1282_v48, %v1322_v24  ;;  %v1395_v3 = vmax.f32 %v4858_v4, %v4609_v16  ;;  %v4875_v43 = vmax.f32 %v1130_v2, %v1170_v25  ;;  %v1224_v34 = vld [vmem:[#allocation2 + $0x89] sm:$0xff] }
 0x123   : > { %v1425_v19 = vmax.f32 %v1393_v11, %v4609_v16 }
 0x124   : > { %6509 = vst [vmem:[#allocation27_spill] sm:$0xff] %v4862_v44  ;;  %v1283_v53 = vmax.f32 %v1203_v62, %v1243_v61  ;;  %v1400_v9 = vmax.f32 %v4703_v23, %v4862_v44  ;;  %v1430_v24 = vmax.f32 %v6511_v22, %v4862_v44  ;;  %v1460_v48 = vmax.f32 %v4723_v35, %v4862_v44  ;;  %v4889_v61 = vld [vmem:[#allocation2 + $0x51] sm:$0xff] }
 0x125   : > { %v1402_v52 = vmax.f32 %v4862_v44, %v4674_v51  ;;  %v1427_v32 = vmax.f32 %v1395_v3, %v4660_v47  ;;  %v1457_v33 = vmax.f32 %v1425_v19, %v4660_v47  ;;  %v1222_v19 = vld [vmem:[#allocation2 + $0x69] sm:$0xff]  ;;  %v1264_v23 = vmax.f32 %v4847_v8, %v1224_v34  ;;  %v1301_v8 = vld [vmem:[#allocation2 + $0x52] sm:$0xff] }
 0x126   : > { %v1363_v62 = vmax.f32 %v1283_v53, %v1323_v0  ;;  %v1432_v25 = vmax.f32 %v1400_v9, %v4674_v51  ;;  %v1462_v35 = vmax.f32 %v1430_v24, %v4674_v51  ;;  %v4898_v22 = vmax.f32 %v1460_v48, %v4674_v51  ;;  %v1171_v29 = vld [vmem:[#allocation2 + $0x230] sm:$0xff] }
 0x127   : > { %v4901_v36 = vmax.f32 %v1402_v52, %v4708_v26  ;;  %v6513_v0 = vmax.f32 %v4660_v47, %v4712_v39  ;;  %v1459_v53 = vmax.f32 %v1427_v32, %v4712_v39  ;;  %v1145_v52 = vld [vmem:[#allocation2 + $0x90] sm:$0xff]  ;;  %v4918_v2 = vmax.f32 %v1457_v33, %v4712_v39 }
 0x128   : > { %6512 = vst [vmem:[#allocation29_spill] sm:$0xff] %v4898_v22  ;;  %v1401_v11 = vmax.f32 %v4712_v39, %v1363_v62  ;;  %v1461_v9 = vmax.f32 %v4731_v50, %v1363_v62  ;;  %v1464_v24 = vmax.f32 %v1432_v25, %v4708_v26  ;;  %v4912_v51 = vmax.f32 %v1462_v35, %v4708_v26  ;;  %v1223_v25 = vld [vmem:[#allocation2 + $0x71] sm:$0xff] }
 0x129   : > { %v1431_v3 = vmax.f32 %v6513_v0, %v1363_v62  ;;  %1778 = vst.msk [vmem:[#allocation2 + $0x188] sm:$0xff] %vm329_vm1, %v4898_v22  ;;  %v1403_v48 = vmax.f32 %v1363_v62, %v4676_v60  ;;  %v4922_v50 = vmax.f32 %v1459_v53, %v1363_v62  ;;  %v1296_v35 = vld [vmem:[#allocation2 + $0xa] sm:$0xff]  ;;  %v1466_v33 = vmax.f32 %v4901_v36, %v4764_v13  ;;  %v1297_v62 = vld [vmem:[#allocation2 + $0x12] sm:$0xff] }
 0x12a   : > { %6514 = vst [vmem:[#allocation30_spill] sm:$0xff] %v4912_v51  ;;  %v1433_v0 = vmax.f32 %v1401_v11, %v4676_v60  ;;  %v4925_v58 = vmax.f32 %v1461_v9, %v4676_v60  ;;  %v4928_v1 = vmax.f32 %v1464_v24, %v4764_v13  ;;  %v1298_v11 = vld [vmem:[#allocation2 + $0x2a] sm:$0xff]  ;;  %v1262_v36 = vmax.f32 %v4843_v57, %v1222_v19 }
 0x12b   : > { %6515 = vst [vmem:[#allocation31_spill] sm:$0xff] %v4918_v2  ;;  %v1463_v32 = vmax.f32 %v1431_v3, %v4676_v60  ;;  %v4933_v39 = vmax.f32 %v1403_v48, %v4716_v17  ;;  %v1299_v3 = vld [vmem:[#allocation2 + $0x32] sm:$0xff]  ;;  %v6520_v48 = vmax.f32 %v4796_v18, %v4798_v30  ;;  %v1250_v22 = vld [vmem:[#allocation2 + $0x229] sm:$0xff]  ;;  %v1263_v44 = vmax.f32 %v4845_v38, %v1223_v25 }
 0x12c   : > { %6516 = vst [vmem:[#allocation32_spill] sm:$0xff] %v4922_v50  ;;  %v1465_v60 = vmax.f32 %v1433_v0, %v4716_v17  ;;  %v1051_v9 = vld [vmem:[#allocation2 + $0x22e] sm:$0xff]  ;;  %v1290_v30 = vmax.f32 %v4875_v43, %v1250_v22 }
 0x12d   : > { %6517 = vst [vmem:[#allocation33_spill] sm:$0xff] %v4925_v58  ;;  %v4941_v53 = vmax.f32 %v1463_v32, %v4716_v17  ;;  %v1091_v24 = vld [vmem:[#allocation2 + $0x22f] sm:$0xff]  ;;  %v1185_v7 = vmax.f32 %v6520_v48, %v1145_v52  ;;  %v1467_v0 = vmax.f32 %v4933_v39, %v4789_v55  ;;  %v6522_v52 = vmax.f32 %v4819_v20, %v4814_v31 }
 0x12e   : > { %6518 = vst [vmem:[#allocation34_spill] sm:$0xff] %v4928_v1  ;;  %v1225_v32 = vld [vmem:[#allocation2 + $0x91] sm:$0xff]  ;;  %v4954_v47 = vmax.f32 %v1465_v60, %v4789_v55  ;;  %v6523_v39 = vmax.f32 %v4824_v10, %v4831_v14  ;;  %v6525_v20 = vmax.f32 %v4837_v63, %v4835_v15  ;;  %v6526_v10 = vmax.f32 %v4839_v28, %v4849_v12 }
 0x12f   : > { %1780 = vst.msk [vmem:[#allocation2 + $0x1a8] sm:$0xff] %vm329_vm1, %v4912_v51  ;;  %v1131_v51 = vmax.f32 %v1051_v9, %v1091_v24  ;;  %v1251_v18 = vld [vmem:[#allocation2 + $0x231] sm:$0xff]  ;;  %v1265_v57 = vmax.f32 %v1185_v7, %v1225_v32  ;;  %v1336_v19 = vmax.f32 %v6522_v52, %v1296_v35  ;;  %v6524_v9 = vmax.f32 %v4829_v54, %v4833_v21  ;;  %v3764_v32 = vld [vmem:[%s6423_s4 + $0xc] sm:$0xf] }
 0x130   : > { %1775 = vst.msk [vmem:[#allocation2 + $0x150] sm:$0xff] %vm329_vm1, %v4918_v2  ;;  %v1330_v2 = vld [vmem:[#allocation2 + $0x22a] sm:$0xff]  ;;  %v1337_v60 = vmax.f32 %v6523_v39, %v1297_v62  ;;  %v4975_v31 = vmax.f32 %v6525_v20, %v1299_v3  ;;  %v1303_v22 = vld [vmem:[#allocation2 + $0x72] sm:$0xff]  ;;  %v6527_v54 = vmax.f32 %v4841_v27, %v4889_v61  ;;  %v6528_v27 = vmax.f32 %v4708_v26, %v4764_v13 }
 0x131   : > { %6519 = vst [vmem:[#allocation35_spill] sm:$0xff] %v4941_v53  ;;  %v1211_v38 = vmax.f32 %v1131_v51, %v1171_v29  ;;  %v1300_v25 = vld [vmem:[#allocation2 + $0x4a] sm:$0xff]  ;;  %v4970_v43 = vmax.f32 %v6524_v9, %v1298_v11  ;;  %v1331_v29 = vld [vmem:[#allocation2 + $0x232] sm:$0xff]  ;;  %v1370_v7 = vmax.f32 %v1290_v30, %v1330_v2  ;;  %v4993_v2 = vmax.f32 %v1263_v44, %v1303_v22 }
 0x132   : > { %1777 = vst.msk [vmem:[#allocation2 + $0x170] sm:$0xff] %vm329_vm1, %v4922_v50  ;;  %v1302_v34 = vld [vmem:[#allocation2 + $0x6a] sm:$0xff]  ;;  %v4982_v14 = vmax.f32 %v6526_v10, %v1300_v25  ;;  %v4987_v21 = vmax.f32 %v6527_v54, %v1301_v8  ;;  %v1305_v35 = vld [vmem:[#allocation2 + $0x92] sm:$0xff]  ;;  %v6531_v25 = vmax.f32 %v4716_v17, %v4789_v55 }
 0x133   : > { %6521 = vst [vmem:[#allocation36_spill] sm:$0xff] %v4954_v47  ;;  %v1304_v51 = vld [vmem:[#allocation2 + $0x8a] sm:$0xff]  ;;  %v4989_v15 = vmax.f32 %v1262_v36, %v1302_v34  ;;  %v1291_v63 = vmax.f32 %v1211_v38, %v1251_v18  ;;  %v4998_v12 = vmax.f32 %v1336_v19, %v4970_v43  ;;  %v1438_v61 = vmax.f32 %v6528_v27, %v1370_v7 }
 0x134   : > { %1779 = vst.msk [vmem:[#allocation2 + $0x190] sm:$0xff] %vm329_vm1, %v4925_v58  ;;  %v4995_v62 = vmax.f32 %v1264_v23, %v1304_v51  ;;  %v1468_v24 = vmax.f32 %v4809_v6, %v1370_v7  ;;  %v5004_v48 = vmax.f32 %v1466_v33, %v1370_v7  ;;  %v5007_v36 = vmax.f32 %v1337_v60, %v4975_v31  ;;  %v5031_v60 = vld [vmem:[#allocation2 + $0xa6] sm:$0xff] }
 0x135   : > { %1781 = vst.msk [vmem:[#allocation2 + $0x1b0] sm:$0xff] %vm329_vm1, %v4941_v53  ;;  %v1371_v23 = vmax.f32 %v1291_v63, %v1331_v29  ;;  %v5012_v18 = vmax.f32 %v1265_v57, %v1305_v35  ;;  %v1408_v30 = vmax.f32 %v4998_v12, %v4982_v14  ;;  %v1470_v26 = vmax.f32 %v1438_v61, %v4771_v59  ;;  %v5033_v9 = vld [vmem:[#allocation2 + $0xa7] sm:$0xff] }
 0x136   : > { %1782 = vst.msk [vmem:[#allocation2 + $0x1c8] sm:$0xff] %vm329_vm1, %v4928_v1  ;;  %v1816_v28 = vld [vmem:[#allocation2 + $0x1a6] sm:$0xff]  ;;  %v5018_v13 = vmax.f32 %v1468_v24, %v4771_v59  ;;  %v3151_v6 = vsel %vm378_vm0, %v3764_v32, 0  ;;  %v1409_v33 = vmax.f32 %v5007_v36, %v4987_v21 }
 0x137   : > { %1783 = vst.msk [vmem:[#allocation2 + $0x1d0] sm:$0xff] %vm329_vm1, %v4954_v47  ;;  %v1856_v11 = vld [vmem:[#allocation2 + $0x1a7] sm:$0xff]  ;;  %v1439_v8 = vmax.f32 %v6531_v25, %v1371_v23  ;;  %v1469_v34 = vmax.f32 %v4812_v41, %v1371_v23  ;;  %v5029_v39 = vmax.f32 %v1467_v0, %v1371_v23  ;;  %3160 = vmatpush.bf16.msrb.mxu0 %v3151_v6  ;;  %v5044_v0 = vld [vmem:[#allocation2 + $0xaf] sm:$0xff] }
 0x138   : > { %v1936_v3 = vld [vmem:[#allocation2 + $0x1a8] sm:$0xff]  ;;  %6529 = vst [vmem:[#allocation37_spill] sm:$0xff] %v5004_v48  ;;  %v1896_v44 = vmax.f32 %v1816_v28, %v1856_v11  ;;  %v5036_v51 = vmax.f32 %v1470_v26, %v4783_v40  ;;  %v1440_v17 = vmax.f32 %v1408_v30, %v4989_v15  ;;  %v1441_v55 = vmax.f32 %v1409_v33, %v4993_v2  ;;  %v6538_v47 = vld [vmem:[#allocation6_spill] sm:$0xff] }
 0x139   : > { %6530 = vst [vmem:[#allocation38_spill] sm:$0xff] %v5018_v13  ;;  %v5042_v41 = vld [vmem:[#allocation2 + $0xae] sm:$0xff]  ;;  %v1471_v28 = vmax.f32 %v1439_v8, %v4773_v5  ;;  %v5048_v11 = vmax.f32 %v1469_v34, %v4773_v5  ;;  %v740_v1 = vpack.c.bf16 %v6538_v47, %v4403_v49 }
 0x13a   : > { %1784 = vst.msk [vmem:[#allocation2 + $0x1e8] sm:$0xff] %vm329_vm1, %v5004_v48  ;;  %v1976_v38 = vmax.f32 %v1896_v44, %v1936_v3  ;;  %v739_v3 = vpack.c.bf16 %v4384_v42, %v4297_v45  ;;  %v1472_v32 = vmax.f32 %v1440_v17, %v4995_v62  ;;  %v1473_v30 = vmax.f32 %v1441_v55, %v5012_v18 }
 0x13b   : > { %v1815_v52 = vld [vmem:[#allocation2 + $0x18e] sm:$0xff]  ;;  %6532 = vst [vmem:[#allocation39_spill] sm:$0xff] %v5029_v39  ;;  %v5059_v25 = vmax.f32 %v1471_v28, %v4785_v46 }
 0x13c   : > { %v1855_v19 = vld [vmem:[#allocation2 + $0x18f] sm:$0xff]  ;;  %6533 = vst [vmem:[#allocation40_spill] sm:$0xff] %v5036_v51  ;;  %3718 = vmatmul.msk.bf16.gmra.mxu1 %vm329_vm1, %v739_v3  ;;  %v1536_v34 = vpack.c.bf16 %v1473_v30, %v1472_v32 }
 0x13d   : > { %v1935_v57 = vld [vmem:[#allocation2 + $0x190] sm:$0xff]  ;;  %v1895_v7 = vmax.f32 %v1815_v52, %v1855_v19  ;;  %1786 = vst.msk [vmem:[#allocation2 + $0x208] sm:$0xff] %vm329_vm1, %v5018_v13  ;;  %v1818_v8 = vld [vmem:[#allocation2 + $0x1c6] sm:$0xff] }
 0x13e   : > { %v1817_v20 = vld [vmem:[#allocation2 + $0x1ae] sm:$0xff]  ;;  %6534 = vst [vmem:[#allocation41_spill] sm:$0xff] %v5048_v11  ;;  %3731 = vmatmul.msk.bf16.vlgmr.msrb.gmra.mxu2 %vm329_vm1, %v1536_v34 }
 0x13f   : > { %v1857_v29 = vld [vmem:[#allocation2 + $0x1af] sm:$0xff]  ;;  %1785 = vst.msk [vmem:[#allocation2 + $0x1f0] sm:$0xff] %vm329_vm1, %v5029_v39  ;;  %v1975_v44 = vmax.f32 %v1895_v7, %v1935_v57  ;;  %v1858_v55 = vld [vmem:[#allocation2 + $0x1c7] sm:$0xff] }
 0x140   : > { %v1937_v22 = vld [vmem:[#allocation2 + $0x1b0] sm:$0xff]  ;;  %v1897_v10 = vmax.f32 %v1817_v20, %v1857_v29  ;;  %1788 = vst.msk [vmem:[#allocation2 + $0x228] sm:$0xff] %vm329_vm1, %v5036_v51  ;;  %v1106_v20 = vmax.f32 %v5031_v60, %v5033_v9  ;;  %v1146_v29 = vld [vmem:[#allocation2 + $0xa8] sm:$0xff]  ;;  %v1898_v3 = vmax.f32 %v1818_v8, %v1858_v55 }
 0x141   : > { %v2015_v54 = vld [vmem:[#allocation2 + $0x191] sm:$0xff]  ;;  %v2016_v63 = vld [vmem:[#allocation2 + $0x1a9] sm:$0xff]  ;;  %6535 = vst [vmem:[#allocation42_spill] sm:$0xff] %v5059_v25 }
 0x142   : > { %v2017_v35 = vld [vmem:[#allocation2 + $0x1b1] sm:$0xff]  ;;  %v2056_v23 = vmax.f32 %v1976_v38, %v2016_v63  ;;  %v1977_v6 = vmax.f32 %v1897_v10, %v1937_v22  ;;  %1787 = vst.msk [vmem:[#allocation2 + $0x210] sm:$0xff] %vm329_vm1, %v5048_v11  ;;  %v2055_v45 = vmax.f32 %v1975_v44, %v2015_v54  ;;  %v1820_v17 = vld [vmem:[#allocation2 + $0x1e6] sm:$0xff]  ;;  %v1378_v63 = vmax.f32 %v4970_v43, %v4982_v14 }
 0x143   : > { %v1819_v27 = vld [vmem:[#allocation2 + $0x1ce] sm:$0xff]  ;;  %1758 = vst.msk [vmem:[#allocation2 + $0x48] sm:$0xff] %vm329_vm1, %v1472_v32 }
 0x144   : > { %v1859_v61 = vld [vmem:[#allocation2 + $0x1cf] sm:$0xff]  ;;  %v2057_v22 = vmax.f32 %v1977_v6, %v2017_v35  ;;  %1789 = vst.msk [vmem:[#allocation2 + $0x230] sm:$0xff] %vm329_vm1, %v5059_v25  ;;  %v1860_v10 = vld [vmem:[#allocation2 + $0x1e7] sm:$0xff]  ;;  %v1379_v6 = vmax.f32 %v4975_v31, %v4987_v21  ;;  %v5088_v34 = vmax.f32 %v1378_v63, %v4989_v15 }
 0x145   : > { %v1939_v24 = vld [vmem:[#allocation2 + $0x1d0] sm:$0xff]  ;;  %v1899_v26 = vmax.f32 %v1819_v27, %v1859_v61  ;;  %v1900_v27 = vmax.f32 %v1820_v17, %v1860_v10  ;;  %v1938_v60 = vld [vmem:[#allocation2 + $0x1c8] sm:$0xff]  ;;  %1759 = vst.msk [vmem:[#allocation2 + $0x50] sm:$0xff] %vm329_vm1, %v1473_v30 }
 0x146   : > { %v2019_v33 = vld [vmem:[#allocation2 + $0x1d1] sm:$0xff]  ;;  %v1940_v9 = vld [vmem:[#allocation2 + $0x1e8] sm:$0xff]  ;;  %v1978_v17 = vmax.f32 %v1898_v3, %v1938_v60 }
 0x147   : > { %v2095_v52 = vld [vmem:[#allocation2 + $0x192] sm:$0xff]  ;;  %v2096_v19 = vld [vmem:[#allocation2 + $0x1aa] sm:$0xff]  ;;  %v1979_v7 = vmax.f32 %v1899_v26, %v1939_v24  ;;  %v5083_v26 = vmax.f32 %v1106_v20, %v1146_v29  ;;  %v1980_v55 = vmax.f32 %v1900_v27, %v1940_v9 }
 0x148   : > { %v2097_v42 = vld [vmem:[#allocation2 + $0x1b2] sm:$0xff]  ;;  %v5064_v38 = vmax.f32 %v2056_v23, %v2096_v19  ;;  %v5075_v28 = vmax.f32 %v2055_v45, %v2095_v52  ;;  %v5077_v61 = vld [vmem:[#allocation2 + $0x1c9] sm:$0xff] }
 0x149   : > { %v2099_v57 = vld [vmem:[#allocation2 + $0x1d2] sm:$0xff]  ;;  %v2059_v35 = vmax.f32 %v1979_v7, %v2019_v33  ;;  %v5081_v24 = vmax.f32 %v2057_v22, %v2097_v42  ;;  %v1822_v44 = vld [vmem:[#allocation2 + $0x206] sm:$0xff]  ;;  %v5095_v22 = vmax.f32 %v1379_v6, %v4993_v2 }
 0x14a   : > { %6536 = vst [vmem:[#allocation43_spill] sm:$0xff] %v5075_v28  ;;  %v1862_v23 = vld [vmem:[#allocation2 + $0x207] sm:$0xff]  ;;  %v1861_v19 = vld [vmem:[#allocation2 + $0x1ef] sm:$0xff] }
 0x14b   : > { %6537 = vst [vmem:[#allocation44_spill] sm:$0xff] %v5081_v24  ;;  %v1942_v32 = vld [vmem:[#allocation2 + $0x208] sm:$0xff]  ;;  %v1902_v45 = vmax.f32 %v1822_v44, %v1862_v23  ;;  %v1941_v8 = vld [vmem:[#allocation2 + $0x1f0] sm:$0xff]  ;;  %v5090_v30 = vmax.f32 %v2059_v35, %v2099_v57  ;;  %v2175_v33 = vmax.f32 %v5075_v28, %v5081_v24  ;;  %v2058_v23 = vmax.f32 %v1978_v17, %v5077_v61 }
 0x14c   : > { %v1821_v52 = vld [vmem:[#allocation2 + $0x1ee] sm:$0xff]  ;;  %v1824_v42 = vld [vmem:[#allocation2 + $0x226] sm:$0xff]  ;;  %v1443_v17 = vmax.f32 %v5095_v22, %v5012_v18  ;;  %3719 = vmatmul.msk.bf16.gmra.mxu1 %vm329_vm1, %v740_v1 }
 0x14d   : > { %v1864_v20 = vld [vmem:[#allocation2 + $0x227] sm:$0xff]  ;;  %v1901_v29 = vmax.f32 %v1821_v52, %v1861_v19  ;;  %v5099_v27 = vld [vmem:[#allocation2 + $0xcf] sm:$0xff]  ;;  %v1982_v35 = vmax.f32 %v1902_v45, %v1942_v32  ;;  %v2207_v19 = vmax.f32 %v2175_v33, %v5090_v30  ;;  %v2177_v13 = vmax.f32 %v5081_v24, %v5090_v30 }
 0x14e   : > { %v1944_v7 = vld [vmem:[#allocation2 + $0x228] sm:$0xff]  ;;  %v1904_v57 = vmax.f32 %v1824_v42, %v1864_v20  ;;  %v1943_v9 = vld [vmem:[#allocation2 + $0x210] sm:$0xff] }
 0x14f   : > { %v1028_v10 = vld [vmem:[#allocation2 + $0xc6] sm:$0xff]  ;;  %v5097_v44 = vld [vmem:[#allocation2 + $0xce] sm:$0xff]  ;;  %v1981_v54 = vmax.f32 %v1901_v29, %v1941_v8 }
 0x150   : > { %v1068_v3 = vld [vmem:[#allocation2 + $0xc7] sm:$0xff]  ;;  %v1863_v60 = vld [vmem:[#allocation2 + $0x20f] sm:$0xff]  ;;  %v1984_v32 = vmax.f32 %v1904_v57, %v1944_v7 }
 0x151   : > { %v1823_v63 = vld [vmem:[#allocation2 + $0x20e] sm:$0xff]  ;;  %v1108_v28 = vmax.f32 %v1028_v10, %v1068_v3 }
 0x152   : > { %v1903_v6 = vmax.f32 %v1823_v63, %v1863_v60  ;;  %v2020_v25 = vld [vmem:[#allocation2 + $0x1e9] sm:$0xff]  ;;  %v2021_v51 = vld [vmem:[#allocation2 + $0x1f1] sm:$0xff] }
 0x153   : > { %v2022_v11 = vld [vmem:[#allocation2 + $0x209] sm:$0xff]  ;;  %v2060_v45 = vmax.f32 %v1980_v55, %v2020_v25  ;;  %v2023_v63 = vld [vmem:[#allocation2 + $0x211] sm:$0xff]  ;;  %v2061_v60 = vmax.f32 %v1981_v54, %v2021_v51  ;;  %v1380_v25 = vmax.f32 %v4982_v14, %v4989_v15 }
 0x154   : > { %v1148_v39 = vld [vmem:[#allocation2 + $0xc8] sm:$0xff]  ;;  %v1945_v20 = vld [vmem:[#allocation2 + $0x230] sm:$0xff]  ;;  %v2062_v61 = vmax.f32 %v1982_v35, %v2022_v11  ;;  %v1983_v33 = vmax.f32 %v1903_v6, %v1943_v9  ;;  %v1109_v11 = vmax.f32 %v5097_v44, %v5099_v27 }
 0x155   : > { %v1825_v48 = vld [vmem:[#allocation2 + $0x22e] sm:$0xff]  ;;  %v5123_v3 = vmax.f32 %v1108_v28, %v1148_v39 }
 0x156   : > { %v1865_v42 = vld [vmem:[#allocation2 + $0x22f] sm:$0xff]  ;;  %v2063_v55 = vmax.f32 %v1983_v33, %v2023_v63 }
 0x157   : > { %v1905_v52 = vmax.f32 %v1825_v48, %v1865_v42  ;;  %v2024_v8 = vld [vmem:[#allocation2 + $0x229] sm:$0xff]  ;;  %v2025_v29 = vld [vmem:[#allocation2 + $0x231] sm:$0xff] }
 0x158   : > { %v2064_v53 = vmax.f32 %v1984_v32, %v2024_v8  ;;  %v2098_v58 = vld [vmem:[#allocation2 + $0x1ca] sm:$0xff]  ;;  %v2101_v24 = vld [vmem:[#allocation2 + $0x1f2] sm:$0xff] }
 0x159   : > { %v2100_v50 = vld [vmem:[#allocation2 + $0x1ea] sm:$0xff]  ;;  %v1985_v48 = vmax.f32 %v1905_v52, %v1945_v20  ;;  %v2103_v57 = vld [vmem:[#allocation2 + $0x212] sm:$0xff]  ;;  %v5115_v51 = vmax.f32 %v2058_v23, %v2098_v58  ;;  %v5119_v47 = vmax.f32 %v2061_v60, %v2101_v24 }
 0x15a   : > { %v2102_v7 = vld [vmem:[#allocation2 + $0x20a] sm:$0xff]  ;;  %v5117_v54 = vmax.f32 %v2060_v45, %v2100_v50  ;;  %v2105_v49 = vld [vmem:[#allocation2 + $0x232] sm:$0xff]  ;;  %v2143_v27 = vmax.f32 %v2063_v55, %v2103_v57 }
 0x15b   : > { %v2104_v9 = vld [vmem:[#allocation2 + $0x22a] sm:$0xff]  ;;  %v5121_v35 = vmax.f32 %v2062_v61, %v2102_v7  ;;  %v2065_v44 = vmax.f32 %v1985_v48, %v2025_v29  ;;  %v2176_v52 = vmax.f32 %v5064_v38, %v5115_v51  ;;  %v2179_v58 = vmax.f32 %v5090_v30, %v5119_v47 }
 0x15c   : > { %v2144_v10 = vmax.f32 %v2064_v53, %v2104_v9  ;;  %v2178_v6 = vmax.f32 %v5115_v51, %v5117_v54  ;;  %v2209_v24 = vmax.f32 %v2177_v13, %v5119_v47  ;;  %v2239_v53 = vmax.f32 %v2207_v19, %v5119_v47  ;;  %v1226_v20 = vld [vmem:[#allocation2 + $0xa9] sm:$0xff]  ;;  %v1227_v57 = vld [vmem:[#allocation2 + $0xb1] sm:$0xff] }
 0x15d   : > { %v2180_v50 = vmax.f32 %v5117_v54, %v5121_v35  ;;  %v2145_v39 = vmax.f32 %v2065_v44, %v2105_v49  ;;  %v2181_v28 = vmax.f32 %v5119_v47, %v2143_v27  ;;  %v2208_v23 = vmax.f32 %v2176_v52, %v5117_v54  ;;  %v1147_v63 = vld [vmem:[#allocation2 + $0xb0] sm:$0xff]  ;;  %v5145_v48 = vld [vmem:[#allocation2 + $0x126] sm:$0xff] }
 0x15e   : > { %v2210_v42 = vmax.f32 %v2178_v6, %v5121_v35  ;;  %v2211_v32 = vmax.f32 %v2179_v58, %v2143_v27  ;;  %v2241_v61 = vmax.f32 %v2209_v24, %v2143_v27  ;;  %v5139_v33 = vmax.f32 %v2239_v53, %v2143_v27  ;;  %v1228_v49 = vld [vmem:[#allocation2 + $0xc9] sm:$0xff] }
 0x15f   : > { %v2212_v45 = vmax.f32 %v2180_v50, %v2144_v10  ;;  %v2213_v8 = vmax.f32 %v2181_v28, %v2145_v39  ;;  %v2240_v13 = vmax.f32 %v2208_v23, %v5121_v35  ;;  %v6540_v29 = vmax.f32 %v5042_v41, %v5044_v0  ;;  %v1074_v44 = vld [vmem:[#allocation2 + $0x127] sm:$0xff]  ;;  %v1149_v58 = vld [vmem:[#allocation2 + $0xd0] sm:$0xff] }
 0x160   : > { %6539 = vst [vmem:[#allocation6_spill] sm:$0xff] %v5139_v33  ;;  %v2242_v19 = vmax.f32 %v2210_v42, %v2144_v10  ;;  %v2243_v55 = vmax.f32 %v2211_v32, %v2145_v39  ;;  %v5148_v1 = vmax.f32 %v2241_v61, %v2145_v39  ;;  %v1266_v9 = vmax.f32 %v5083_v26, %v1226_v20  ;;  %v1306_v6 = vld [vmem:[#allocation2 + $0xaa] sm:$0xff]  ;;  %v1307_v26 = vld [vmem:[#allocation2 + $0xb2] sm:$0xff] }
 0x161   : > { %v1187_v60 = vmax.f32 %v6540_v29, %v1147_v63  ;;  %v2244_v7 = vmax.f32 %v2212_v45, %v4771_v59  ;;  %2557 = vst.msk [vmem:[#allocation2 + $0x1d0] sm:$0xff] %vm329_vm1, %v5139_v33  ;;  %v2245_v27 = vmax.f32 %v2213_v8, %v4773_v5  ;;  %v5154_v52 = vmax.f32 %v2240_v13, %v2144_v10  ;;  %v1229_v39 = vld [vmem:[#allocation2 + $0xd1] sm:$0xff]  ;;  %v1794_v28 = vld [vmem:[#allocation2 + $0x46] sm:$0xff] }
 0x162   : > { %6541 = vst [vmem:[#allocation45_spill] sm:$0xff] %v5148_v1  ;;  %v5157_v41 = vmax.f32 %v2242_v19, %v4771_v59  ;;  %v5160_v50 = vmax.f32 %v2243_v55, %v4773_v5  ;;  %v5167_v53 = vmax.f32 %v1266_v9, %v1306_v6  ;;  %v1189_v10 = vmax.f32 %v1109_v11, %v1149_v58  ;;  %v1795_v42 = vld [vmem:[#allocation2 + $0x4e] sm:$0xff]  ;;  %v1032_v45 = vld [vmem:[#allocation2 + $0x106] sm:$0xff] }
 0x163   : > { %6542 = vst [vmem:[#allocation46_spill] sm:$0xff] %v5154_v52  ;;  %v1267_v0 = vmax.f32 %v1187_v60, %v1227_v57  ;;  %v5163_v24 = vmax.f32 %v2244_v7, %v4783_v40  ;;  %v5170_v59 = vmax.f32 %v2245_v27, %v4785_v46  ;;  %v1268_v40 = vmax.f32 %v5123_v3, %v1228_v49  ;;  %v1834_v20 = vld [vmem:[#allocation2 + $0x47] sm:$0xff]  ;;  %v1835_v32 = vld [vmem:[#allocation2 + $0x4f] sm:$0xff] }
 0x164   : > { %6543 = vst [vmem:[#allocation47_spill] sm:$0xff] %v5157_v41  ;;  %v1381_v23 = vmax.f32 %v4987_v21, %v4993_v2  ;;  %v1072_v11 = vld [vmem:[#allocation2 + $0x107] sm:$0xff]  ;;  %v6547_v46 = vmax.f32 %v5088_v34, %v4995_v62  ;;  %v1269_v63 = vmax.f32 %v1189_v10, %v1229_v39  ;;  %v1412_v3 = vmax.f32 %v1380_v25, %v4995_v62  ;;  %v1309_v29 = vld [vmem:[#allocation2 + $0xd2] sm:$0xff] }
 0x165   : > { %6544 = vst [vmem:[#allocation48_spill] sm:$0xff] %v5160_v50  ;;  %v5174_v5 = vmax.f32 %v1267_v0, %v1307_v26  ;;  %v1114_v21 = vmax.f32 %v5145_v48, %v1074_v44  ;;  %v1308_v13 = vld [vmem:[#allocation2 + $0xca] sm:$0xff]  ;;  %v1874_v60 = vmax.f32 %v1794_v28, %v1834_v20  ;;  %v1875_v48 = vmax.f32 %v1795_v42, %v1835_v32 }
 0x166   : > { %6545 = vst [vmem:[#allocation49_spill] sm:$0xff] %v5163_v24  ;;  %v1474_v61 = vmax.f32 %v6547_v46, %v5167_v53  ;;  %v1413_v34 = vmax.f32 %v1381_v23, %v5012_v18  ;;  %v1154_v19 = vld [vmem:[#allocation2 + $0x128] sm:$0xff]  ;;  %v5199_v14 = vmax.f32 %v1268_v40, %v1308_v13  ;;  %v1444_v25 = vmax.f32 %v1412_v3, %v5167_v53  ;;  %v1915_v39 = vld [vmem:[#allocation2 + $0x50] sm:$0xff] }
 0x167   : > { %2559 = vst.msk [vmem:[#allocation2 + $0x1f0] sm:$0xff] %vm329_vm1, %v5148_v1  ;;  %v1475_v8 = vmax.f32 %v1443_v17, %v5174_v5  ;;  %v1030_v55 = vld [vmem:[#allocation2 + $0xe6] sm:$0xff]  ;;  %v1112_v7 = vmax.f32 %v1032_v45, %v1072_v11  ;;  %v5204_v17 = vmax.f32 %v1269_v63, %v1309_v29  ;;  %v1031_v9 = vld [vmem:[#allocation2 + $0xee] sm:$0xff]  ;;  %v1194_v26 = vmax.f32 %v1114_v21, %v1154_v19 }
 0x168   : > { %6546 = vst [vmem:[#allocation50_spill] sm:$0xff] %v5170_v59  ;;  %v1445_v57 = vmax.f32 %v1413_v34, %v5174_v5  ;;  %v1070_v49 = vld [vmem:[#allocation2 + $0xe7] sm:$0xff]  ;;  %v1071_v44 = vld [vmem:[#allocation2 + $0xef] sm:$0xff]  ;;  %v5209_v6 = vmax.f32 %v1444_v25, %v5199_v14  ;;  %v1955_v23 = vmax.f32 %v1875_v48, %v1915_v39  ;;  %v1384_v46 = vmax.f32 %v4995_v62, %v5167_v53 }
 0x169   : > { %2558 = vst.msk [vmem:[#allocation2 + $0x1e8] sm:$0xff] %vm329_vm1, %v5154_v52  ;;  %v1537_v22 = vpack.c.bf16 %v1475_v8, %v1474_v61  ;;  %v1152_v27 = vld [vmem:[#allocation2 + $0x108] sm:$0xff]  ;;  %v1110_v20 = vmax.f32 %v1030_v55, %v1070_v49  ;;  %v1111_v32 = vmax.f32 %v1031_v9, %v1071_v44  ;;  %v6549_v63 = vld [vmem:[#allocation14_spill] sm:$0xff]  ;;  %v1385_v13 = vmax.f32 %v5012_v18, %v5174_v5 }
 0x16a   : > { %2560 = vst.msk [vmem:[#allocation2 + $0x208] sm:$0xff] %vm329_vm1, %v5157_v41  ;;  %v1234_v0 = vld [vmem:[#allocation2 + $0x129] sm:$0xff]  ;;  %v5214_v10 = vmax.f32 %v1445_v57, %v5204_v17  ;;  %v1192_v45 = vmax.f32 %v1112_v7, %v1152_v27  ;;  %v1995_v19 = vld [vmem:[#allocation2 + $0x51] sm:$0xff]  ;;  %v1386_v7 = vmax.f32 %v5167_v53, %v5199_v14  ;;  %v1387_v44 = vmax.f32 %v5174_v5, %v5204_v17 }
 0x16b   : > { %2561 = vst.msk [vmem:[#allocation2 + $0x210] sm:$0xff] %vm329_vm1, %v5160_v50  ;;  %v1914_v58 = vld [vmem:[#allocation2 + $0x48] sm:$0xff]  ;;  %3732 = vmatmul.msk.bf16.gmra.mxu2 %vm329_vm1, %v1537_v22  ;;  %v1274_v11 = vmax.f32 %v1194_v26, %v1234_v0  ;;  %v2035_v22 = vmax.f32 %v1955_v23, %v1995_v19  ;;  %v1231_v49 = vld [vmem:[#allocation2 + $0xf1] sm:$0xff]  ;;  %v5232_v27 = vmax.f32 %v1384_v46, %v5199_v14 }
 0x16c   : > { %2562 = vst.msk [vmem:[#allocation2 + $0x228] sm:$0xff] %vm329_vm1, %v5163_v24  ;;  %v1954_v28 = vmax.f32 %v1874_v60, %v1914_v58  ;;  %v1232_v40 = vld [vmem:[#allocation2 + $0x109] sm:$0xff]  ;;  %v2075_v26 = vld [vmem:[#allocation2 + $0x52] sm:$0xff]  ;;  %v1538_v23 = vpack.c.bf16 %v5214_v10, %v5209_v6 }
 0x16d   : > { %2563 = vst.msk [vmem:[#allocation2 + $0x230] sm:$0xff] %vm329_vm1, %v5170_v59  ;;  %v1994_v42 = vld [vmem:[#allocation2 + $0x49] sm:$0xff]  ;;  %v1272_v60 = vmax.f32 %v1192_v45, %v1232_v40  ;;  %v5237_v40 = vmax.f32 %v1385_v13, %v5204_v17  ;;  %v1382_v13 = vmax.f32 %v4989_v15, %v4995_v62 }
 0x16e   : > { %1760 = vst.msk [vmem:[#allocation2 + $0x68] sm:$0xff] %vm329_vm1, %v1474_v61  ;;  %v6548_v61 = vld [vmem:[#allocation7_spill] sm:$0xff]  ;;  %v1150_v21 = vld [vmem:[#allocation2 + $0xe8] sm:$0xff]  ;;  %v2034_v29 = vmax.f32 %v1954_v28, %v1994_v42 }
 0x16f   : > { %1761 = vst.msk [vmem:[#allocation2 + $0x70] sm:$0xff] %vm329_vm1, %v1475_v8  ;;  %v741_v3 = vpack.c.bf16 %v6549_v63, %v6548_v61  ;;  %v1151_v8 = vld [vmem:[#allocation2 + $0xf0] sm:$0xff]  ;;  %v1190_v9 = vmax.f32 %v1110_v20, %v1150_v21 }
 0x170   : > { %1762 = vst.msk [vmem:[#allocation2 + $0x88] sm:$0xff] %vm329_vm1, %v5209_v6  ;;  %v1191_v34 = vmax.f32 %v1111_v32, %v1151_v8  ;;  %v1230_v25 = vld [vmem:[#allocation2 + $0xe9] sm:$0xff]  ;;  %v1311_v61 = vld [vmem:[#allocation2 + $0xf2] sm:$0xff] }
 0x171   : > { %1763 = vst.msk [vmem:[#allocation2 + $0x90] sm:$0xff] %vm329_vm1, %v5214_v10  ;;  %3720 = vmatmul.msk.bf16.gmra.mxu1 %vm329_vm1, %v741_v3  ;;  %v1312_v48 = vld [vmem:[#allocation2 + $0x10a] sm:$0xff]  ;;  %v1270_v45 = vmax.f32 %v1190_v9, %v1230_v25  ;;  %v1383_v25 = vmax.f32 %v4993_v2, %v5012_v18 }
 0x172   : > { %v1314_v55 = vld [vmem:[#allocation2 + $0x12a] sm:$0xff]  ;;  %v1271_v39 = vmax.f32 %v1191_v34, %v1231_v49 }
 0x173   : > { %v2074_v57 = vld [vmem:[#allocation2 + $0x4a] sm:$0xff]  ;;  %v5234_v28 = vmax.f32 %v1274_v11, %v1314_v55  ;;  %v5243_v11 = vmax.f32 %v1272_v60, %v1312_v48  ;;  %v6550_v48 = vld [vmem:[#allocation15_spill] sm:$0xff] }
 0x174   : > { %v5241_v8 = vmax.f32 %v2034_v29, %v2074_v57  ;;  %v1310_v34 = vld [vmem:[#allocation2 + $0xea] sm:$0xff]  ;;  %v5251_v60 = vmax.f32 %v1271_v39, %v1311_v61 }
 0x175   : > { %v1796_v0 = vld [vmem:[#allocation2 + $0x66] sm:$0xff]  ;;  %v1394_v15 = vmax.f32 %v5234_v28, %v6550_v48 }
 0x176   : > { %v1836_v58 = vld [vmem:[#allocation2 + $0x67] sm:$0xff]  ;;  %v1837_v20 = vld [vmem:[#allocation2 + $0x6f] sm:$0xff]  ;;  %v2182_v18 = vmax.f32 %v4998_v12, %v5241_v8  ;;  %v1391_v39 = vmax.f32 %v5251_v60, %v4710_v37  ;;  %v1415_v12 = vmax.f32 %v1383_v25, %v5174_v5 }
 0x177   : > { %v1797_v42 = vld [vmem:[#allocation2 + $0x6e] sm:$0xff]  ;;  %v1876_v32 = vmax.f32 %v1796_v0, %v1836_v58  ;;  %v1798_v63 = vld [vmem:[#allocation2 + $0x86] sm:$0xff]  ;;  %v5247_v0 = vmax.f32 %v2035_v22, %v2075_v26  ;;  %v1414_v22 = vmax.f32 %v1382_v13, %v5167_v53 }
 0x178   : > { %v1838_v46 = vld [vmem:[#allocation2 + $0x87] sm:$0xff]  ;;  %v1877_v3 = vmax.f32 %v1797_v42, %v1837_v20  ;;  %v1839_v55 = vld [vmem:[#allocation2 + $0x8f] sm:$0xff] }
 0x179   : > { %v1916_v21 = vld [vmem:[#allocation2 + $0x68] sm:$0xff]  ;;  %v1878_v6 = vmax.f32 %v1798_v63, %v1838_v46  ;;  %v1917_v10 = vld [vmem:[#allocation2 + $0x70] sm:$0xff]  ;;  %v2183_v13 = vmax.f32 %v5007_v36, %v5247_v0  ;;  %v1392_v36 = vmax.f32 %v5243_v11, %v5234_v28 }
 0x17a   : > { %v1799_v19 = vld [vmem:[#allocation2 + $0x8e] sm:$0xff]  ;;  %v1956_v49 = vmax.f32 %v1876_v32, %v1916_v21  ;;  %v1957_v29 = vmax.f32 %v1877_v3, %v1917_v10  ;;  %v1350_v32 = vmax.f32 %v1270_v45, %v1310_v34  ;;  %v1419_v10 = vmax.f32 %v1387_v44, %v5251_v60 }
 0x17b   : > { %v1879_v9 = vmax.f32 %v1799_v19, %v1839_v55  ;;  %v1918_v58 = vld [vmem:[#allocation2 + $0x88] sm:$0xff]  ;;  %v1919_v62 = vld [vmem:[#allocation2 + $0x90] sm:$0xff]  ;;  %3733 = vmatmul.msk.bf16.gmra.mxu2 %vm329_vm1, %v1538_v23  ;;  %v1389_v23 = vmax.f32 %v5204_v17, %v5251_v60 }
 0x17c   : > { %v1996_v57 = vld [vmem:[#allocation2 + $0x69] sm:$0xff]  ;;  %v1958_v20 = vmax.f32 %v1878_v6, %v1918_v58  ;;  %v1997_v63 = vld [vmem:[#allocation2 + $0x71] sm:$0xff]  ;;  %v1418_v6 = vmax.f32 %v1386_v7, %v1350_v32  ;;  %v1446_v7 = vmax.f32 %v1414_v22, %v5199_v14  ;;  %v1390_v25 = vmax.f32 %v1350_v32, %v5243_v11 }
 0x17d   : > { %v1998_v42 = vld [vmem:[#allocation2 + $0x89] sm:$0xff]  ;;  %v2036_v46 = vmax.f32 %v1956_v49, %v1996_v57  ;;  %v1959_v26 = vmax.f32 %v1879_v9, %v1919_v62  ;;  %v2037_v21 = vmax.f32 %v1957_v29, %v1997_v63  ;;  %v1999_v61 = vld [vmem:[#allocation2 + $0x91] sm:$0xff]  ;;  %v1423_v29 = vmax.f32 %v1391_v39, %v4858_v4 }
 0x17e   : > { %v2076_v2 = vld [vmem:[#allocation2 + $0x6a] sm:$0xff]  ;;  %v2038_v3 = vmax.f32 %v1958_v20, %v1998_v42  ;;  %v2077_v19 = vld [vmem:[#allocation2 + $0x72] sm:$0xff]  ;;  %v1388_v42 = vmax.f32 %v5199_v14, %v1350_v32  ;;  %v1450_v62 = vmax.f32 %v1418_v6, %v5243_v11  ;;  %v1451_v20 = vmax.f32 %v1419_v10, %v4710_v37 }
 0x17f   : > { %v5260_v55 = vmax.f32 %v2036_v46, %v2076_v2  ;;  %v2039_v45 = vmax.f32 %v1959_v26, %v1999_v61  ;;  %v2078_v34 = vld [vmem:[#allocation2 + $0x8a] sm:$0xff]  ;;  %v5263_v53 = vmax.f32 %v2037_v21, %v2077_v19  ;;  %v2079_v49 = vld [vmem:[#allocation2 + $0x92] sm:$0xff]  ;;  %v1447_v14 = vmax.f32 %v1415_v12, %v5204_v17  ;;  %v6552_v12 = vld [vmem:[#allocation20_spill] sm:$0xff] }
 0x180   : > { %v5268_v9 = vmax.f32 %v2038_v3, %v2078_v34  ;;  %v1420_v46 = vmax.f32 %v1388_v42, %v5243_v11  ;;  %v1422_v22 = vmax.f32 %v1390_v25, %v5234_v28  ;;  %v1448_v26 = vmax.f32 %v5232_v27, %v1350_v32  ;;  %v1814_v17 = vld [vmem:[#allocation2 + $0x186] sm:$0xff]  ;;  %v6551_v34 = vld [vmem:[#allocation19_spill] sm:$0xff] }
 0x181   : > { %v2214_v58 = vmax.f32 %v2182_v18, %v5260_v55  ;;  %v5274_v44 = vmax.f32 %v2039_v45, %v2079_v49  ;;  %v2215_v57 = vmax.f32 %v2183_v13, %v5263_v53  ;;  %v1455_v21 = vmax.f32 %v1423_v29, %v4609_v16  ;;  %v1854_v19 = vld [vmem:[#allocation2 + $0x187] sm:$0xff]  ;;  %v6554_v42 = vld [vmem:[#allocation23_spill] sm:$0xff] }
 0x182   : > { %v1478_v2 = vmax.f32 %v1446_v7, %v1350_v32  ;;  %v1421_v39 = vmax.f32 %v1389_v23, %v4710_v37  ;;  %v1424_v61 = vmax.f32 %v1392_v36, %v6550_v48  ;;  %v1449_v3 = vmax.f32 %v5237_v40, %v5251_v60  ;;  %v6553_v49 = vld [vmem:[#allocation24_spill] sm:$0xff] }
 0x183   : > { %v2246_v5 = vmax.f32 %v2214_v58, %v5268_v9  ;;  %v2247_v63 = vmax.f32 %v2215_v57, %v5274_v44  ;;  %v1426_v6 = vmax.f32 %v1394_v15, %v4656_v56  ;;  %v1452_v10 = vmax.f32 %v1420_v46, %v5234_v28  ;;  %v1934_v15 = vld [vmem:[#allocation2 + $0x188] sm:$0xff] }
 0x184   : > { %v5301_v27 = vmax.f32 %v1450_v62, %v5234_v28  ;;  %v5304_v32 = vmax.f32 %v1451_v20, %v4858_v4  ;;  %1764 = vst.msk [vmem:[#allocation2 + $0xa8] sm:$0xff] %vm329_vm1, %v1478_v2  ;;  %v1453_v45 = vmax.f32 %v1421_v39, %v4858_v4  ;;  %v1479_v40 = vmax.f32 %v1447_v14, %v5251_v60  ;;  %v2014_v57 = vld [vmem:[#allocation2 + $0x189] sm:$0xff] }
 0x185   : > { %2532 = vst.msk [vmem:[#allocation2 + $0x48] sm:$0xff] %vm329_vm1, %v2246_v5  ;;  %v2310_v18 = vpack.c.bf16 %v2247_v63, %v2246_v5  ;;  %v5311_v13 = vmax.f32 %v1455_v21, %v6551_v34  ;;  %v742_v58 = vpack.c.bf16 %v6553_v49, %v6552_v12  ;;  %v1454_v28 = vmax.f32 %v1422_v22, %v6550_v48 }
 0x186   : > { %2533 = vst.msk [vmem:[#allocation2 + $0x50] sm:$0xff] %vm329_vm1, %v2247_v63  ;;  %v5317_v29 = vmax.f32 %v1448_v26, %v5243_v11  ;;  %v1894_v7 = vmax.f32 %v1814_v17, %v1854_v19  ;;  %v1456_v4 = vmax.f32 %v1424_v61, %v4656_v56  ;;  %v5323_v60 = vmax.f32 %v1449_v3, %v4710_v37  ;;  %v2094_v37 = vld [vmem:[#allocation2 + $0x18a] sm:$0xff]  ;;  %v6555_v63 = vld [vmem:[#allocation27_spill] sm:$0xff] }
 0x187   : > { %3748 = vmatmul.msk.bf16.vlgmr.msrb.gmra.mxu3 %vm329_vm1, %v2310_v18  ;;  %1768 = vst.msk [vmem:[#allocation2 + $0xe8] sm:$0xff] %vm329_vm1, %v5301_v27  ;;  %3721 = vmatmul.msk.bf16.gmra.mxu1 %vm329_vm1, %v742_v58  ;;  %v1458_v36 = vmax.f32 %v1426_v6, %v6554_v42  ;;  %v5330_v11 = vmax.f32 %v1452_v10, %v6550_v48 }
 0x188   : > { %1769 = vst.msk [vmem:[#allocation2 + $0xf0] sm:$0xff] %vm329_vm1, %v5304_v32  ;;  %v1974_v5 = vmax.f32 %v1894_v7, %v1934_v15  ;;  %v5335_v25 = vmax.f32 %v1453_v45, %v4609_v16  ;;  %v5339_v62 = vmax.f32 %v1454_v28, %v4656_v56  ;;  %v5344_v48 = vmax.f32 %v1456_v4, %v6554_v42 }
 0x189   : > { %1773 = vst.msk [vmem:[#allocation2 + $0x130] sm:$0xff] %vm329_vm1, %v5311_v13  ;;  %v5349_v23 = vmax.f32 %v1458_v36, %v6555_v63  ;;  %v1539_v56 = vpack.c.bf16 %v1479_v40, %v1478_v2  ;;  %v2154_v46 = vmax.f32 %v5241_v8, %v5260_v55  ;;  %v2152_v39 = vmax.f32 %v4970_v43, %v5241_v8 }
 0x18a   : > { %1765 = vst.msk [vmem:[#allocation2 + $0xb0] sm:$0xff] %vm329_vm1, %v1479_v40  ;;  %v2054_v20 = vmax.f32 %v1974_v5, %v2014_v57  ;;  %v2155_v61 = vmax.f32 %v5247_v0, %v5263_v53 }
 0x18b   : > { %1766 = vst.msk [vmem:[#allocation2 + $0xc8] sm:$0xff] %vm329_vm1, %v5317_v29  ;;  %v1800_v14 = vld [vmem:[#allocation2 + $0xa6] sm:$0xff]  ;;  %3734 = vmatmul.msk.bf16.gmra.mxu2 %vm329_vm1, %v1539_v56  ;;  %v5376_v34 = vmax.f32 %v2152_v39, %v5260_v55  ;;  %v5379_v43 = vmax.f32 %v2154_v46, %v5268_v9 }
 0x18c   : > { %1767 = vst.msk [vmem:[#allocation2 + $0xd0] sm:$0xff] %vm329_vm1, %v5323_v60  ;;  %v5353_v16 = vmax.f32 %v2054_v20, %v2094_v37  ;;  %v1840_v22 = vld [vmem:[#allocation2 + $0xa7] sm:$0xff]  ;;  %v2153_v37 = vmax.f32 %v4975_v31, %v5247_v0  ;;  %v5387_v20 = vmax.f32 %v2155_v61, %v5274_v44 }
 0x18d   : > { %6556 = vst [vmem:[#allocation7_spill] sm:$0xff] %v5349_v23  ;;  %v1880_v12 = vmax.f32 %v1800_v14, %v1840_v22  ;;  %v1920_v36 = vld [vmem:[#allocation2 + $0xa8] sm:$0xff] }
 0x18e   : > { %1770 = vst.msk [vmem:[#allocation2 + $0x108] sm:$0xff] %vm329_vm1, %v5330_v11  ;;  %v2174_v26 = vmax.f32 %v5353_v16, %v5064_v38  ;;  %v1804_v21 = vld [vmem:[#allocation2 + $0xe6] sm:$0xff]  ;;  %v5392_v31 = vmax.f32 %v2153_v37, %v5263_v53 }
 0x18f   : > { %1771 = vst.msk [vmem:[#allocation2 + $0x110] sm:$0xff] %vm329_vm1, %v5335_v25  ;;  %v1805_v2 = vld [vmem:[#allocation2 + $0xee] sm:$0xff]  ;;  %v5399_v10 = vmax.f32 %v1880_v12, %v1920_v36 }
 0x190   : > { %1772 = vst.msk [vmem:[#allocation2 + $0x128] sm:$0xff] %vm329_vm1, %v5339_v62  ;;  %v1844_v18 = vld [vmem:[#allocation2 + $0xe7] sm:$0xff]  ;;  %v1845_v19 = vld [vmem:[#allocation2 + $0xef] sm:$0xff]  ;;  %v2206_v6 = vmax.f32 %v2174_v26, %v5115_v51 }
 0x191   : > { %1774 = vst.msk [vmem:[#allocation2 + $0x148] sm:$0xff] %vm329_vm1, %v5344_v48  ;;  %v1801_v3 = vld [vmem:[#allocation2 + $0xae] sm:$0xff]  ;;  %v1884_v49 = vmax.f32 %v1804_v21, %v1844_v18  ;;  %v1885_v42 = vmax.f32 %v1805_v2, %v1845_v19  ;;  %v6557_v21 = vld [vmem:[#allocation4_spill] sm:$0xff] }
 0x192   : > { %1776 = vst.msk [vmem:[#allocation2 + $0x168] sm:$0xff] %vm329_vm1, %v5349_v23  ;;  %v1841_v17 = vld [vmem:[#allocation2 + $0xaf] sm:$0xff]  ;;  %v1802_v45 = vld [vmem:[#allocation2 + $0xc6] sm:$0xff]  ;;  %v2238_v58 = vmax.f32 %v2206_v6, %v5117_v54 }
 0x193   : > { %v1842_v40 = vld [vmem:[#allocation2 + $0xc7] sm:$0xff]  ;;  %v1843_v15 = vld [vmem:[#allocation2 + $0xcf] sm:$0xff]  ;;  %v1881_v57 = vmax.f32 %v1801_v3, %v1841_v17 }
 0x194   : > { %v1803_v8 = vld [vmem:[#allocation2 + $0xce] sm:$0xff]  ;;  %v1882_v46 = vmax.f32 %v1802_v45, %v1842_v40  ;;  %v5397_v61 = vmax.f32 %v2238_v58, %v5121_v35 }
 0x195   : > { %v1806_v7 = vld [vmem:[#allocation2 + $0x106] sm:$0xff]  ;;  %v1883_v14 = vmax.f32 %v1803_v8, %v1843_v15  ;;  %v1921_v22 = vld [vmem:[#allocation2 + $0xb0] sm:$0xff] }
 0x196   : > { %v1846_v4 = vld [vmem:[#allocation2 + $0x107] sm:$0xff]  ;;  %v1847_v56 = vld [vmem:[#allocation2 + $0x10f] sm:$0xff]  ;;  %6559 = vst [vmem:[#allocation14_spill] sm:$0xff] %v5397_v61  ;;  %v5403_v41 = vmax.f32 %v1881_v57, %v1921_v22 }
 0x197   : > { %v1924_v5 = vld [vmem:[#allocation2 + $0xe8] sm:$0xff]  ;;  %v1925_v26 = vld [vmem:[#allocation2 + $0xf0] sm:$0xff]  ;;  %v1886_v17 = vmax.f32 %v1806_v7, %v1846_v4  ;;  %2556 = vst.msk [vmem:[#allocation2 + $0x1c8] sm:$0xff] %vm329_vm1, %v5397_v61 }
 0x198   : > { %v1807_v63 = vld [vmem:[#allocation2 + $0x10e] sm:$0xff]  ;;  %v1808_v6 = vld [vmem:[#allocation2 + $0x126] sm:$0xff]  ;;  %v5401_v7 = vmax.f32 %v1884_v49, %v1924_v5  ;;  %v5405_v0 = vmax.f32 %v1885_v42, %v1925_v26 }
 0x199   : > { %v6558_v18 = vld [vmem:[#allocation5_spill] sm:$0xff]  ;;  %v1923_v28 = vld [vmem:[#allocation2 + $0xd0] sm:$0xff]  ;;  %v1887_v15 = vmax.f32 %v1807_v63, %v1847_v56 }
 0x19a   : > { %v743_v39 = vpack.c.bf16 %v6558_v18, %v6557_v21  ;;  %v1809_v3 = vld [vmem:[#allocation2 + $0x12e] sm:$0xff]  ;;  %v1810_v45 = vld [vmem:[#allocation2 + $0x146] sm:$0xff] }
 0x19b   : > { %v1848_v2 = vld [vmem:[#allocation2 + $0x127] sm:$0xff]  ;;  %v1849_v8 = vld [vmem:[#allocation2 + $0x12f] sm:$0xff] }
 0x19c   : > { %v1922_v19 = vld [vmem:[#allocation2 + $0xc8] sm:$0xff]  ;;  %v1888_v21 = vmax.f32 %v1808_v6, %v1848_v2  ;;  %v1889_v24 = vmax.f32 %v1809_v3, %v1849_v8  ;;  %v1929_v50 = vld [vmem:[#allocation2 + $0x130] sm:$0xff]  ;;  %3722 = vmatmul.msk.bf16.gmra.mxu1 %vm329_vm1, %v743_v39  ;;  %v1963_v6 = vmax.f32 %v1883_v14, %v1923_v28 }
 0x19d   : > { %v1811_v40 = vld [vmem:[#allocation2 + $0x14e] sm:$0xff]  ;;  %v1812_v4 = vld [vmem:[#allocation2 + $0x166] sm:$0xff]  ;;  %v1962_v56 = vmax.f32 %v1882_v46, %v1922_v19 }
 0x19e   : > { %v1926_v18 = vld [vmem:[#allocation2 + $0x108] sm:$0xff]  ;;  %v1931_v5 = vld [vmem:[#allocation2 + $0x150] sm:$0xff] }
 0x19f   : > { %v1813_v59 = vld [vmem:[#allocation2 + $0x16e] sm:$0xff]  ;;  %v5414_v1 = vmax.f32 %v1886_v17, %v1926_v18 }
 0x1a0   : > { %v1850_v37 = vld [vmem:[#allocation2 + $0x147] sm:$0xff]  ;;  %v1851_v12 = vld [vmem:[#allocation2 + $0x14f] sm:$0xff] }
 0x1a1   : > { %v5407_v35 = vld [vmem:[#allocation2 + $0xe9] sm:$0xff]  ;;  %v1890_v36 = vmax.f32 %v1810_v45, %v1850_v37  ;;  %v1891_v42 = vmax.f32 %v1811_v40, %v1851_v12  ;;  %v1969_v45 = vmax.f32 %v1889_v24, %v1929_v50  ;;  %v2001_v57 = vld [vmem:[#allocation2 + $0xb1] sm:$0xff] }
 0x1a2   : > { %v1852_v58 = vld [vmem:[#allocation2 + $0x167] sm:$0xff]  ;;  %v1853_v49 = vld [vmem:[#allocation2 + $0x16f] sm:$0xff]  ;;  %v2044_v50 = vmax.f32 %v5401_v7, %v5407_v35 }
 0x1a3   : > { %v1933_v63 = vld [vmem:[#allocation2 + $0x170] sm:$0xff]  ;;  %v1892_v22 = vmax.f32 %v1812_v4, %v1852_v58  ;;  %v1893_v26 = vmax.f32 %v1813_v59, %v1853_v49  ;;  %v1928_v2 = vld [vmem:[#allocation2 + $0x128] sm:$0xff]  ;;  %v1971_v28 = vmax.f32 %v1891_v42, %v1931_v5 }
 0x1a4   : > { %v1927_v3 = vld [vmem:[#allocation2 + $0x110] sm:$0xff]  ;;  %v1930_v8 = vld [vmem:[#allocation2 + $0x148] sm:$0xff]  ;;  %v1968_v33 = vmax.f32 %v1888_v21, %v1928_v2 }
 0x1a5   : > { %v1932_v39 = vld [vmem:[#allocation2 + $0x168] sm:$0xff]  ;;  %v5416_v52 = vmax.f32 %v1887_v15, %v1927_v3  ;;  %v1970_v37 = vmax.f32 %v1890_v36, %v1930_v8  ;;  %v1973_v19 = vmax.f32 %v1893_v26, %v1933_v63  ;;  %v2003_v40 = vld [vmem:[#allocation2 + $0xd1] sm:$0xff]  ;;  %v2041_v15 = vmax.f32 %v5403_v41, %v2001_v57 }
 0x1a6   : > { %v2000_v61 = vld [vmem:[#allocation2 + $0xa9] sm:$0xff]  ;;  %v1972_v14 = vmax.f32 %v1892_v22, %v1932_v39  ;;  %v2005_v4 = vld [vmem:[#allocation2 + $0xf1] sm:$0xff]  ;;  %v2043_v21 = vmax.f32 %v1963_v6, %v2003_v40  ;;  %v2217_v22 = vmax.f32 %v5392_v31, %v5274_v44 }
 0x1a7   : > { %v2002_v46 = vld [vmem:[#allocation2 + $0xc9] sm:$0xff]  ;;  %v2011_v59 = vld [vmem:[#allocation2 + $0x151] sm:$0xff]  ;;  %v2040_v12 = vmax.f32 %v5399_v10, %v2000_v61  ;;  %v2045_v63 = vmax.f32 %v5405_v0, %v2005_v4  ;;  %v1540_v10 = vpack.c.bf16 %v5323_v60, %v5317_v29 }
 0x1a8   : > { %v2006_v58 = vld [vmem:[#allocation2 + $0x109] sm:$0xff]  ;;  %v2042_v49 = vmax.f32 %v1962_v56, %v2002_v46  ;;  %v2009_v24 = vld [vmem:[#allocation2 + $0x131] sm:$0xff]  ;;  %v2051_v56 = vmax.f32 %v1971_v28, %v2011_v59  ;;  %v1541_v59 = vpack.c.bf16 %v5304_v32, %v5301_v27 }
 0x1a9   : > { %v2008_v17 = vld [vmem:[#allocation2 + $0x129] sm:$0xff]  ;;  %v2013_v5 = vld [vmem:[#allocation2 + $0x171] sm:$0xff]  ;;  %v2049_v26 = vmax.f32 %v1969_v45, %v2009_v24  ;;  %v2046_v7 = vmax.f32 %v5414_v1, %v2006_v58  ;;  %3735 = vmatmul.msk.bf16.gmra.mxu2 %vm329_vm1, %v1540_v10 }
 0x1aa   : > { %v2010_v18 = vld [vmem:[#allocation2 + $0x149] sm:$0xff]  ;;  %v2048_v42 = vmax.f32 %v1968_v33, %v2008_v17  ;;  %v2007_v61 = vld [vmem:[#allocation2 + $0x111] sm:$0xff]  ;;  %v2053_v2 = vmax.f32 %v1973_v19, %v2013_v5 }
 0x1ab   : > { %v2012_v36 = vld [vmem:[#allocation2 + $0x169] sm:$0xff]  ;;  %v2050_v41 = vmax.f32 %v1970_v37, %v2010_v18  ;;  %v2081_v3 = vld [vmem:[#allocation2 + $0xb2] sm:$0xff]  ;;  %v2047_v35 = vmax.f32 %v5416_v52, %v2007_v61 }
 0x1ac   : > { %v2052_v6 = vmax.f32 %v1972_v14, %v2012_v36  ;;  %v2080_v57 = vld [vmem:[#allocation2 + $0xaa] sm:$0xff]  ;;  %v2083_v33 = vld [vmem:[#allocation2 + $0xd2] sm:$0xff]  ;;  %v5432_v37 = vmax.f32 %v2041_v15, %v2081_v3 }
 0x1ad   : > { %v2082_v0 = vld [vmem:[#allocation2 + $0xca] sm:$0xff]  ;;  %v5429_v39 = vmax.f32 %v2040_v12, %v2080_v57  ;;  %v2085_v29 = vld [vmem:[#allocation2 + $0xf2] sm:$0xff]  ;;  %v5436_v28 = vmax.f32 %v2043_v21, %v2083_v33 }
 0x1ae   : > { %v2084_v8 = vld [vmem:[#allocation2 + $0xea] sm:$0xff]  ;;  %v2091_v45 = vld [vmem:[#allocation2 + $0x152] sm:$0xff]  ;;  %v5434_v46 = vmax.f32 %v2042_v49, %v2082_v0  ;;  %v5440_v40 = vmax.f32 %v2045_v63, %v2085_v29  ;;  %v2159_v32 = vmax.f32 %v5274_v44, %v5432_v37 }
 0x1af   : > { %v2088_v60 = vld [vmem:[#allocation2 + $0x12a] sm:$0xff]  ;;  %v5438_v1 = vmax.f32 %v2044_v50, %v2084_v8  ;;  %v2089_v52 = vld [vmem:[#allocation2 + $0x132] sm:$0xff]  ;;  %v5452_v24 = vmax.f32 %v2051_v56, %v2091_v45  ;;  %v2158_v27 = vmax.f32 %v5268_v9, %v5429_v39  ;;  %v2161_v61 = vmax.f32 %v5432_v37, %v5436_v28 }
 0x1b0   : > { %v2090_v14 = vld [vmem:[#allocation2 + $0x14a] sm:$0xff]  ;;  %v5442_v4 = vmax.f32 %v2048_v42, %v2088_v60  ;;  %v6561_v58 = vld [vmem:[#allocation11_spill] sm:$0xff]  ;;  %v5448_v21 = vmax.f32 %v2049_v26, %v2089_v52  ;;  %v2160_v10 = vmax.f32 %v5429_v39, %v5434_v46  ;;  %v6563_v60 = vmax.f32 %v5260_v55, %v5268_v9 }
 0x1b1   : > { %v2092_v19 = vld [vmem:[#allocation2 + $0x16a] sm:$0xff]  ;;  %v2087_v15 = vld [vmem:[#allocation2 + $0x112] sm:$0xff]  ;;  %v5450_v50 = vmax.f32 %v2050_v41, %v2090_v14  ;;  %v2162_v26 = vmax.f32 %v5434_v46, %v5438_v1  ;;  %v2163_v41 = vmax.f32 %v5436_v28, %v5440_v40  ;;  %v6564_v52 = vmax.f32 %v5263_v53, %v5274_v44 }
 0x1b2   : > { %v6560_v12 = vld [vmem:[#allocation9_spill] sm:$0xff]  ;;  %v2093_v49 = vld [vmem:[#allocation2 + $0x172] sm:$0xff]  ;;  %v5454_v36 = vmax.f32 %v2052_v6, %v2092_v19  ;;  %v5458_v63 = vmax.f32 %v2047_v35, %v2087_v15  ;;  %v2169_v35 = vmax.f32 %v5448_v21, %v5452_v24  ;;  %v2188_v45 = vmax.f32 %v6563_v60, %v5429_v39 }
 0x1b3   : > { %v744_v17 = vpack.c.bf16 %v6561_v58, %v6560_v12  ;;  %v2086_v18 = vld [vmem:[#allocation2 + $0x10a] sm:$0xff]  ;;  %v5460_v42 = vmax.f32 %v2053_v2, %v2093_v49  ;;  %v6562_v8 = vld [vmem:[#allocation43_spill] sm:$0xff]  ;;  %v2189_v14 = vmax.f32 %v6564_v52, %v5432_v37  ;;  %v2190_v19 = vmax.f32 %v2158_v27, %v5434_v46 }
 0x1b4   : > { %v5456_v5 = vmax.f32 %v2046_v7, %v2086_v18  ;;  %v2165_v6 = vmax.f32 %v5440_v40, %v5458_v63  ;;  %v2167_v3 = vmax.f32 %v5458_v63, %v5448_v21  ;;  %v2168_v7 = vmax.f32 %v5442_v4, %v5450_v50  ;;  %v2566_v31 = vld [vmem:[#allocation2 + $0x26] sm:$0xff] }
 0x1b5   : > { %v2170_v2 = vmax.f32 %v5450_v50, %v5454_v36  ;;  %v2171_v0 = vmax.f32 %v5452_v24, %v5460_v42  ;;  %v2172_v33 = vmax.f32 %v5454_v36, %v5353_v16  ;;  %v2173_v29 = vmax.f32 %v5460_v42, %v6562_v8  ;;  %3723 = vmatmul.msk.bf16.gmra.mxu1 %vm329_vm1, %v744_v17 }
 0x1b6   : > { %v2164_v56 = vmax.f32 %v5438_v1, %v5456_v5  ;;  %v2166_v57 = vmax.f32 %v5456_v5, %v5442_v4  ;;  %v2191_v12 = vmax.f32 %v2159_v32, %v5436_v28  ;;  %v2192_v58 = vmax.f32 %v2160_v10, %v5438_v1 }
 0x1b7   : > { %v2193_v18 = vmax.f32 %v2161_v61, %v5440_v40  ;;  %v2194_v15 = vmax.f32 %v2162_v26, %v5456_v5  ;;  %v2195_v55 = vmax.f32 %v2163_v41, %v5458_v63  ;;  %v2197_v17 = vmax.f32 %v2165_v6, %v5448_v21  ;;  %v6565_v41 = vld [vmem:[#allocation44_spill] sm:$0xff] }
 0x1b8   : > { %v2196_v49 = vmax.f32 %v2164_v56, %v5442_v4  ;;  %v2198_v60 = vmax.f32 %v2166_v57, %v5450_v50  ;;  %v5513_v53 = vmax.f32 %v2167_v3, %v5452_v24  ;;  %v5516_v27 = vmax.f32 %v2168_v7, %v5454_v36 }
 0x1b9   : > { %v5519_v32 = vmax.f32 %v2169_v35, %v5460_v42  ;;  %v5522_v10 = vmax.f32 %v2170_v2, %v5353_v16  ;;  %v5525_v61 = vmax.f32 %v2171_v0, %v6562_v8  ;;  %v5528_v26 = vmax.f32 %v2172_v33, %v5064_v38  ;;  %3736 = vmatmul.msk.bf16.gmra.mxu2 %vm329_vm1, %v1541_v59 }
 0x1ba   : > { %v5531_v56 = vmax.f32 %v2173_v29, %v6565_v41  ;;  %v2218_v6 = vmax.f32 %v5379_v43, %v5429_v39  ;;  %v2219_v57 = vmax.f32 %v5387_v20, %v5432_v37  ;;  %v2220_v3 = vmax.f32 %v2188_v45, %v5434_v46 }
 0x1bb   : > { %v2221_v7 = vmax.f32 %v2189_v14, %v5436_v28  ;;  %v2222_v35 = vmax.f32 %v2190_v19, %v5438_v1  ;;  %v2223_v2 = vmax.f32 %v2191_v12, %v5440_v40  ;;  %v2224_v0 = vmax.f32 %v2192_v58, %v5456_v5 }
 0x1bc   : > { %v2225_v33 = vmax.f32 %v2193_v18, %v5458_v63  ;;  %v2226_v29 = vmax.f32 %v2194_v15, %v5442_v4  ;;  %v2227_v52 = vmax.f32 %v2195_v55, %v5448_v21  ;;  %v2228_v43 = vmax.f32 %v2196_v49, %v5450_v50  ;;  %v2564_v49 = vld [vmem:[#allocation2 + $0x6] sm:$0xff] }
 0x1bd   : > { %v2229_v20 = vmax.f32 %v2197_v17, %v5452_v24  ;;  %v2230_v45 = vmax.f32 %v2198_v60, %v5454_v36  ;;  %v2231_v14 = vmax.f32 %v5513_v53, %v5460_v42  ;;  %v6566_v19 = vmax.f32 %v5376_v34, %v5268_v9  ;;  %v2565_v17 = vld [vmem:[#allocation2 + $0xe] sm:$0xff] }
 0x1be   : > { %v2232_v58 = vmax.f32 %v5516_v27, %v5353_v16  ;;  %v2249_v18 = vmax.f32 %v2217_v22, %v5432_v37  ;;  %v5562_v15 = vmax.f32 %v2218_v6, %v5434_v46  ;;  %v5565_v55 = vmax.f32 %v2219_v57, %v5436_v28  ;;  %v2567_v22 = vld [vmem:[#allocation2 + $0x2e] sm:$0xff]  ;;  %v2568_v37 = vld [vmem:[#allocation2 + $0x46] sm:$0xff] }
 0x1bf   : > { %v2248_v12 = vmax.f32 %v6566_v19, %v5429_v39  ;;  %v5574_v44 = vmax.f32 %v2220_v3, %v5438_v1  ;;  %v2604_v46 = vld [vmem:[#allocation2 + $0x7] sm:$0xff]  ;;  %v2605_v28 = vld [vmem:[#allocation2 + $0xf] sm:$0xff]  ;;  %v5582_v53 = vmax.f32 %v2221_v7, %v5440_v40  ;;  %v5585_v27 = vmax.f32 %v2222_v35, %v5456_v5 }
 0x1c0   : > { %2535 = vst.msk [vmem:[#allocation2 + $0x70] sm:$0xff] %vm329_vm1, %v2249_v18  ;;  %v2569_v1 = vld [vmem:[#allocation2 + $0x4e] sm:$0xff]  ;;  %v5589_v3 = vmax.f32 %v2223_v2, %v5458_v63  ;;  %v5592_v19 = vmax.f32 %v2224_v0, %v5442_v4  ;;  %v5595_v59 = vmax.f32 %v2225_v33, %v5448_v21  ;;  %v5598_v40 = vmax.f32 %v2226_v29, %v5450_v50 }
 0x1c1   : > { %2534 = vst.msk [vmem:[#allocation2 + $0x68] sm:$0xff] %vm329_vm1, %v2248_v12  ;;  %v2606_v6 = vld [vmem:[#allocation2 + $0x27] sm:$0xff]  ;;  %v2607_v57 = vld [vmem:[#allocation2 + $0x2f] sm:$0xff]  ;;  %v5603_v60 = vmax.f32 %v2227_v52, %v5452_v24  ;;  %v5606_v63 = vmax.f32 %v2228_v43, %v5454_v36  ;;  %v5609_v4 = vmax.f32 %v2229_v20, %v5460_v42  ;;  %v5612_v21 = vmax.f32 %v2230_v45, %v5353_v16 }
 0x1c2   : > { %6567 = vst [vmem:[#allocation15_spill] sm:$0xff] %v5595_v59  ;;  %v2608_v5 = vld [vmem:[#allocation2 + $0x47] sm:$0xff]  ;;  %v2609_v7 = vld [vmem:[#allocation2 + $0x4f] sm:$0xff]  ;;  %v5617_v33 = vmax.f32 %v2231_v14, %v6562_v8  ;;  %v2311_v24 = vpack.c.bf16 %v2249_v18, %v2248_v12  ;;  %v2644_v36 = vmax.f32 %v2564_v49, %v2604_v46  ;;  %v2645_v29 = vmax.f32 %v2565_v17, %v2605_v28 }
 0x1c3   : > { %2536 = vst.msk [vmem:[#allocation2 + $0x88] sm:$0xff] %vm329_vm1, %v5562_v15  ;;  %v2684_v35 = vld [vmem:[#allocation2 + $0x8] sm:$0xff]  ;;  %v2685_v50 = vld [vmem:[#allocation2 + $0x10] sm:$0xff]  ;;  %v2646_v16 = vmax.f32 %v2566_v31, %v2606_v6  ;;  %v2647_v20 = vmax.f32 %v2567_v22, %v2607_v57  ;;  %v2648_v45 = vmax.f32 %v2568_v37, %v2608_v5  ;;  %v2649_v39 = vmax.f32 %v2569_v1, %v2609_v7 }
 0x1c4   : > { %2537 = vst.msk [vmem:[#allocation2 + $0x90] sm:$0xff] %vm329_vm1, %v5565_v55  ;;  %v2686_v2 = vld [vmem:[#allocation2 + $0x28] sm:$0xff]  ;;  %v2687_v0 = vld [vmem:[#allocation2 + $0x30] sm:$0xff]  ;;  %v5624_v12 = vmax.f32 %v2232_v58, %v5064_v38  ;;  %3749 = vmatmul.msk.bf16.gmra.mxu3 %vm329_vm1, %v2311_v24  ;;  %v2724_v18 = vmax.f32 %v2644_v36, %v2684_v35  ;;  %v2725_v49 = vmax.f32 %v2645_v29, %v2685_v50 }
 0x1c5   : > { %2538 = vst.msk [vmem:[#allocation2 + $0xa8] sm:$0xff] %vm329_vm1, %v5574_v44  ;;  %v2688_v42 = vld [vmem:[#allocation2 + $0x48] sm:$0xff]  ;;  %v2689_v52 = vld [vmem:[#allocation2 + $0x50] sm:$0xff]  ;;  %v2726_v37 = vmax.f32 %v2646_v16, %v2686_v2  ;;  %v2727_v1 = vmax.f32 %v2647_v20, %v2687_v0  ;;  %v6568_v7 = vmax.f32 %v5519_v32, %v6562_v8  ;;  %v5639_v0 = vpop.f32.mrf.mxu1 }
 0x1c6   : > { %v2764_v43 = vld [vmem:[#allocation2 + $0x9] sm:$0xff]  ;;  %2539 = vst.msk [vmem:[#allocation2 + $0xb0] sm:$0xff] %vm329_vm1, %v5582_v53  ;;  %v2765_v34 = vld [vmem:[#allocation2 + $0x11] sm:$0xff]  ;;  %v2728_v6 = vmax.f32 %v2648_v45, %v2688_v42  ;;  %v2729_v58 = vmax.f32 %v2649_v39, %v2689_v52 }
 0x1c7   : > { %v2766_v9 = vld [vmem:[#allocation2 + $0x29] sm:$0xff]  ;;  %v2767_v14 = vld [vmem:[#allocation2 + $0x31] sm:$0xff]  ;;  %2540 = vst.msk [vmem:[#allocation2 + $0xc8] sm:$0xff] %vm329_vm1, %v5585_v27  ;;  %v5635_v35 = vmax.f32 %v6568_v7, %v6565_v41  ;;  %v2804_v29 = vmax.f32 %v2724_v18, %v2764_v43  ;;  %v2805_v23 = vmax.f32 %v2725_v49, %v2765_v34 }
 0x1c8   : > { %v2768_v17 = vld [vmem:[#allocation2 + $0x49] sm:$0xff]  ;;  %v2845_v28 = vld [vmem:[#allocation2 + $0x12] sm:$0xff]  ;;  %2541 = vst.msk [vmem:[#allocation2 + $0xd0] sm:$0xff] %vm329_vm1, %v5589_v3  ;;  %v2806_v32 = vmax.f32 %v2726_v37, %v2766_v9  ;;  %v2807_v16 = vmax.f32 %v2727_v1, %v2767_v14 }
 0x1c9   : > { %v2844_v46 = vld [vmem:[#allocation2 + $0xa] sm:$0xff]  ;;  %2542 = vst.msk [vmem:[#allocation2 + $0xe8] sm:$0xff] %vm329_vm1, %v5592_v19  ;;  %v2847_v2 = vld [vmem:[#allocation2 + $0x32] sm:$0xff]  ;;  %v2808_v20 = vmax.f32 %v2728_v6, %v2768_v17  ;;  %v2885_v17 = vmax.f32 %v2805_v23, %v2845_v28 }
 0x1ca   : > { %v2570_v31 = vld [vmem:[#allocation2 + $0x66] sm:$0xff]  ;;  %v2769_v57 = vld [vmem:[#allocation2 + $0x51] sm:$0xff]  ;;  %2543 = vst.msk [vmem:[#allocation2 + $0xf0] sm:$0xff] %vm329_vm1, %v5595_v59  ;;  %v2884_v7 = vmax.f32 %v2804_v29, %v2844_v46  ;;  %v5651_v46 = vmax.f32 %v2807_v16, %v2847_v2 }
 0x1cb   : > { %v2610_v22 = vld [vmem:[#allocation2 + $0x67] sm:$0xff]  ;;  %v2611_v24 = vld [vmem:[#allocation2 + $0x6f] sm:$0xff]  ;;  %2544 = vst.msk [vmem:[#allocation2 + $0x108] sm:$0xff] %vm329_vm1, %v5598_v40 }
 0x1cc   : > { %v2846_v5 = vld [vmem:[#allocation2 + $0x2a] sm:$0xff]  ;;  %v2650_v36 = vmax.f32 %v2570_v31, %v2610_v22  ;;  %v2809_v22 = vmax.f32 %v2729_v58, %v2769_v57  ;;  %2545 = vst.msk [vmem:[#allocation2 + $0x110] sm:$0xff] %vm329_vm1, %v5603_v60  ;;  %v2849_v58 = vld [vmem:[#allocation2 + $0x52] sm:$0xff] }
 0x1cd   : > { %v2571_v50 = vld [vmem:[#allocation2 + $0x6e] sm:$0xff]  ;;  %v2572_v39 = vld [vmem:[#allocation2 + $0x86] sm:$0xff]  ;;  %v5647_v37 = vmax.f32 %v2806_v32, %v2846_v5  ;;  %2546 = vst.msk [vmem:[#allocation2 + $0x128] sm:$0xff] %vm329_vm1, %v5606_v63 }
 0x1ce   : > { %v2612_v42 = vld [vmem:[#allocation2 + $0x87] sm:$0xff]  ;;  %v2651_v52 = vmax.f32 %v2571_v50, %v2611_v24  ;;  %v2613_v43 = vld [vmem:[#allocation2 + $0x8f] sm:$0xff]  ;;  %2547 = vst.msk [vmem:[#allocation2 + $0x130] sm:$0xff] %vm329_vm1, %v5609_v4  ;;  %v5657_v28 = vmax.f32 %v2809_v22, %v2849_v58  ;;  %v6571_v22 = vmax.f32 %v5528_v26, %v5115_v51 }
 0x1cf   : > { %v2690_v8 = vld [vmem:[#allocation2 + $0x68] sm:$0xff]  ;;  %v2652_v34 = vmax.f32 %v2572_v39, %v2612_v42  ;;  %v2691_v18 = vld [vmem:[#allocation2 + $0x70] sm:$0xff]  ;;  %v2924_v5 = vmax.f32 %v2884_v7, %v5647_v37  ;;  %2548 = vst.msk [vmem:[#allocation2 + $0x148] sm:$0xff] %vm329_vm1, %v5612_v21 }
 0x1d0   : > { %v2848_v45 = vld [vmem:[#allocation2 + $0x4a] sm:$0xff]  ;;  %v2730_v49 = vmax.f32 %v2650_v36, %v2690_v8  ;;  %v2731_v24 = vmax.f32 %v2651_v52, %v2691_v18  ;;  %v6569_v52 = vmax.f32 %v5522_v10, %v5064_v38  ;;  %v2851_v16 = vld [vmem:[#allocation2 + $0x72] sm:$0xff]  ;;  %2549 = vst.msk [vmem:[#allocation2 + $0x150] sm:$0xff] %vm329_vm1, %v5617_v33  ;;  %v5686_v7 = vmax.f32 %v6571_v22, %v5117_v54 }
 0x1d1   : > { %v2573_v31 = vld [vmem:[#allocation2 + $0x8e] sm:$0xff]  ;;  %v5653_v57 = vmax.f32 %v2808_v20, %v2848_v45  ;;  %v6570_v45 = vmax.f32 %v5525_v61, %v6565_v41  ;;  %2550 = vst.msk [vmem:[#allocation2 + $0x168] sm:$0xff] %vm329_vm1, %v5624_v12  ;;  %v2574_v26 = vld [vmem:[#allocation2 + $0xa6] sm:$0xff] }
 0x1d2   : > { %v2653_v59 = vmax.f32 %v2573_v31, %v2613_v43  ;;  %v2692_v50 = vld [vmem:[#allocation2 + $0x88] sm:$0xff]  ;;  %v2693_v1 = vld [vmem:[#allocation2 + $0x90] sm:$0xff]  ;;  %v5664_v8 = vmax.f32 %v6569_v52, %v5115_v51  ;;  %2551 = vst.msk [vmem:[#allocation2 + $0x170] sm:$0xff] %vm329_vm1, %v5635_v35 }
 0x1d3   : > { %v2770_v9 = vld [vmem:[#allocation2 + $0x69] sm:$0xff]  ;;  %v2732_v6 = vmax.f32 %v2652_v34, %v2692_v50  ;;  %v2771_v39 = vld [vmem:[#allocation2 + $0x71] sm:$0xff]  ;;  %v5675_v31 = vmax.f32 %v6570_v45, %v5090_v30  ;;  %v2956_v34 = vmax.f32 %v2924_v5, %v5653_v57  ;;  %2554 = vst.msk [vmem:[#allocation2 + $0x1a8] sm:$0xff] %vm329_vm1, %v5686_v7 }
 0x1d4   : > { %v2772_v14 = vld [vmem:[#allocation2 + $0x89] sm:$0xff]  ;;  %v2810_v36 = vmax.f32 %v2730_v49, %v2770_v9  ;;  %v2733_v29 = vmax.f32 %v2653_v59, %v2693_v1  ;;  %v2811_v42 = vmax.f32 %v2731_v24, %v2771_v39  ;;  %v2773_v2 = vld [vmem:[#allocation2 + $0x91] sm:$0xff]  ;;  %v2925_v59 = vmax.f32 %v2885_v17, %v5651_v46  ;;  %v814_v24 = vpop.f32.mrf.mxu1  ;;  %2552 = vst.msk [vmem:[#allocation2 + $0x188] sm:$0xff] %vm329_vm1, %v5664_v8 }
 0x1d5   : > { %v2850_v23 = vld [vmem:[#allocation2 + $0x6a] sm:$0xff]  ;;  %v2812_v32 = vmax.f32 %v2732_v6, %v2772_v14  ;;  %v2853_v61 = vld [vmem:[#allocation2 + $0x92] sm:$0xff]  ;;  %v6572_v9 = vmax.f32 %v5531_v56, %v5090_v30  ;;  %2553 = vst.msk [vmem:[#allocation2 + $0x190] sm:$0xff] %vm329_vm1, %v5675_v31  ;;  %v1542_v30 = vpack.c.bf16 %v5335_v25, %v5330_v11  ;;  %v2312_v39 = vpack.c.bf16 %v5565_v55, %v5562_v15 }
 0x1d6   : > { %v5668_v20 = vmax.f32 %v2810_v36, %v2850_v23  ;;  %v2813_v38 = vmax.f32 %v2733_v29, %v2773_v2  ;;  %v2852_v10 = vld [vmem:[#allocation2 + $0x8a] sm:$0xff]  ;;  %v5679_v43 = vmax.f32 %v2811_v42, %v2851_v16  ;;  %v2957_v50 = vmax.f32 %v2925_v59, %v5657_v28  ;;  %893 = vst.msk [vmem:[#allocation3] sm:$0xff] %vm892_vm3, %v5639_v0  ;;  %v6573_v0 = vld [vmem:[#allocation12_spill] sm:$0xff] }
 0x1d7   : > { %v2575_v18 = vld [vmem:[#allocation2 + $0xae] sm:$0xff]  ;;  %v5690_v41 = vmax.f32 %v2812_v32, %v2852_v10  ;;  %v5697_v14 = vmax.f32 %v6572_v9, %v5119_v47  ;;  %3750 = vmatmul.msk.bf16.gmra.mxu3 %vm329_vm1, %v2312_v39  ;;  %v2927_v11 = vmax.f32 %v5651_v46, %v5657_v28  ;;  %3737 = vmatmul.msk.bf16.gmra.mxu2 %vm329_vm1, %v1542_v30  ;;  %v6574_v32 = vld [vmem:[#allocation16_spill] sm:$0xff] }
 0x1d8   : > { %v2615_v49 = vld [vmem:[#allocation2 + $0xaf] sm:$0xff]  ;;  %v5701_v51 = vmax.f32 %v2813_v38, %v2853_v61  ;;  %v2988_v54 = vmax.f32 %v2956_v34, %v5668_v20  ;;  %v2614_v17 = vld [vmem:[#allocation2 + $0xa7] sm:$0xff]  ;;  %v2989_v1 = vmax.f32 %v2957_v50, %v5679_v43  ;;  %894 = vst.msk [vmem:[#allocation3 + $0x8] sm:$0xff] %vm892_vm3, %v814_v24  ;;  %v2926_v55 = vmax.f32 %v5647_v37, %v5653_v57 }
 0x1d9   : > { %v2655_v6 = vmax.f32 %v2575_v18, %v2615_v49  ;;  %v2654_v36 = vmax.f32 %v2574_v26, %v2614_v17  ;;  %2555 = vst.msk [vmem:[#allocation2 + $0x1b0] sm:$0xff] %vm329_vm1, %v5697_v14  ;;  %v2695_v58 = vld [vmem:[#allocation2 + $0xb0] sm:$0xff]  ;;  %v2694_v25 = vld [vmem:[#allocation2 + $0xa8] sm:$0xff]  ;;  %v2959_v2 = vmax.f32 %v2927_v11, %v5679_v43  ;;  %v745_v16 = vpack.c.bf16 %v6574_v32, %v6573_v0 }
 0x1da   : > { %v3020_v47 = vmax.f32 %v2988_v54, %v5690_v41  ;;  %v3021_v56 = vmax.f32 %v2989_v1, %v5701_v51  ;;  %v2774_v5 = vld [vmem:[#allocation2 + $0xa9] sm:$0xff]  ;;  %v2775_v52 = vld [vmem:[#allocation2 + $0xb1] sm:$0xff]  ;;  %v2958_v45 = vmax.f32 %v2926_v55, %v5668_v20  ;;  %v2316_v54 = vpack.c.bf16 %v5603_v60, %v5598_v40 }
 0x1db   : > { %v2735_v42 = vmax.f32 %v2655_v6, %v2695_v58  ;;  %v2734_v15 = vmax.f32 %v2654_v36, %v2694_v25  ;;  %v2855_v38 = vld [vmem:[#allocation2 + $0xb2] sm:$0xff]  ;;  %3724 = vmatmul.msk.bf16.gmra.mxu1 %vm329_vm1, %v745_v16  ;;  %v2991_v37 = vmax.f32 %v2959_v2, %v5701_v51  ;;  %v2854_v34 = vld [vmem:[#allocation2 + $0xaa] sm:$0xff]  ;;  %v2313_v6 = vpack.c.bf16 %v5582_v53, %v5574_v44 }
 0x1dc   : > { %v3084_v29 = vpack.c.bf16 %v3021_v56, %v3020_v47  ;;  %v817_v23 = vpop.f32.mrf.mxu1  ;;  %v2577_v18 = vld [vmem:[#allocation2 + $0xce] sm:$0xff]  ;;  %v2990_v61 = vmax.f32 %v2958_v45, %v5690_v41  ;;  %v2576_v24 = vld [vmem:[#allocation2 + $0xc6] sm:$0xff]  ;;  %v2317_v56 = vpack.c.bf16 %v5609_v4, %v5606_v63  ;;  %v2929_v58 = vmax.f32 %v5657_v28, %v5679_v43 }
 0x1dd   : > { %895 = vst.msk [vmem:[#allocation3 + $0x10] sm:$0xff] %vm892_vm3, %v817_v23  ;;  %v2815_v46 = vmax.f32 %v2735_v42, %v2775_v52  ;;  %v2814_v59 = vmax.f32 %v2734_v15, %v2774_v5  ;;  %v2617_v49 = vld [vmem:[#allocation2 + $0xcf] sm:$0xff]  ;;  %v2616_v9 = vld [vmem:[#allocation2 + $0xc7] sm:$0xff]  ;;  %v2928_v53 = vmax.f32 %v5653_v57, %v5668_v20 }
 0x1de   : > { %3765 = vmatmul.msk.bf16.vlgmr.msrb.gmra.mxu0 %vm329_vm1, %v3084_v29  ;;  %v2657_v17 = vmax.f32 %v2577_v18, %v2617_v49  ;;  %v2656_v30 = vmax.f32 %v2576_v24, %v2616_v9  ;;  %v2697_v47 = vld [vmem:[#allocation2 + $0xd0] sm:$0xff]  ;;  %v6575_v29 = vpack.c.bf16 %v5311_v13, %v5339_v62  ;;  %v2696_v42 = vld [vmem:[#allocation2 + $0xc8] sm:$0xff]  ;;  %v2961_v28 = vmax.f32 %v2929_v58, %v5701_v51  ;;  %v6578_v24 = vld [vmem:[#allocation31_spill] sm:$0xff] }
 0x1df   : > { %v5735_v10 = vmax.f32 %v2815_v46, %v2855_v38  ;;  %v5738_v22 = vmax.f32 %v2814_v59, %v2854_v34  ;;  %v2776_v25 = vld [vmem:[#allocation2 + $0xc9] sm:$0xff]  ;;  %v2777_v15 = vld [vmem:[#allocation2 + $0xd1] sm:$0xff]  ;;  %v2318_v13 = vpack.c.bf16 %v5617_v33, %v5612_v21  ;;  %v2960_v46 = vmax.f32 %v2928_v53, %v5690_v41 }
 0x1e0   : > { %v2737_v36 = vmax.f32 %v2657_v17, %v2697_v47  ;;  %v2736_v44 = vmax.f32 %v2656_v30, %v2696_v42  ;;  %v6576_v62 = vld [vmem:[#allocation21_spill] sm:$0xff]  ;;  %v2857_v2 = vld [vmem:[#allocation2 + $0xd2] sm:$0xff]  ;;  %v2319_v49 = vpack.c.bf16 %v5635_v35, %v5624_v12  ;;  %v1544_v9 = vpack.c.bf16 %v6578_v24, %v5344_v48  ;;  %v1614_v42 = vpop.f32.mrf.mxu2 }
 0x1e1   : > { %v3023_v26 = vmax.f32 %v2991_v37, %v5735_v10  ;;  %v3022_v1 = vmax.f32 %v2990_v61, %v5738_v22  ;;  %v6577_v23 = vld [vmem:[#allocation25_spill] sm:$0xff]  ;;  %v2993_v0 = vmax.f32 %v2961_v28, %v5735_v10  ;;  %v2992_v38 = vmax.f32 %v2960_v46, %v5738_v22  ;;  %v2699_v30 = vld [vmem:[#allocation2 + $0xf0] sm:$0xff] }
 0x1e2   : > { %v2817_v55 = vmax.f32 %v2737_v36, %v2777_v15  ;;  %v746_v5 = vpack.c.bf16 %v6577_v23, %v6576_v62  ;;  %v2816_v52 = vmax.f32 %v2736_v44, %v2776_v25  ;;  %v2856_v32 = vld [vmem:[#allocation2 + $0xca] sm:$0xff]  ;;  %v2314_v17 = vpack.c.bf16 %v5589_v3, %v5585_v27 }
 0x1e3   : > { %v3085_v39 = vpack.c.bf16 %v3023_v26, %v3022_v1  ;;  %v2579_v16 = vld [vmem:[#allocation2 + $0xee] sm:$0xff]  ;;  %v2578_v34 = vld [vmem:[#allocation2 + $0xe6] sm:$0xff]  ;;  %v2931_v36 = vmax.f32 %v5679_v43, %v5701_v51  ;;  %v2930_v27 = vmax.f32 %v5668_v20, %v5690_v41  ;;  %v2321_v44 = vpack.c.bf16 %v5697_v14, %v5686_v7 }
 0x1e4   : > { %v819_v50 = vpop.f32.mrf.mxu1  ;;  %v5768_v57 = vmax.f32 %v2817_v55, %v2857_v2  ;;  %v2619_v59 = vld [vmem:[#allocation2 + $0xef] sm:$0xff]  ;;  %v5771_v45 = vmax.f32 %v2816_v52, %v2856_v32  ;;  %v2618_v18 = vld [vmem:[#allocation2 + $0xe7] sm:$0xff] }
 0x1e5   : > { %896 = vst.msk [vmem:[#allocation3 + $0x18] sm:$0xff] %vm892_vm3, %v819_v50  ;;  %v2659_v50 = vmax.f32 %v2579_v16, %v2619_v59  ;;  %v2658_v1 = vmax.f32 %v2578_v34, %v2618_v18  ;;  %v2698_v48 = vld [vmem:[#allocation2 + $0xe8] sm:$0xff]  ;;  %v2963_v15 = vmax.f32 %v2931_v36, %v5735_v10  ;;  %v6579_v55 = vld [vmem:[#allocation8_spill] sm:$0xff]  ;;  %v6580_v28 = vld [vmem:[#allocation10_spill] sm:$0xff]  ;;  %v2962_v23 = vmax.f32 %v2930_v27, %v5738_v22 }
 0x1e6   : > { %v3025_v61 = vmax.f32 %v2993_v0, %v5768_v57  ;;  %v3024_v26 = vmax.f32 %v2992_v38, %v5771_v45  ;;  %v2778_v53 = vld [vmem:[#allocation2 + $0xe9] sm:$0xff]  ;;  %v747_v62 = vpack.c.bf16 %v6580_v28, %v6579_v55  ;;  %v2787_v33 = vld [vmem:[#allocation2 + $0x171] sm:$0xff] }
 0x1e7   : > { %3751 = vmatmul.msk.bf16.gmra.mxu3 %vm329_vm1, %v2313_v6  ;;  %3738 = vmatmul.msk.bf16.gmra.mxu2 %vm329_vm1, %v6575_v29  ;;  %v2320_v6 = vpack.c.bf16 %v5675_v31, %v5664_v8  ;;  %v2738_v58 = vmax.f32 %v2658_v1, %v2698_v48  ;;  %v1504_v29 = vld [vmem:[#allocation3] sm:$0xff]  ;;  %v2995_v46 = vmax.f32 %v2963_v15, %v5768_v57  ;;  %v2858_v2 = vld [vmem:[#allocation2 + $0xea] sm:$0xff] }
 0x1e8   : > { %v3086_v47 = vpack.c.bf16 %v3025_v61, %v3024_v26  ;;  %v1694_v43 = vadd.f32 %v1614_v42, %v1504_v29  ;;  %v2994_v32 = vmax.f32 %v2962_v23, %v5771_v45  ;;  %v2581_v59 = vld [vmem:[#allocation2 + $0x10e] sm:$0xff]  ;;  %v2580_v34 = vld [vmem:[#allocation2 + $0x106] sm:$0xff]  ;;  %v6582_v26 = vld [vmem:[#allocation7_spill] sm:$0xff] }
 0x1e9   : > { %v2818_v20 = vmax.f32 %v2738_v58, %v2778_v53  ;;  %v2621_v38 = vld [vmem:[#allocation2 + $0x10f] sm:$0xff]  ;;  %v2620_v18 = vld [vmem:[#allocation2 + $0x107] sm:$0xff] }
 0x1ea   : > { %1726 = vst.msk [vmem:[#allocation3] sm:$0xff] %vm892_vm3, %v1694_v43  ;;  %v2701_v36 = vld [vmem:[#allocation2 + $0x110] sm:$0xff]  ;;  %v1505_v27 = vld [vmem:[#allocation3 + $0x8] sm:$0xff] }
 0x1eb   : > { %3725 = vmatmul.msk.bf16.gmra.mxu1 %vm329_vm1, %v746_v5  ;;  %v2859_v5 = vld [vmem:[#allocation2 + $0xf2] sm:$0xff]  ;;  %v5804_v0 = vmax.f32 %v2818_v20, %v2858_v2  ;;  %v2700_v29 = vld [vmem:[#allocation2 + $0x108] sm:$0xff] }
 0x1ec   : > { %v822_v11 = vpop.f32.mrf.mxu1  ;;  %v2781_v43 = vld [vmem:[#allocation2 + $0x111] sm:$0xff]  ;;  %v6585_v15 = vld [vmem:[#allocation17_spill] sm:$0xff] }
 0x1ed   : > { %897 = vst.msk [vmem:[#allocation3 + $0x20] sm:$0xff] %vm892_vm3, %v822_v11  ;;  %v2779_v11 = vld [vmem:[#allocation2 + $0xf1] sm:$0xff]  ;;  %v3026_v61 = vmax.f32 %v2994_v32, %v5804_v0  ;;  %v2786_v21 = vld [vmem:[#allocation2 + $0x169] sm:$0xff] }
 0x1ee   : > { %3766 = vmatmul.msk.bf16.gmra.mxu0 %vm329_vm1, %v3085_v39  ;;  %v2739_v39 = vmax.f32 %v2659_v50, %v2699_v30  ;;  %v6581_v50 = vld [vmem:[#allocation15_spill] sm:$0xff]  ;;  %v1506_v32 = vld [vmem:[#allocation3 + $0x10] sm:$0xff] }
 0x1ef   : > { %v2315_v24 = vpack.c.bf16 %v6581_v50, %v5592_v19  ;;  %v2932_v19 = vmax.f32 %v5690_v41, %v5738_v22  ;;  %v2861_v23 = vld [vmem:[#allocation2 + $0x112] sm:$0xff]  ;;  %v2582_v50 = vld [vmem:[#allocation2 + $0x126] sm:$0xff] }
 0x1f0   : > { %v2819_v25 = vmax.f32 %v2739_v39, %v2779_v11  ;;  %v2933_v39 = vmax.f32 %v5701_v51, %v5735_v10  ;;  %v2780_v51 = vld [vmem:[#allocation2 + $0x109] sm:$0xff] }
 0x1f1   : > { %v2964_v41 = vmax.f32 %v2932_v19, %v5771_v45  ;;  %v2278_v40 = vld [vmem:[#allocation3] sm:$0xff] }
 0x1f2   : > { %v5801_v52 = vmax.f32 %v2819_v25, %v2859_v5  ;;  %v2965_v11 = vmax.f32 %v2933_v39, %v5768_v57  ;;  %v6584_v25 = vld [vmem:[#allocation13_spill] sm:$0xff] }
 0x1f3   : > { %v748_v55 = vpack.c.bf16 %v6585_v15, %v6584_v25  ;;  %v6588_v25 = vld [vmem:[#allocation18_spill] sm:$0xff] }
 0x1f4   : > { %v824_v37 = vpop.f32.mrf.mxu1  ;;  %v2997_v20 = vmax.f32 %v2965_v11, %v5801_v52  ;;  %v6589_v15 = vld [vmem:[#allocation22_spill] sm:$0xff] }
 0x1f5   : > { %898 = vst.msk [vmem:[#allocation3 + $0x28] sm:$0xff] %vm892_vm3, %v824_v37  ;;  %v3027_v37 = vmax.f32 %v2995_v46, %v5801_v52  ;;  %v2996_v46 = vmax.f32 %v2964_v41, %v5804_v0 }
 0x1f7   : > { %3752 = vmatmul.msk.bf16.gmra.mxu3 %vm329_vm1, %v2314_v17  ;;  %3739 = vmatmul.msk.bf16.gmra.mxu2 %vm329_vm1, %v1544_v9  ;;  %v2661_v9 = vmax.f32 %v2581_v59, %v2621_v38  ;;  %v6583_v17 = vld [vmem:[#allocation32_spill] sm:$0xff]  ;;  %v3087_v30 = vpack.c.bf16 %v3027_v37, %v3026_v61  ;;  %v2860_v59 = vld [vmem:[#allocation2 + $0x10a] sm:$0xff] }
 0x1f8   : > { %v1545_v1 = vpack.c.bf16 %v6583_v17, %v6582_v26  ;;  %v2583_v38 = vld [vmem:[#allocation2 + $0x12e] sm:$0xff] }
 0x1f9   : > { %v2741_v48 = vmax.f32 %v2661_v9, %v2701_v36  ;;  %v2623_v37 = vld [vmem:[#allocation2 + $0x12f] sm:$0xff]  ;;  %v2935_v36 = vmax.f32 %v5735_v10, %v5768_v57 }
 0x1fa   : > { %v2663_v26 = vmax.f32 %v2583_v38, %v2623_v37  ;;  %v6586_v17 = vld [vmem:[#allocation29_spill] sm:$0xff] }
 0x1fb   : > { %3726 = vmatmul.msk.bf16.gmra.mxu1 %vm329_vm1, %v747_v62  ;;  %v2821_v28 = vmax.f32 %v2741_v48, %v2781_v43  ;;  %v2703_v48 = vld [vmem:[#allocation2 + $0x130] sm:$0xff]  ;;  %v2967_v10 = vmax.f32 %v2935_v36, %v5801_v52 }
 0x1fc   : > { %v827_v3 = vpop.f32.mrf.mxu1  ;;  %v2743_v19 = vmax.f32 %v2663_v26, %v2703_v48  ;;  %v2783_v43 = vld [vmem:[#allocation2 + $0x131] sm:$0xff]  ;;  %v2937_v48 = vmax.f32 %v5768_v57, %v5801_v52 }
 0x1fd   : > { %899 = vst.msk [vmem:[#allocation3 + $0x30] sm:$0xff] %vm892_vm3, %v827_v3  ;;  %v1616_v3 = vpop.f32.mrf.mxu2  ;;  %v5829_v5 = vmax.f32 %v2821_v28, %v2861_v23  ;;  %v2585_v38 = vld [vmem:[#allocation2 + $0x14e] sm:$0xff] }
 0x1fe   : > { %3767 = vmatmul.msk.bf16.gmra.mxu0 %vm329_vm1, %v3086_v47  ;;  %v2660_v47 = vmax.f32 %v2580_v34, %v2620_v18  ;;  %v1695_v42 = vadd.f32 %v1616_v3, %v1505_v27  ;;  %v1507_v3 = vld [vmem:[#allocation3 + $0x18] sm:$0xff]  ;;  %v2625_v37 = vld [vmem:[#allocation2 + $0x14f] sm:$0xff] }
 0x1ff   : > { %v3029_v61 = vmax.f32 %v2997_v20, %v5829_v5  ;;  %v2863_v20 = vld [vmem:[#allocation2 + $0x132] sm:$0xff]  ;;  %v2969_v57 = vmax.f32 %v2937_v48, %v5829_v5 }
 0x200   : > { %v2740_v53 = vmax.f32 %v2660_v47, %v2700_v29  ;;  %1727 = vst.msk [vmem:[#allocation3 + $0x8] sm:$0xff] %vm892_vm3, %v1695_v42  ;;  %v2702_v42 = vld [vmem:[#allocation2 + $0x128] sm:$0xff] }
 0x202   : > { %v2820_v62 = vmax.f32 %v2740_v53, %v2780_v51  ;;  %v2782_v51 = vld [vmem:[#allocation2 + $0x129] sm:$0xff] }
 0x204   : > { %v829_v16 = vpop.f32.mrf.mxu1  ;;  %v5833_v18 = vmax.f32 %v2820_v62, %v2860_v59  ;;  %v2999_v62 = vmax.f32 %v2967_v10, %v5829_v5  ;;  %v2862_v59 = vld [vmem:[#allocation2 + $0x12a] sm:$0xff] }
 0x205   : > { %900 = vst.msk [vmem:[#allocation3 + $0x38] sm:$0xff] %vm892_vm3, %v829_v16  ;;  %v1619_v16 = vpop.f32.mrf.mxu2  ;;  %v2785_v10 = vld [vmem:[#allocation2 + $0x151] sm:$0xff] }
 0x206   : > { %v1696_v34 = vadd.f32 %v1619_v16, %v1506_v32  ;;  %v3028_v9 = vmax.f32 %v2996_v46, %v5833_v18  ;;  %v1508_v32 = vld [vmem:[#allocation3 + $0x20] sm:$0xff] }
 0x207   : > { %3753 = vmatmul.msk.bf16.gmra.mxu3 %vm329_vm1, %v2315_v24  ;;  %3740 = vmatmul.msk.bf16.gmra.mxu2 %vm329_vm1, %v1545_v1  ;;  %v2622_v24 = vld [vmem:[#allocation2 + $0x127] sm:$0xff] }
 0x208   : > { %1728 = vst.msk [vmem:[#allocation3 + $0x10] sm:$0xff] %vm892_vm3, %v1696_v34  ;;  %v6587_v1 = vld [vmem:[#allocation33_spill] sm:$0xff]  ;;  %v3088_v47 = vpack.c.bf16 %v3029_v61, %v3028_v9  ;;  %v2662_v39 = vmax.f32 %v2582_v50, %v2622_v24 }
 0x209   : > { %v2584_v24 = vld [vmem:[#allocation2 + $0x146] sm:$0xff] }
 0x20a   : > { %v2742_v53 = vmax.f32 %v2662_v39, %v2702_v42  ;;  %v2624_v9 = vld [vmem:[#allocation2 + $0x147] sm:$0xff] }
 0x20b   : > { %3727 = vmatmul.msk.bf16.gmra.mxu1 %vm329_vm1, %v748_v55  ;;  %v2823_v55 = vmax.f32 %v2743_v19, %v2783_v43  ;;  %v2664_v36 = vmax.f32 %v2584_v24, %v2624_v9  ;;  %v2705_v19 = vld [vmem:[#allocation2 + $0x150] sm:$0xff]  ;;  %v2279_v4 = vld [vmem:[#allocation3 + $0x8] sm:$0xff] }
 0x20c   : > { %v832_v58 = vpop.f32.mrf.mxu1  ;;  %v2822_v41 = vmax.f32 %v2742_v53, %v2782_v51  ;;  %v2784_v53 = vld [vmem:[#allocation2 + $0x149] sm:$0xff]  ;;  %v6593_v51 = vld [vmem:[#allocation28_spill] sm:$0xff] }
 0x20d   : > { %901 = vst.msk [vmem:[#allocation3 + $0x40] sm:$0xff] %vm892_vm3, %v832_v58  ;;  %v2934_v58 = vmax.f32 %v5738_v22, %v5771_v45  ;;  %v1621_v29 = vpop.f32.mrf.mxu2  ;;  %v749_v22 = vpack.c.bf16 %v6589_v15, %v6588_v25  ;;  %v5859_v23 = vmax.f32 %v2823_v55, %v2863_v20  ;;  %v2865_v55 = vld [vmem:[#allocation2 + $0x152] sm:$0xff] }
 0x20e   : > { %3768 = vmatmul.msk.bf16.gmra.mxu0 %vm329_vm1, %v3087_v30  ;;  %v1546_v30 = vpack.c.bf16 %v6587_v1, %v6586_v17  ;;  %v1697_v60 = vadd.f32 %v1621_v29, %v1507_v3  ;;  %v5863_v61 = vmax.f32 %v2822_v41, %v2862_v59  ;;  %v2665_v17 = vmax.f32 %v2585_v38, %v2625_v37  ;;  %v6590_v1 = vld [vmem:[#allocation30_spill] sm:$0xff]  ;;  %v1509_v29 = vld [vmem:[#allocation3 + $0x28] sm:$0xff] }
 0x20f   : > { %v2966_v28 = vmax.f32 %v2934_v58, %v5804_v0  ;;  %v3031_v50 = vmax.f32 %v2999_v62, %v5859_v23  ;;  %v1510_v20 = vld [vmem:[#allocation3 + $0x30] sm:$0xff] }
 0x210   : > { %1729 = vst.msk [vmem:[#allocation3 + $0x18] sm:$0xff] %vm892_vm3, %v1697_v60  ;;  %v2745_v58 = vmax.f32 %v2665_v17, %v2705_v19  ;;  %v2704_v60 = vld [vmem:[#allocation2 + $0x148] sm:$0xff]  ;;  %v6595_v17 = vld [vmem:[#allocation36_spill] sm:$0xff]  ;;  %v2938_v19 = vmax.f32 %v5804_v0, %v5833_v18 }
 0x211   : > { %v2998_v46 = vmax.f32 %v2966_v28, %v5833_v18 }
 0x212   : > { %v2825_v43 = vmax.f32 %v2745_v58, %v2785_v10  ;;  %v2706_v58 = vld [vmem:[#allocation2 + $0x168] sm:$0xff] }
 0x213   : > { %v3030_v26 = vmax.f32 %v2998_v46, %v5863_v61  ;;  %v2628_v10 = vld [vmem:[#allocation2 + $0x187] sm:$0xff] }
 0x214   : > { %v834_v2 = vpop.f32.mrf.mxu1  ;;  %v5889_v28 = vmax.f32 %v2825_v43, %v2865_v55  ;;  %v6597_v43 = vld [vmem:[#allocation39_spill] sm:$0xff]  ;;  %v2941_v55 = vmax.f32 %v5829_v5, %v5859_v23 }
 0x215   : > { %902 = vst.msk [vmem:[#allocation3 + $0x48] sm:$0xff] %vm892_vm3, %v834_v2  ;;  %v1624_v16 = vpop.f32.mrf.mxu2  ;;  %v3089_v39 = vpack.c.bf16 %v3031_v50, %v3030_v26  ;;  %v2626_v50 = vld [vmem:[#allocation2 + $0x167] sm:$0xff]  ;;  %v6594_v26 = vld [vmem:[#allocation34_spill] sm:$0xff] }
 0x216   : > { %v1698_v34 = vadd.f32 %v1624_v16, %v1508_v32  ;;  %v2587_v32 = vld [vmem:[#allocation2 + $0x16e] sm:$0xff]  ;;  %v2973_v35 = vmax.f32 %v2941_v55, %v5889_v28  ;;  %v5968_v55 = vld [vmem:[%s6425_s6] ss:$0 sm:$0xff] }
 0x217   : > { %3754 = vmatmul.msk.bf16.gmra.mxu3 %vm329_vm1, %v2316_v54  ;;  %3741 = vmatmul.msk.bf16.gmra.mxu2 %vm329_vm1, %v1546_v30  ;;  %v2388_v54 = vpop.f32.mrf.mxu3  ;;  %v6591_v30 = vld [vmem:[#allocation35_spill] sm:$0xff]  ;;  %v2627_v16 = vld [vmem:[#allocation2 + $0x16f] sm:$0xff] }
 0x218   : > { %v2468_v11 = vadd.f32 %v2388_v54, %v2278_v40  ;;  %1730 = vst.msk [vmem:[#allocation3 + $0x20] sm:$0xff] %vm892_vm3, %v1698_v34  ;;  %v2744_v40 = vmax.f32 %v2664_v36, %v2704_v60  ;;  %v2586_v34 = vld [vmem:[#allocation2 + $0x166] sm:$0xff]  ;;  %v2667_v9 = vmax.f32 %v2587_v32, %v2627_v16  ;;  %v2707_v36 = vld [vmem:[#allocation2 + $0x170] sm:$0xff] }
 0x219   : > { %v2867_v60 = vld [vmem:[#allocation2 + $0x172] sm:$0xff]  ;;  %v2708_v32 = vld [vmem:[#allocation2 + $0x188] sm:$0xff] }
 0x21a   : > { %2500 = vst.msk [vmem:[#allocation3] sm:$0xff] %vm892_vm3, %v2468_v11  ;;  %v6592_v11 = vld [vmem:[#allocation26_spill] sm:$0xff]  ;;  %v2824_v15 = vmax.f32 %v2744_v40, %v2784_v53  ;;  %v2747_v48 = vmax.f32 %v2667_v9, %v2707_v36  ;;  %v2588_v53 = vld [vmem:[#allocation2 + $0x186] sm:$0xff] }
 0x21b   : > { %3728 = vmatmul.msk.bf16.gmra.mxu1 %vm329_vm1, %v749_v22  ;;  %v3001_v22 = vmax.f32 %v2969_v57, %v5859_v23  ;;  %v2589_v40 = vld [vmem:[#allocation2 + $0x18e] sm:$0xff] }
 0x21c   : > { %v837_v27 = vpop.f32.mrf.mxu1  ;;  %v2630_v36 = vld [vmem:[#allocation2 + $0x1a7] sm:$0xff] }
 0x21d   : > { %903 = vst.msk [vmem:[#allocation3 + $0x50] sm:$0xff] %vm892_vm3, %v837_v27  ;;  %v2936_v27 = vmax.f32 %v5771_v45, %v5804_v0  ;;  %v1626_v42 = vpop.f32.mrf.mxu2  ;;  %v750_v45 = vpack.c.bf16 %v6593_v51, %v6592_v11  ;;  %v3033_v37 = vmax.f32 %v3001_v22, %v5889_v28  ;;  %v2629_v0 = vld [vmem:[#allocation2 + $0x18f] sm:$0xff]  ;;  %v2668_v22 = vmax.f32 %v2588_v53, %v2628_v10  ;;  %v2281_v53 = vld [vmem:[#allocation3 + $0x18] sm:$0xff] }
 0x21e   : > { %3769 = vmatmul.msk.bf16.gmra.mxu0 %vm329_vm1, %v3088_v47  ;;  %v1547_v47 = vpack.c.bf16 %v6591_v30, %v6590_v1  ;;  %v1699_v63 = vadd.f32 %v1626_v42, %v1509_v29  ;;  %v1548_v1 = vpack.c.bf16 %v6595_v17, %v6594_v26  ;;  %v2970_v29 = vmax.f32 %v2938_v19, %v5863_v61  ;;  %v2868_v26 = vld [vmem:[#allocation2 + $0x18a] sm:$0xff] }
 0x21f   : > { %v2968_v25 = vmax.f32 %v2936_v27, %v5833_v18  ;;  %v2669_v51 = vmax.f32 %v2589_v40, %v2629_v0  ;;  %v2748_v12 = vmax.f32 %v2668_v22, %v2708_v32  ;;  %v2591_v17 = vld [vmem:[#allocation2 + $0x1ae] sm:$0xff] }
 0x220   : > { %1731 = vst.msk [vmem:[#allocation3 + $0x28] sm:$0xff] %vm892_vm3, %v1699_v63  ;;  %v2710_v40 = vld [vmem:[#allocation2 + $0x1a8] sm:$0xff] }
 0x221   : > { %v3000_v41 = vmax.f32 %v2968_v25, %v5863_v61 }
 0x224   : > { %v839_v2 = vpop.f32.mrf.mxu1 }
 0x225   : > { %904 = vst.msk [vmem:[#allocation3 + $0x58] sm:$0xff] %vm892_vm3, %v839_v2  ;;  %v1629_v46 = vpop.f32.mrf.mxu2  ;;  %v2864_v2 = vld [vmem:[#allocation2 + $0x14a] sm:$0xff] }
 0x226   : > { %v1700_v59 = vadd.f32 %v1629_v46, %v1510_v20  ;;  %v5893_v38 = vmax.f32 %v2824_v15, %v2864_v2  ;;  %v2940_v20 = vmax.f32 %v5833_v18, %v5863_v61  ;;  %v2280_v46 = vld [vmem:[#allocation3 + $0x10] sm:$0xff] }
 0x227   : > { %3755 = vmatmul.msk.bf16.gmra.mxu3 %vm329_vm1, %v2317_v56  ;;  %3742 = vmatmul.msk.bf16.gmra.mxu2 %vm329_vm1, %v1547_v47  ;;  %v2390_v56 = vpop.f32.mrf.mxu3  ;;  %v2666_v47 = vmax.f32 %v2586_v34, %v2626_v50 }
 0x228   : > { %v2469_v54 = vadd.f32 %v2390_v56, %v2279_v4  ;;  %1732 = vst.msk [vmem:[#allocation3 + $0x30] sm:$0xff] %vm892_vm3, %v1700_v59  ;;  %v3032_v24 = vmax.f32 %v3000_v41, %v5893_v38  ;;  %v3002_v4 = vmax.f32 %v2970_v29, %v5893_v38  ;;  %v2866_v56 = vld [vmem:[#allocation2 + $0x16a] sm:$0xff] }
 0x229   : > { %v2746_v27 = vmax.f32 %v2666_v47, %v2706_v58  ;;  %v2709_v41 = vld [vmem:[#allocation2 + $0x190] sm:$0xff] }
 0x22a   : > { %2501 = vst.msk [vmem:[#allocation3 + $0x8] sm:$0xff] %vm892_vm3, %v2469_v54  ;;  %v3090_v30 = vpack.c.bf16 %v3033_v37, %v3032_v24  ;;  %v2789_v59 = vld [vmem:[#allocation2 + $0x191] sm:$0xff]  ;;  %v2972_v37 = vmax.f32 %v2940_v20, %v5893_v38 }
 0x22b   : > { %3729 = vmatmul.msk.bf16.gmra.mxu1 %vm329_vm1, %v750_v45  ;;  %v2826_v42 = vmax.f32 %v2746_v27, %v2786_v21  ;;  %v6596_v45 = vld [vmem:[#allocation37_spill] sm:$0xff]  ;;  %v2869_v24 = vld [vmem:[#allocation2 + $0x192] sm:$0xff]  ;;  %v3052_v21 = vld [vmem:[#allocation3] sm:$0xff] }
 0x22c   : > { %v842_v3 = vpop.f32.mrf.mxu1  ;;  %v1549_v25 = vpack.c.bf16 %v6597_v43, %v6596_v45  ;;  %v6598_v58 = vld [vmem:[#allocation38_spill] sm:$0xff]  ;;  %v6599_v27 = vld [vmem:[#allocation41_spill] sm:$0xff]  ;;  %v5961_v45 = vld [vmem:[%s6424_s5] ss:$0 sm:$0xff] }
 0x22d   : > { %905 = vst.msk [vmem:[#allocation3 + $0x60] sm:$0xff] %vm892_vm3, %v842_v3  ;;  %v5916_v57 = vmax.f32 %v2826_v42, %v2866_v56  ;;  %v2942_v56 = vmax.f32 %v5863_v61, %v5893_v38  ;;  %v1631_v8 = vpop.f32.mrf.mxu2 }
 0x22e   : > { %3770 = vmatmul.msk.bf16.gmra.mxu0 %vm329_vm1, %v3089_v39  ;;  %v2939_v39 = vmax.f32 %v5801_v52, %v5829_v5 }
 0x22f   : > { %v3034_v11 = vmax.f32 %v3002_v4, %v5916_v57  ;;  %v3004_v18 = vmax.f32 %v2972_v37, %v5916_v57 }
 0x230   : > { %v2971_v3 = vmax.f32 %v2939_v39, %v5859_v23  ;;  %v2590_v39 = vld [vmem:[#allocation2 + $0x1a6] sm:$0xff] }
 0x232   : > { %v3003_v52 = vmax.f32 %v2971_v3, %v5889_v28  ;;  %v1550_v3 = vpack.c.bf16 %v6599_v27, %v6598_v58  ;;  %v6600_v27 = vld [vmem:[#allocation40_spill] sm:$0xff] }
 0x234   : > { %v844_v62 = vpop.f32.mrf.mxu1 }
 0x235   : > { %906 = vst.msk [vmem:[#allocation3 + $0x68] sm:$0xff] %vm892_vm3, %v844_v62  ;;  %v2749_v62 = vmax.f32 %v2669_v51, %v2709_v41  ;;  %v2791_v51 = vld [vmem:[#allocation2 + $0x1b1] sm:$0xff] }
 0x237   : > { %3756 = vmatmul.msk.bf16.gmra.mxu3 %vm329_vm1, %v2318_v13  ;;  %3743 = vmatmul.msk.bf16.gmra.mxu2 %vm329_vm1, %v1548_v1  ;;  %v2827_v13 = vmax.f32 %v2747_v48, %v2787_v33  ;;  %v2829_v5 = vmax.f32 %v2749_v62, %v2789_v59  ;;  %v2631_v1 = vld [vmem:[#allocation2 + $0x1af] sm:$0xff] }
 0x238   : > { %v2671_v19 = vmax.f32 %v2591_v17, %v2631_v1  ;;  %v2870_v59 = vld [vmem:[#allocation2 + $0x1aa] sm:$0xff] }
 0x239   : > { %v5913_v63 = vmax.f32 %v2827_v13, %v2867_v60  ;;  %v5936_v9 = vmax.f32 %v2829_v5, %v2869_v24  ;;  %v2670_v13 = vmax.f32 %v2590_v39, %v2630_v36  ;;  %v2711_v60 = vld [vmem:[#allocation2 + $0x1b0] sm:$0xff]  ;;  %v2632_v17 = vld [vmem:[#allocation2 + $0x1c7] sm:$0xff] }
 0x23a   : > { %v2751_v4 = vmax.f32 %v2671_v19, %v2711_v60 }
 0x23b   : > { %v3035_v54 = vmax.f32 %v3003_v52, %v5913_v63  ;;  %v3005_v50 = vmax.f32 %v2973_v35, %v5913_v63  ;;  %v2943_v52 = vmax.f32 %v5859_v23, %v5889_v28  ;;  %v2750_v31 = vmax.f32 %v2670_v13, %v2710_v40  ;;  %v2593_v35 = vld [vmem:[#allocation2 + $0x1ce] sm:$0xff] }
 0x23c   : > { %v847_v0 = vpop.f32.mrf.mxu1  ;;  %v2831_v43 = vmax.f32 %v2751_v4, %v2791_v51  ;;  %v2713_v40 = vld [vmem:[#allocation2 + $0x1d0] sm:$0xff] }
 0x23d   : > { %v3091_v15 = vpack.c.bf16 %v3035_v54, %v3034_v11  ;;  %v3037_v47 = vmax.f32 %v3005_v50, %v5936_v9  ;;  %v1511_v54 = vld [vmem:[#allocation3 + $0x38] sm:$0xff]  ;;  %907 = vst.msk [vmem:[#allocation3 + $0x70] sm:$0xff] %vm892_vm3, %v847_v0  ;;  %v2790_v11 = vld [vmem:[#allocation2 + $0x1a9] sm:$0xff]  ;;  %v1634_v50 = vpop.f32.mrf.mxu2 }
 0x23e   : > { %3771 = vmatmul.msk.bf16.gmra.mxu0 %vm329_vm1, %v3090_v30  ;;  %v1701_v23 = vadd.f32 %v1631_v8, %v1511_v54  ;;  %v2830_v62 = vmax.f32 %v2750_v31, %v2790_v11  ;;  %v2944_v54 = vmax.f32 %v5893_v38, %v5916_v57  ;;  %v2712_v8 = vld [vmem:[#allocation2 + $0x1c8] sm:$0xff] }
 0x23f   : > { %v2792_v51 = vld [vmem:[#allocation2 + $0x1c9] sm:$0xff] }
 0x240   : > { %1733 = vst.msk [vmem:[#allocation3 + $0x38] sm:$0xff] %vm892_vm3, %v1701_v23  ;;  %v5980_v24 = vmax.f32 %v2830_v62, %v2870_v59 }
 0x244   : > { %v849_v37 = vpop.f32.mrf.mxu1 }
 0x245   : > { %908 = vst.msk [vmem:[#allocation3 + $0x78] sm:$0xff] %vm892_vm3, %v849_v37  ;;  %v1636_v31 = vpop.f32.mrf.mxu2  ;;  %v2873_v37 = vld [vmem:[#allocation2 + $0x1d2] sm:$0xff] }
 0x247   : > { %3757 = vmatmul.msk.bf16.gmra.mxu3 %vm329_vm1, %v2319_v49  ;;  %3744 = vmatmul.msk.bf16.gmra.mxu2 %vm329_vm1, %v1549_v25  ;;  %v2393_v2 = vpop.f32.mrf.mxu3  ;;  %v2788_v49 = vld [vmem:[#allocation2 + $0x189] sm:$0xff]  ;;  %v2974_v25 = vmax.f32 %v2942_v56, %v5916_v57 }
 0x248   : > { %v2470_v16 = vadd.f32 %v2393_v2, %v2280_v46  ;;  %v2828_v34 = vmax.f32 %v2748_v12, %v2788_v49  ;;  %v2871_v2 = vld [vmem:[#allocation2 + $0x1b2] sm:$0xff] }
 0x249   : > { %v2633_v49 = vld [vmem:[#allocation2 + $0x1cf] sm:$0xff] }
 0x24a   : > { %2502 = vst.msk [vmem:[#allocation3 + $0x10] sm:$0xff] %vm892_vm3, %v2470_v16  ;;  %v5939_v30 = vmax.f32 %v2828_v34, %v2868_v26  ;;  %v5974_v16 = vmax.f32 %v2831_v43, %v2871_v2  ;;  %v1512_v34 = vld [vmem:[#allocation3 + $0x40] sm:$0xff]  ;;  %v2673_v36 = vmax.f32 %v2593_v35, %v2633_v49  ;;  %v2635_v35 = vld [vmem:[#allocation2 + $0x1ef] sm:$0xff] }
 0x24b   : > { %v2592_v26 = vld [vmem:[#allocation2 + $0x1c6] sm:$0xff]  ;;  %v1702_v1 = vadd.f32 %v1634_v50, %v1512_v34 }
 0x24c   : > { %v3036_v48 = vmax.f32 %v3004_v18, %v5939_v30  ;;  %v3006_v12 = vmax.f32 %v2974_v25, %v5939_v30  ;;  %v852_v14 = vpop.f32.mrf.mxu1 }
 0x24d   : > { %1734 = vst.msk [vmem:[#allocation3 + $0x40] sm:$0xff] %vm892_vm3, %v1702_v1  ;;  %v2872_v1 = vld [vmem:[#allocation2 + $0x1ca] sm:$0xff] }
 0x24e   : > { %3772 = vmatmul.msk.bf16.gmra.mxu0 %vm329_vm1, %v3091_v15  ;;  %v3092_v42 = vpack.c.bf16 %v3037_v47, %v3036_v48  ;;  %v3053_v15 = vld [vmem:[#allocation3 + $0x8] sm:$0xff]  ;;  %v2282_v47 = vld [vmem:[#allocation3 + $0x20] sm:$0xff]  ;;  %v3038_v58 = vmax.f32 %v3006_v12, %v5980_v24  ;;  %909 = vst.msk [vmem:[#allocation3 + $0x80] sm:$0xff] %vm892_vm3, %v852_v14 }
 0x24f   : > { %v2395_v10 = vpop.f32.mrf.mxu3  ;;  %v2595_v12 = vld [vmem:[#allocation2 + $0x1ee] sm:$0xff] }
 0x250   : > { %v2471_v61 = vadd.f32 %v2395_v10, %v2281_v53  ;;  %v2283_v10 = vld [vmem:[#allocation3 + $0x28] sm:$0xff] }
 0x252   : > { %2503 = vst.msk [vmem:[#allocation3 + $0x18] sm:$0xff] %vm892_vm3, %v2471_v61  ;;  %v2793_v61 = vld [vmem:[#allocation2 + $0x1d1] sm:$0xff] }
 0x257   : > { %3758 = vmatmul.msk.bf16.gmra.mxu3 %vm329_vm1, %v2320_v6  ;;  %3745 = vmatmul.msk.bf16.gmra.mxu2 %vm329_vm1, %v1550_v3  ;;  %v2975_v6 = vmax.f32 %v2943_v52, %v5913_v63  ;;  %v6601_v3 = vld [vmem:[#allocation42_spill] sm:$0xff] }
 0x259   : > { %v3007_v20 = vmax.f32 %v2975_v6, %v5936_v9 }
 0x25a   : > { %v2398_v39 = vpop.f32.mrf.mxu3 }
 0x25b   : > { %v3162_v33 = vpop.f32.mrf.mxu0  ;;  %v3039_v18 = vmax.f32 %v3007_v20, %v5974_v16  ;;  %v2472_v19 = vadd.f32 %v2398_v39, %v2282_v47  ;;  %v2675_v47 = vmax.f32 %v2595_v12, %v2635_v35  ;;  %v2875_v35 = vld [vmem:[#allocation2 + $0x1f2] sm:$0xff] }
 0x25c   : > { %v3242_v29 = vadd.f32 %v3162_v33, %v3052_v21  ;;  %v1551_v21 = vpack.c.bf16 %v6601_v3, %v6600_v27  ;;  %v3054_v33 = vld [vmem:[#allocation3 + $0x10] sm:$0xff] }
 0x25d   : > { %2504 = vst.msk [vmem:[#allocation3 + $0x20] sm:$0xff] %vm892_vm3, %v2472_v19  ;;  %v3093_v4 = vpack.c.bf16 %v3039_v18, %v3038_v58  ;;  %v1639_v19 = vpop.f32.mrf.mxu2  ;;  %v2715_v3 = vld [vmem:[#allocation2 + $0x1f0] sm:$0xff] }
 0x25e   : > { %3274 = vst.msk [vmem:[#allocation3] sm:$0xff] %vm892_vm3, %v3242_v29  ;;  %3773 = vmatmul.msk.bf16.gmra.mxu0 %vm329_vm1, %v3092_v42  ;;  %v2672_v29 = vmax.f32 %v2592_v26, %v2632_v17  ;;  %v2945_v42 = vmax.f32 %v5889_v28, %v5913_v63  ;;  %v2753_v28 = vmax.f32 %v2673_v36, %v2713_v40  ;;  %v2594_v26 = vld [vmem:[#allocation2 + $0x1e6] sm:$0xff]  ;;  %v854_v36 = vpop.f32.mrf.mxu1 }
 0x25f   : > { %v2634_v17 = vld [vmem:[#allocation2 + $0x1e7] sm:$0xff]  ;;  %910 = vst.msk [vmem:[#allocation3 + $0x88] sm:$0xff] %vm892_vm3, %v854_v36 }
 0x260   : > { %v2752_v6 = vmax.f32 %v2672_v29, %v2712_v8  ;;  %v2977_v23 = vmax.f32 %v2945_v42, %v5936_v9  ;;  %v2833_v25 = vmax.f32 %v2753_v28, %v2793_v61  ;;  %v2674_v29 = vmax.f32 %v2594_v26, %v2634_v17  ;;  %v2795_v61 = vld [vmem:[#allocation2 + $0x1f1] sm:$0xff] }
 0x261   : > { %v2755_v8 = vmax.f32 %v2675_v47, %v2715_v3 }
 0x262   : > { %v2400_v11 = vpop.f32.mrf.mxu3  ;;  %v2832_v2 = vmax.f32 %v2752_v6, %v2792_v51  ;;  %v6014_v50 = vmax.f32 %v2833_v25, %v2873_v37  ;;  %v2946_v25 = vmax.f32 %v5916_v57, %v5939_v30 }
 0x263   : > { %v3164_v22 = vpop.f32.mrf.mxu0  ;;  %v2473_v38 = vadd.f32 %v2400_v11, %v2283_v10 }
 0x264   : > { %v3243_v41 = vadd.f32 %v3164_v22, %v3053_v15  ;;  %v2976_v15 = vmax.f32 %v2944_v54, %v5939_v30  ;;  %v3055_v22 = vld [vmem:[#allocation3 + $0x18] sm:$0xff]  ;;  %v6020_v58 = vmax.f32 %v2832_v2, %v2872_v1  ;;  %v3056_v28 = vld [vmem:[#allocation3 + $0x20] sm:$0xff]  ;;  %v2978_v37 = vmax.f32 %v2946_v25, %v5980_v24 }
 0x265   : > { %v3306_v46 = vld [vmem:[#allocation3] sm:$0xff]  ;;  %2505 = vst.msk [vmem:[#allocation3 + $0x28] sm:$0xff] %vm892_vm3, %v2473_v38  ;;  %v2285_v2 = vld [vmem:[#allocation3 + $0x38] sm:$0xff] }
 0x266   : > { %v3342_v32 = vmul.f32 %v5961_v45, %v3306_v46  ;;  %3275 = vst.msk [vmem:[#allocation3 + $0x8] sm:$0xff] %vm892_vm3, %v3243_v41  ;;  %v3008_v18 = vmax.f32 %v2976_v15, %v5980_v24 }
 0x267   : > { %3759 = vmatmul.msk.bf16.gmra.mxu3 %vm329_vm1, %v2321_v44  ;;  %3746 = vmatmul.msk.bf16.gmra.mxu2 %vm329_vm1, %v1551_v21  ;;  %v1513_v44 = vld [vmem:[#allocation3 + $0x48] sm:$0xff] }
 0x268   : > { %v5978_v5 = vadd.f32 %v5968_v55, %v3342_v32  ;;  %v1703_v53 = vadd.f32 %v1636_v31, %v1513_v44  ;;  %v3009_v32 = vmax.f32 %v2977_v23, %v5974_v16  ;;  %v2947_v23 = vmax.f32 %v5913_v63, %v5936_v9  ;;  %v2794_v63 = vld [vmem:[#allocation2 + $0x1e9] sm:$0xff] }
 0x26a   : > { %v3410_v48 = vsub.f32 0.0, %v5978_v5  ;;  %1735 = vst.msk [vmem:[#allocation3 + $0x48] sm:$0xff] %vm892_vm3, %v1703_v53  ;;  %v3041_v27 = vmax.f32 %v3009_v32, %v6014_v50 }
 0x26b   : > { %v3167_v13 = vpop.f32.mrf.mxu0 }
 0x26c   : > { %v3442_v52 = vmul.f32 1.442695, %v3410_v48  ;;  %v3244_v60 = vadd.f32 %v3167_v13, %v3054_v33  ;;  %v1514_v48 = vld [vmem:[#allocation3 + $0x50] sm:$0xff]  ;;  %v2403_v13 = vpop.f32.mrf.mxu3 }
 0x26d   : > { %v3307_v56 = vld [vmem:[#allocation3 + $0x8] sm:$0xff]  ;;  %v1704_v21 = vadd.f32 %v1639_v19, %v1514_v48  ;;  %v2284_v33 = vld [vmem:[#allocation3 + $0x30] sm:$0xff] }
 0x26e   : > { %3929 = vpow2.f32 %v3442_v52  ;;  %v3343_v0 = vmul.f32 %v5961_v45, %v3307_v56  ;;  %3276 = vst.msk [vmem:[#allocation3 + $0x10] sm:$0xff] %vm892_vm3, %v3244_v60  ;;  %3774 = vmatmul.msk.bf16.gmra.mxu0 %vm329_vm1, %v3093_v4  ;;  %v2474_v52 = vadd.f32 %v2403_v13, %v2284_v33  ;;  %v3040_v60 = vmax.f32 %v3008_v18, %v6020_v58  ;;  %v6602_v4 = vld [vmem:[#allocation14_spill] sm:$0xff] }
 0x26f   : > { %v6603_v56 = vld [vmem:[#allocation6_spill] sm:$0xff]  ;;  %1736 = vst.msk [vmem:[#allocation3 + $0x50] sm:$0xff] %vm892_vm3, %v1704_v21 }
 0x270   : > { %v6003_v7 = vadd.f32 %v5968_v55, %v3343_v0  ;;  %v2322_v40 = vpack.c.bf16 %v6603_v56, %v6602_v4  ;;  %v2714_v0 = vld [vmem:[#allocation2 + $0x1e8] sm:$0xff]  ;;  %2506 = vst.msk [vmem:[#allocation3 + $0x30] sm:$0xff] %vm892_vm3, %v2474_v52  ;;  %v3094_v6 = vpack.c.bf16 %v3041_v27, %v3040_v60 }
 0x271   : > { %v2754_v51 = vmax.f32 %v2674_v29, %v2714_v0  ;;  %v2597_v48 = vld [vmem:[#allocation2 + $0x20e] sm:$0xff]  ;;  %v2596_v52 = vld [vmem:[#allocation2 + $0x206] sm:$0xff] }
 0x272   : > { %v3411_v43 = vsub.f32 0.0, %v6003_v7  ;;  %v2637_v19 = vld [vmem:[#allocation2 + $0x20f] sm:$0xff]  ;;  %v2636_v60 = vld [vmem:[#allocation2 + $0x207] sm:$0xff] }
 0x273   : > { %v3169_v41 = vpop.f32.mrf.mxu0  ;;  %v2834_v12 = vmax.f32 %v2754_v51, %v2794_v63  ;;  %v2677_v4 = vmax.f32 %v2597_v48, %v2637_v19  ;;  %v1516_v0 = vld [vmem:[#allocation3 + $0x60] sm:$0xff]  ;;  %v2877_v19 = vld [vmem:[#allocation2 + $0x212] sm:$0xff] }
 0x274   : > { %v3930_v62 = vpop.eup %3929  ;;  %v3444_v20 = vmul.f32 1.442695, %v3411_v43  ;;  %v3245_v46 = vadd.f32 %v3169_v41, %v3055_v22  ;;  %v857_v22 = vpop.f32.mrf.mxu1  ;;  %v1515_v41 = vld [vmem:[#allocation3 + $0x58] sm:$0xff] }
 0x275   : > { %v3506_v49 = vadd.f32 1.0, %v3930_v62  ;;  %v3308_v59 = vld [vmem:[#allocation3 + $0x10] sm:$0xff]  ;;  %v2835_v62 = vmax.f32 %v2755_v8, %v2795_v61  ;;  %911 = vst.msk [vmem:[#allocation3 + $0x90] sm:$0xff] %vm892_vm3, %v857_v22  ;;  %v2405_v32 = vpop.f32.mrf.mxu3  ;;  %v2716_v61 = vld [vmem:[#allocation2 + $0x208] sm:$0xff] }
 0x276   : > { %3931 = vpow2.f32 %v3444_v20  ;;  %v3344_v34 = vmul.f32 %v5961_v45, %v3308_v59  ;;  %3277 = vst.msk [vmem:[#allocation3 + $0x18] sm:$0xff] %vm892_vm3, %v3245_v46  ;;  %v2979_v20 = vmax.f32 %v2947_v23, %v5974_v16  ;;  %v2874_v59 = vld [vmem:[#allocation2 + $0x1ea] sm:$0xff] }
 0x277   : > { %3933 = vrcp.f32 %v3506_v49  ;;  %3760 = vmatmul.msk.bf16.gmra.mxu3 %vm329_vm1, %v2322_v40  ;;  %v2475_v49 = vadd.f32 %v2405_v32, %v2285_v2  ;;  %v6057_v47 = vmax.f32 %v2835_v62, %v2875_v35  ;;  %v6060_v33 = vmax.f32 %v2834_v12, %v2874_v59  ;;  %v2797_v12 = vld [vmem:[#allocation2 + $0x211] sm:$0xff] }
 0x278   : > { %v6018_v39 = vadd.f32 %v5968_v55, %v3344_v34  ;;  %v3057_v34 = vld [vmem:[#allocation3 + $0x28] sm:$0xff]  ;;  %v3011_v36 = vmax.f32 %v2979_v20, %v6014_v50  ;;  %v2949_v62 = vmax.f32 %v5936_v9, %v5974_v16  ;;  %v2948_v59 = vmax.f32 %v5939_v30, %v5980_v24 }
 0x279   : > { %2507 = vst.msk [vmem:[#allocation3 + $0x38] sm:$0xff] %vm892_vm3, %v2475_v49  ;;  %v2796_v49 = vld [vmem:[#allocation2 + $0x209] sm:$0xff] }
 0x27a   : > { %v3412_v42 = vsub.f32 0.0, %v6018_v39 }
 0x27b   : > { %v3172_v54 = vpop.f32.mrf.mxu0 }
 0x27c   : > { %v3932_v14 = vpop.eup %3931  ;;  %v3446_v44 = vmul.f32 1.442695, %v3412_v42  ;;  %v3246_v31 = vadd.f32 %v3172_v54, %v3056_v28  ;;  %v3010_v42 = vmax.f32 %v2978_v37, %v6020_v58  ;;  %v859_v40 = vpop.f32.mrf.mxu1  ;;  %v2717_v54 = vld [vmem:[#allocation2 + $0x210] sm:$0xff] }
 0x27d   : > { %v3934_v53 = vpop.eup %3933  ;;  %v3507_v10 = vadd.f32 1.0, %v3932_v14  ;;  %v3309_v11 = vld [vmem:[#allocation3 + $0x18] sm:$0xff]  ;;  %912 = vst.msk [vmem:[#allocation3 + $0x98] sm:$0xff] %vm892_vm3, %v859_v40  ;;  %v2286_v14 = vld [vmem:[#allocation3 + $0x40] sm:$0xff]  ;;  %v2757_v63 = vmax.f32 %v2677_v4, %v2717_v54 }
 0x27e   : > { %v3570_v43 = vmul.f32 %v3934_v53, %v5978_v5  ;;  %3935 = vpow2.f32 %v3446_v44  ;;  %v3345_v38 = vmul.f32 %v5961_v45, %v3309_v11  ;;  %3278 = vst.msk [vmem:[#allocation3 + $0x20] sm:$0xff] %vm892_vm3, %v3246_v31  ;;  %3775 = vmatmul.msk.bf16.gmra.mxu0 %vm329_vm1, %v3094_v6  ;;  %v1641_v5 = vpop.f32.mrf.mxu2  ;;  %v2408_v44 = vpop.f32.mrf.mxu3  ;;  %v2676_v31 = vmax.f32 %v2596_v52, %v2636_v60  ;;  %v6605_v11 = vld [vmem:[#allocation45_spill] sm:$0xff] }
 0x27f   : > { %3937 = vrcp.f32 %v3507_v10  ;;  %v1705_v46 = vadd.f32 %v1641_v5, %v1515_v41  ;;  %v2476_v23 = vadd.f32 %v2408_v44, %v2286_v14  ;;  %v3042_v53 = vmax.f32 %v3010_v42, %v6060_v33  ;;  %v6604_v10 = vld [vmem:[#allocation46_spill] sm:$0xff] }
 0x280   : > { %3602 = vst.msk [vmem:[%s6038_s30] sm:$0xff] %vm892_vm3, %v3570_v43  ;;  %v6049_v15 = vadd.f32 %v5968_v55, %v3345_v38  ;;  %v2323_v51 = vpack.c.bf16 %v6605_v11, %v6604_v10  ;;  %v3058_v43 = vld [vmem:[#allocation3 + $0x30] sm:$0xff]  ;;  %v2756_v32 = vmax.f32 %v2676_v31, %v2716_v61 }
 0x281   : > { %1737 = vst.msk [vmem:[#allocation3 + $0x58] sm:$0xff] %vm892_vm3, %v1705_v46  ;;  %v1518_v61 = vld [vmem:[#allocation3 + $0x70] sm:$0xff] }
 0x282   : > { %v3413_v57 = vsub.f32 0.0, %v6049_v15  ;;  %2508 = vst.msk [vmem:[#allocation3 + $0x40] sm:$0xff] %vm892_vm3, %v2476_v23  ;;  %v2836_v48 = vmax.f32 %v2756_v32, %v2796_v49  ;;  %v2598_v23 = vld [vmem:[#allocation2 + $0x226] sm:$0xff] }
 0x283   : > { %v3174_v18 = vpop.f32.mrf.mxu0 }
 0x284   : > { %v3936_v26 = vpop.eup %3935  ;;  %v3448_v17 = vmul.f32 1.442695, %v3413_v57  ;;  %v3247_v1 = vadd.f32 %v3174_v18, %v3057_v34  ;;  %v862_v37 = vpop.f32.mrf.mxu1  ;;  %v1517_v34 = vld [vmem:[#allocation3 + $0x68] sm:$0xff]  ;;  %v2837_v18 = vmax.f32 %v2757_v63, %v2797_v12 }
 0x285   : > { %v3938_v27 = vpop.eup %3937  ;;  %v3508_v3 = vadd.f32 1.0, %v3936_v26  ;;  %v3310_v21 = vld [vmem:[#allocation3 + $0x20] sm:$0xff]  ;;  %v2981_v26 = vmax.f32 %v2949_v62, %v6014_v50  ;;  %913 = vst.msk [vmem:[#allocation3 + $0xa0] sm:$0xff] %vm892_vm3, %v862_v37  ;;  %v2718_v12 = vld [vmem:[#allocation2 + $0x228] sm:$0xff] }
 0x286   : > { %v3571_v13 = vmul.f32 %v3938_v27, %v6003_v7  ;;  %3939 = vpow2.f32 %v3448_v17  ;;  %v3346_v29 = vmul.f32 %v5961_v45, %v3310_v21  ;;  %3279 = vst.msk [vmem:[#allocation3 + $0x28] sm:$0xff] %vm892_vm3, %v3247_v1  ;;  %v1644_v28 = vpop.f32.mrf.mxu2  ;;  %v3043_v7 = vmax.f32 %v3011_v36, %v6057_v47  ;;  %v2287_v1 = vld [vmem:[#allocation3 + $0x48] sm:$0xff]  ;;  %v2410_v36 = vpop.f32.mrf.mxu3 }
 0x287   : > { %3941 = vrcp.f32 %v3508_v3  ;;  %v1706_v8 = vadd.f32 %v1644_v28, %v1516_v0  ;;  %3761 = vmatmul.msk.bf16.gmra.mxu3 %vm329_vm1, %v2323_v51  ;;  %v2477_v27 = vadd.f32 %v2410_v36, %v2287_v1  ;;  %v2876_v3 = vld [vmem:[#allocation2 + $0x20a] sm:$0xff]  ;;  %v2980_v21 = vmax.f32 %v2948_v59, %v6020_v58 }
 0x288   : > { %3603 = vst.msk [vmem:[%s6038_s30 + $0x8] sm:$0xff] %vm892_vm3, %v3571_v13  ;;  %v6069_v56 = vadd.f32 %v5968_v55, %v3346_v29  ;;  %v3095_v5 = vpack.c.bf16 %v3043_v7, %v3042_v53  ;;  %v3059_v13 = vld [vmem:[#allocation3 + $0x38] sm:$0xff]  ;;  %v6099_v4 = vmax.f32 %v2837_v18, %v2877_v19  ;;  %v3013_v40 = vmax.f32 %v2981_v26, %v6057_v47  ;;  %v2599_v0 = vld [vmem:[#allocation2 + $0x22e] sm:$0xff] }
 0x289   : > { %1738 = vst.msk [vmem:[#allocation3 + $0x60] sm:$0xff] %vm892_vm3, %v1706_v8  ;;  %v2639_v28 = vld [vmem:[#allocation2 + $0x22f] sm:$0xff]  ;;  %v6102_v14 = vmax.f32 %v2836_v48, %v2876_v3  ;;  %v2638_v53 = vld [vmem:[#allocation2 + $0x227] sm:$0xff]  ;;  %v2951_v18 = vmax.f32 %v5974_v16, %v6014_v50  ;;  %v2950_v3 = vmax.f32 %v5980_v24, %v6020_v58 }
 0x28a   : > { %v3414_v6 = vsub.f32 0.0, %v6069_v56  ;;  %2509 = vst.msk [vmem:[#allocation3 + $0x48] sm:$0xff] %vm892_vm3, %v2477_v27  ;;  %v2679_v10 = vmax.f32 %v2599_v0, %v2639_v28  ;;  %v2799_v48 = vld [vmem:[#allocation2 + $0x231] sm:$0xff]  ;;  %v2798_v27 = vld [vmem:[#allocation2 + $0x229] sm:$0xff] }
 0x28b   : > { %v3177_v38 = vpop.f32.mrf.mxu0  ;;  %v2879_v28 = vld [vmem:[#allocation2 + $0x232] sm:$0xff] }
 0x28c   : > { %v3940_v25 = vpop.eup %3939  ;;  %v3450_v22 = vmul.f32 1.442695, %v3414_v6  ;;  %v3248_v41 = vadd.f32 %v3177_v38, %v3058_v43  ;;  %v3012_v6 = vmax.f32 %v2980_v21, %v6060_v33  ;;  %v864_v51 = vpop.f32.mrf.mxu1  ;;  %v2719_v38 = vld [vmem:[#allocation2 + $0x230] sm:$0xff] }
 0x28d   : > { %v3942_v20 = vpop.eup %3941  ;;  %v3509_v46 = vadd.f32 1.0, %v3940_v25  ;;  %v3311_v2 = vld [vmem:[#allocation3 + $0x28] sm:$0xff]  ;;  %914 = vst.msk [vmem:[#allocation3 + $0xa8] sm:$0xff] %vm892_vm3, %v864_v51  ;;  %v2288_v25 = vld [vmem:[#allocation3 + $0x50] sm:$0xff]  ;;  %v2759_v49 = vmax.f32 %v2679_v10, %v2719_v38 }
 0x28e   : > { %v3572_v35 = vmul.f32 %v3942_v20, %v6018_v39  ;;  %3943 = vpow2.f32 %v3450_v22  ;;  %v3347_v57 = vmul.f32 %v5961_v45, %v3311_v2  ;;  %3280 = vst.msk [vmem:[#allocation3 + $0x30] sm:$0xff] %vm892_vm3, %v3248_v41  ;;  %3776 = vmatmul.msk.bf16.gmra.mxu0 %vm329_vm1, %v3095_v5  ;;  %v1646_v39 = vpop.f32.mrf.mxu2  ;;  %v2413_v22 = vpop.f32.mrf.mxu3  ;;  %v2678_v41 = vmax.f32 %v2598_v23, %v2638_v53  ;;  %v6607_v2 = vld [vmem:[#allocation48_spill] sm:$0xff] }
 0x28f   : > { %3945 = vrcp.f32 %v3509_v46  ;;  %v1707_v17 = vadd.f32 %v1646_v39, %v1517_v34  ;;  %v2478_v62 = vadd.f32 %v2413_v22, %v2288_v25  ;;  %v3044_v20 = vmax.f32 %v3012_v6, %v6102_v14  ;;  %v6606_v46 = vld [vmem:[#allocation47_spill] sm:$0xff] }
 0x290   : > { %3604 = vst.msk [vmem:[%s6038_s30 + $0x10] sm:$0xff] %vm892_vm3, %v3572_v35  ;;  %v6091_v9 = vadd.f32 %v5968_v55, %v3347_v57  ;;  %v2324_v32 = vpack.c.bf16 %v6607_v2, %v6606_v46  ;;  %v3060_v35 = vld [vmem:[#allocation3 + $0x40] sm:$0xff]  ;;  %v2758_v36 = vmax.f32 %v2678_v41, %v2718_v12 }
 0x291   : > { %1739 = vst.msk [vmem:[#allocation3 + $0x68] sm:$0xff] %vm892_vm3, %v1707_v17  ;;  %v1520_v12 = vld [vmem:[#allocation3 + $0x80] sm:$0xff] }
 0x292   : > { %v3415_v30 = vsub.f32 0.0, %v6091_v9  ;;  %2510 = vst.msk [vmem:[#allocation3 + $0x50] sm:$0xff] %vm892_vm3, %v2478_v62  ;;  %v2838_v0 = vmax.f32 %v2758_v36, %v2798_v27  ;;  %v2600_v62 = vld [vmem:[#allocation2 + $0x246] sm:$0xff] }
 0x293   : > { %v3179_v29 = vpop.f32.mrf.mxu0 }
 0x294   : > { %v3944_v42 = vpop.eup %3943  ;;  %v3452_v52 = vmul.f32 1.442695, %v3415_v30  ;;  %v3249_v60 = vadd.f32 %v3179_v29, %v3059_v13  ;;  %v867_v21 = vpop.f32.mrf.mxu1  ;;  %v1519_v13 = vld [vmem:[#allocation3 + $0x78] sm:$0xff]  ;;  %v2839_v29 = vmax.f32 %v2759_v49, %v2799_v48  ;;  %v2720_v48 = vld [vmem:[#allocation2 + $0x248] sm:$0xff] }
 0x295   : > { %v3946_v7 = vpop.eup %3945  ;;  %v3510_v54 = vadd.f32 1.0, %v3944_v42  ;;  %v3312_v8 = vld [vmem:[#allocation3 + $0x30] sm:$0xff]  ;;  %v2983_v42 = vmax.f32 %v2951_v18, %v6057_v47  ;;  %915 = vst.msk [vmem:[#allocation3 + $0xb0] sm:$0xff] %vm892_vm3, %v867_v21 }
 0x296   : > { %v3573_v44 = vmul.f32 %v3946_v7, %v6049_v15  ;;  %3947 = vpow2.f32 %v3452_v52  ;;  %v3348_v31 = vmul.f32 %v5961_v45, %v3312_v8  ;;  %3281 = vst.msk [vmem:[#allocation3 + $0x38] sm:$0xff] %vm892_vm3, %v3249_v60  ;;  %v1649_v43 = vpop.f32.mrf.mxu2  ;;  %v3045_v15 = vmax.f32 %v3013_v40, %v6099_v4  ;;  %v2289_v60 = vld [vmem:[#allocation3 + $0x58] sm:$0xff]  ;;  %v2415_v40 = vpop.f32.mrf.mxu3 }
 0x297   : > { %3949 = vrcp.f32 %v3510_v54  ;;  %v1708_v63 = vadd.f32 %v1649_v43, %v1518_v61  ;;  %3762 = vmatmul.msk.bf16.gmra.mxu3 %vm329_vm1, %v2324_v32  ;;  %v2479_v7 = vadd.f32 %v2415_v40, %v2289_v60  ;;  %v2878_v54 = vld [vmem:[#allocation2 + $0x22a] sm:$0xff]  ;;  %v2982_v8 = vmax.f32 %v2950_v3, %v6060_v33 }
 0x298   : > { %3605 = vst.msk [vmem:[%s6038_s30 + $0x18] sm:$0xff] %vm892_vm3, %v3573_v44  ;;  %v6111_v11 = vadd.f32 %v5968_v55, %v3348_v31  ;;  %v3096_v39 = vpack.c.bf16 %v3045_v15, %v3044_v20  ;;  %v3061_v44 = vld [vmem:[#allocation3 + $0x48] sm:$0xff]  ;;  %v6141_v10 = vmax.f32 %v2839_v29, %v2879_v28  ;;  %v3015_v51 = vmax.f32 %v2983_v42, %v6099_v4 }
 0x299   : > { %1740 = vst.msk [vmem:[#allocation3 + $0x70] sm:$0xff] %vm892_vm3, %v1708_v63  ;;  %v2601_v61 = vld [vmem:[#allocation2 + $0x24e] sm:$0xff]  ;;  %v6144_v25 = vmax.f32 %v2838_v0, %v2878_v54  ;;  %v2953_v29 = vmax.f32 %v6014_v50, %v6057_v47  ;;  %v2952_v54 = vmax.f32 %v6020_v58, %v6060_v33 }
 0x29a   : > { %v3416_v5 = vsub.f32 0.0, %v6111_v11  ;;  %2511 = vst.msk [vmem:[#allocation3 + $0x58] sm:$0xff] %vm892_vm3, %v2479_v7  ;;  %v2641_v43 = vld [vmem:[#allocation2 + $0x24f] sm:$0xff]  ;;  %v2640_v20 = vld [vmem:[#allocation2 + $0x247] sm:$0xff] }
 0x29b   : > { %v3182_v57 = vpop.f32.mrf.mxu0  ;;  %v2681_v46 = vmax.f32 %v2601_v61, %v2641_v43  ;;  %v2801_v0 = vld [vmem:[#allocation2 + $0x251] sm:$0xff]  ;;  %v2800_v7 = vld [vmem:[#allocation2 + $0x249] sm:$0xff] }
 0x29c   : > { %v3948_v59 = vpop.eup %3947  ;;  %v3454_v37 = vmul.f32 1.442695, %v3416_v5  ;;  %v3250_v34 = vadd.f32 %v3182_v57, %v3060_v35  ;;  %v3014_v5 = vmax.f32 %v2982_v8, %v6102_v14  ;;  %v869_v32 = vpop.f32.mrf.mxu1  ;;  %v2721_v57 = vld [vmem:[#allocation2 + $0x250] sm:$0xff] }
 0x29d   : > { %v3950_v26 = vpop.eup %3949  ;;  %v3511_v17 = vadd.f32 1.0, %v3948_v59  ;;  %v3313_v1 = vld [vmem:[#allocation3 + $0x38] sm:$0xff]  ;;  %916 = vst.msk [vmem:[#allocation3 + $0xb8] sm:$0xff] %vm892_vm3, %v869_v32  ;;  %v2290_v59 = vld [vmem:[#allocation3 + $0x60] sm:$0xff]  ;;  %v2761_v27 = vmax.f32 %v2681_v46, %v2721_v57 }
 0x29e   : > { %v3574_v19 = vmul.f32 %v3950_v26, %v6069_v56  ;;  %3951 = vpow2.f32 %v3454_v37  ;;  %v3349_v30 = vmul.f32 %v5961_v45, %v3313_v1  ;;  %3282 = vst.msk [vmem:[#allocation3 + $0x40] sm:$0xff] %vm892_vm3, %v3250_v34  ;;  %3777 = vmatmul.msk.bf16.gmra.mxu0 %vm329_vm1, %v3096_v39  ;;  %v1651_v56 = vpop.f32.mrf.mxu2  ;;  %v2418_v37 = vpop.f32.mrf.mxu3  ;;  %v2680_v34 = vmax.f32 %v2600_v62, %v2640_v20  ;;  %v6609_v1 = vld [vmem:[#allocation50_spill] sm:$0xff] }
 0x29f   : > { %3953 = vrcp.f32 %v3511_v17  ;;  %v1709_v52 = vadd.f32 %v1651_v56, %v1519_v13  ;;  %v2480_v18 = vadd.f32 %v2418_v37, %v2290_v59  ;;  %v3046_v26 = vmax.f32 %v3014_v5, %v6144_v25  ;;  %v6608_v17 = vld [vmem:[#allocation49_spill] sm:$0xff]  ;;  %v2881_v43 = vld [vmem:[#allocation2 + $0x252] sm:$0xff] }
 0x2a0   : > { %3606 = vst.msk [vmem:[%s6038_s30 + $0x20] sm:$0xff] %vm892_vm3, %v3574_v19  ;;  %v6133_v16 = vadd.f32 %v5968_v55, %v3349_v30  ;;  %v2325_v36 = vpack.c.bf16 %v6609_v1, %v6608_v17  ;;  %v3062_v19 = vld [vmem:[#allocation3 + $0x50] sm:$0xff]  ;;  %v2760_v40 = vmax.f32 %v2680_v34, %v2720_v48 }
 0x2a1   : > { %1741 = vst.msk [vmem:[#allocation3 + $0x78] sm:$0xff] %vm892_vm3, %v1709_v52  ;;  %v2603_v37 = vld [vmem:[#allocation2 + $0x26e] sm:$0xff] }
 0x2a2   : > { %v3417_v24 = vsub.f32 0.0, %v6133_v16  ;;  %2512 = vst.msk [vmem:[#allocation3 + $0x60] sm:$0xff] %vm892_vm3, %v2480_v18  ;;  %v2840_v61 = vmax.f32 %v2760_v40, %v2800_v7  ;;  %v2643_v34 = vld [vmem:[#allocation2 + $0x26f] sm:$0xff] }
 0x2a3   : > { %v3184_v31 = vpop.f32.mrf.mxu0  ;;  %v1522_v48 = vld [vmem:[#allocation3 + $0x90] sm:$0xff] }
 0x2a4   : > { %v3952_v6 = vpop.eup %3951  ;;  %v3456_v23 = vmul.f32 1.442695, %v3417_v24  ;;  %v3251_v53 = vadd.f32 %v3184_v31, %v3061_v44  ;;  %v872_v8 = vpop.f32.mrf.mxu1  ;;  %v1521_v44 = vld [vmem:[#allocation3 + $0x88] sm:$0xff]  ;;  %v2841_v31 = vmax.f32 %v2761_v27, %v2801_v0 }
 0x2a5   : > { %v3954_v15 = vpop.eup %3953  ;;  %v3512_v38 = vadd.f32 1.0, %v3952_v6  ;;  %v3314_v63 = vld [vmem:[#allocation3 + $0x40] sm:$0xff]  ;;  %v2985_v6 = vmax.f32 %v2953_v29, %v6099_v4  ;;  %917 = vst.msk [vmem:[#allocation3 + $0xc0] sm:$0xff] %vm892_vm3, %v872_v8  ;;  %v2722_v27 = vld [vmem:[#allocation2 + $0x268] sm:$0xff] }
 0x2a6   : > { %v3575_v22 = vmul.f32 %v3954_v15, %v6091_v9  ;;  %3955 = vpow2.f32 %v3456_v23  ;;  %v3350_v41 = vmul.f32 %v5961_v45, %v3314_v63  ;;  %3283 = vst.msk [vmem:[#allocation3 + $0x48] sm:$0xff] %vm892_vm3, %v3251_v53  ;;  %v1654_v35 = vpop.f32.mrf.mxu2  ;;  %v3047_v9 = vmax.f32 %v3015_v51, %v6141_v10  ;;  %v2291_v53 = vld [vmem:[#allocation3 + $0x68] sm:$0xff]  ;;  %v2420_v51 = vpop.f32.mrf.mxu3 }
 0x2a7   : > { %3957 = vrcp.f32 %v3512_v38  ;;  %v1710_v49 = vadd.f32 %v1654_v35, %v1520_v12  ;;  %3763 = vmatmul.msk.bf16.gmra.mxu3 %vm329_vm1, %v2325_v36  ;;  %v2481_v15 = vadd.f32 %v2420_v51, %v2291_v53  ;;  %v2880_v38 = vld [vmem:[#allocation2 + $0x24a] sm:$0xff]  ;;  %v2984_v63 = vmax.f32 %v2952_v54, %v6102_v14 }
 0x2a8   : > { %3607 = vst.msk [vmem:[%s6038_s30 + $0x28] sm:$0xff] %vm892_vm3, %v3575_v22  ;;  %v6153_v2 = vadd.f32 %v5968_v55, %v3350_v41  ;;  %v3097_v56 = vpack.c.bf16 %v3047_v9, %v3046_v26  ;;  %v3063_v22 = vld [vmem:[#allocation3 + $0x58] sm:$0xff]  ;;  %v6183_v46 = vmax.f32 %v2841_v31, %v2881_v43  ;;  %v3017_v32 = vmax.f32 %v2985_v6, %v6141_v10  ;;  %v2602_v12 = vld [vmem:[#allocation2 + $0x266] sm:$0xff] }
 0x2a9   : > { %1742 = vst.msk [vmem:[#allocation3 + $0x80] sm:$0xff] %vm892_vm3, %v1710_v49  ;;  %v2642_v35 = vld [vmem:[#allocation2 + $0x267] sm:$0xff]  ;;  %v6186_v59 = vmax.f32 %v2840_v61, %v2880_v38  ;;  %v3016_v26 = vmax.f32 %v2984_v63, %v6144_v25  ;;  %v2803_v51 = vld [vmem:[#allocation2 + $0x271] sm:$0xff] }
 0x2aa   : > { %v3418_v39 = vsub.f32 0.0, %v6153_v2  ;;  %2513 = vst.msk [vmem:[#allocation3 + $0x68] sm:$0xff] %vm892_vm3, %v2481_v15  ;;  %v2682_v17 = vmax.f32 %v2602_v12, %v2642_v35  ;;  %v2802_v31 = vld [vmem:[#allocation2 + $0x269] sm:$0xff] }
 0x2ab   : > { %v3187_v30 = vpop.f32.mrf.mxu0  ;;  %v2882_v38 = vld [vmem:[#allocation2 + $0x26a] sm:$0xff] }
 0x2ac   : > { %v3956_v3 = vpop.eup %3955  ;;  %v3458_v21 = vmul.f32 1.442695, %v3418_v39  ;;  %v3252_v13 = vadd.f32 %v3187_v30, %v3062_v19  ;;  %v874_v36 = vpop.f32.mrf.mxu1  ;;  %v3049_v30 = vmax.f32 %v3017_v32, %v6183_v46  ;;  %v2762_v0 = vmax.f32 %v2682_v17, %v2722_v27 }
 0x2ad   : > { %v3958_v42 = vpop.eup %3957  ;;  %v3513_v52 = vadd.f32 1.0, %v3956_v3  ;;  %v3315_v60 = vld [vmem:[#allocation3 + $0x48] sm:$0xff]  ;;  %918 = vst.msk [vmem:[#allocation3 + $0xc8] sm:$0xff] %vm892_vm3, %v874_v36 }
 0x2ae   : > { %v3576_v28 = vmul.f32 %v3958_v42, %v6111_v11  ;;  %3959 = vpow2.f32 %v3458_v21  ;;  %v3351_v24 = vmul.f32 %v5961_v45, %v3315_v60  ;;  %3284 = vst.msk [vmem:[#allocation3 + $0x50] sm:$0xff] %vm892_vm3, %v3252_v13  ;;  %3778 = vmatmul.msk.bf16.gmra.mxu0 %vm329_vm1, %v3097_v56  ;;  %v1656_v11 = vpop.f32.mrf.mxu2  ;;  %v2292_v21 = vld [vmem:[#allocation3 + $0x70] sm:$0xff]  ;;  %v2423_v13 = vpop.f32.mrf.mxu3  ;;  %v3064_v60 = vld [vmem:[#allocation3 + $0x60] sm:$0xff] }
 0x2af   : > { %3961 = vrcp.f32 %v3513_v52  ;;  %v1711_v23 = vadd.f32 %v1656_v11, %v1521_v44  ;;  %v2723_v56 = vld [vmem:[#allocation2 + $0x270] sm:$0xff]  ;;  %v2482_v42 = vadd.f32 %v2423_v13, %v2292_v21  ;;  %v3048_v52 = vmax.f32 %v3016_v26, %v6186_v59 }
 0x2b0   : > { %3608 = vst.msk [vmem:[%s6038_s30 + $0x30] sm:$0xff] %vm892_vm3, %v3576_v28  ;;  %v6175_v50 = vadd.f32 %v5968_v55, %v3351_v24  ;;  %v2954_v28 = vmax.f32 %v6060_v33, %v6102_v14  ;;  %v2955_v24 = vmax.f32 %v6057_v47, %v6099_v4  ;;  %v2842_v47 = vmax.f32 %v2762_v0, %v2802_v31 }
 0x2b1   : > { %1743 = vst.msk [vmem:[#allocation3 + $0x88] sm:$0xff] %vm892_vm3, %v1711_v23  ;;  %v3098_v44 = vpack.c.bf16 %v3049_v30, %v3048_v52  ;;  %v3065_v32 = vld [vmem:[#allocation3 + $0x68] sm:$0xff] }
 0x2b2   : > { %v3419_v58 = vsub.f32 0.0, %v6175_v50  ;;  %2514 = vst.msk [vmem:[#allocation3 + $0x70] sm:$0xff] %vm892_vm3, %v2482_v42  ;;  %v2986_v4 = vmax.f32 %v2954_v28, %v6144_v25  ;;  %v2987_v63 = vmax.f32 %v2955_v24, %v6141_v10  ;;  %v2922_v35 = vmax.f32 %v2842_v47, %v2882_v38  ;;  %v6240_v24 = vld [vmem:[%s6424_s5] ss:$0 sm:$0xff] }
 0x2b3   : > { %v3189_v41 = vpop.f32.mrf.mxu0 }
 0x2b4   : > { %v3960_v5 = vpop.eup %3959  ;;  %v3460_v62 = vmul.f32 1.442695, %v3419_v58  ;;  %v3253_v20 = vadd.f32 %v3189_v41, %v3063_v22  ;;  %v877_v43 = vpop.f32.mrf.mxu1  ;;  %v1523_v58 = vld [vmem:[#allocation3 + $0x98] sm:$0xff] }
 0x2b5   : > { %v3962_v9 = vpop.eup %3961  ;;  %v3514_v57 = vadd.f32 1.0, %v3960_v5  ;;  %v3316_v49 = vld [vmem:[#allocation3 + $0x50] sm:$0xff]  ;;  %919 = vst.msk [vmem:[#allocation3 + $0xd0] sm:$0xff] %vm892_vm3, %v877_v43  ;;  %v2293_v41 = vld [vmem:[#allocation3 + $0x78] sm:$0xff] }
 0x2b6   : > { %v3577_v39 = vmul.f32 %v3962_v9, %v6133_v16  ;;  %3963 = vpow2.f32 %v3460_v62  ;;  %v3352_v18 = vmul.f32 %v5961_v45, %v3316_v49  ;;  %3285 = vst.msk [vmem:[#allocation3 + $0x58] sm:$0xff] %vm892_vm3, %v3253_v20  ;;  %v1659_v19 = vpop.f32.mrf.mxu2  ;;  %v2683_v16 = vmax.f32 %v2603_v37, %v2643_v34  ;;  %v2425_v5 = vpop.f32.mrf.mxu3  ;;  %v2883_v62 = vld [vmem:[#allocation2 + $0x272] sm:$0xff] }
 0x2b7   : > { %3965 = vrcp.f32 %v3514_v57  ;;  %v1712_v3 = vadd.f32 %v1659_v19, %v1522_v48  ;;  %v2483_v20 = vadd.f32 %v2425_v5, %v2293_v41  ;;  %v3018_v9 = vmax.f32 %v2986_v4, %v6186_v59  ;;  %v1524_v19 = vld [vmem:[#allocation3 + $0xa0] sm:$0xff]  ;;  %v1526_v5 = vld [vmem:[#allocation3 + $0xb0] sm:$0xff] }
 0x2b8   : > { %3609 = vst.msk [vmem:[%s6038_s30 + $0x38] sm:$0xff] %vm892_vm3, %v3577_v39  ;;  %v6195_v1 = vadd.f32 %v5968_v55, %v3352_v18  ;;  %v2763_v11 = vmax.f32 %v2683_v16, %v2723_v56  ;;  %v3019_v34 = vmax.f32 %v2987_v63, %v6183_v46 }
 0x2b9   : > { %1744 = vst.msk [vmem:[#allocation3 + $0x90] sm:$0xff] %vm892_vm3, %v1712_v3  ;;  %v3050_v46 = vmax.f32 %v3018_v9, %v2922_v35  ;;  %v3066_v13 = vld [vmem:[#allocation3 + $0x70] sm:$0xff] }
 0x2ba   : > { %v3420_v29 = vsub.f32 0.0, %v6195_v1  ;;  %2515 = vst.msk [vmem:[#allocation3 + $0x78] sm:$0xff] %vm892_vm3, %v2483_v20 }
 0x2bb   : > { %v3192_v40 = vpop.f32.mrf.mxu0 }
 0x2bc   : > { %v3964_v7 = vpop.eup %3963  ;;  %v3462_v54 = vmul.f32 1.442695, %v3420_v29  ;;  %v3254_v8 = vadd.f32 %v3192_v40, %v3064_v60  ;;  %v879_v48 = vpop.f32.mrf.mxu1 }
 0x2bd   : > { %v3966_v6 = vpop.eup %3965  ;;  %v3515_v23 = vadd.f32 1.0, %v3964_v7  ;;  %v3317_v53 = vld [vmem:[#allocation3 + $0x58] sm:$0xff]  ;;  %920 = vst.msk [vmem:[#allocation3 + $0xd8] sm:$0xff] %vm892_vm3, %v879_v48 }
 0x2be   : > { %v3578_v61 = vmul.f32 %v3966_v6, %v6153_v2  ;;  %3967 = vpow2.f32 %v3462_v54  ;;  %v3353_v33 = vmul.f32 %v5961_v45, %v3317_v53  ;;  %3286 = vst.msk [vmem:[#allocation3 + $0x60] sm:$0xff] %vm892_vm3, %v3254_v8  ;;  %3779 = vmatmul.msk.bf16.gmra.mxu0 %vm329_vm1, %v3098_v44  ;;  %v1661_v15 = vpop.f32.mrf.mxu2  ;;  %v2843_v2 = vmax.f32 %v2763_v11, %v2803_v51  ;;  %v2428_v3 = vpop.f32.mrf.mxu3  ;;  %v6250_v54 = vld [vmem:[%s6425_s6] ss:$0 sm:$0xff]  ;;  %v1525_v44 = vld [vmem:[#allocation3 + $0xa8] sm:$0xff]  ;;  %v1527_v48 = vld [vmem:[#allocation3 + $0xb8] sm:$0xff] }
 0x2bf   : > { %3969 = vrcp.f32 %v3515_v23  ;;  %v1713_v22 = vadd.f32 %v1661_v15, %v1523_v58  ;;  %v2295_v6 = vld [vmem:[#allocation3 + $0x88] sm:$0xff] }
 0x2c0   : > { %3610 = vst.msk [vmem:[%s6038_s30 + $0x40] sm:$0xff] %vm892_vm3, %v3578_v61  ;;  %v6215_v14 = vadd.f32 %v5968_v55, %v3353_v33  ;;  %v2923_v37 = vmax.f32 %v2843_v2, %v2883_v62  ;;  %v2296_v20 = vld [vmem:[#allocation3 + $0x90] sm:$0xff] }
 0x2c1   : > { %1745 = vst.msk [vmem:[#allocation3 + $0x98] sm:$0xff] %vm892_vm3, %v1713_v22  ;;  %v3067_v61 = vld [vmem:[#allocation3 + $0x78] sm:$0xff] }
 0x2c2   : > { %v3421_v25 = vsub.f32 0.0, %v6215_v14  ;;  %v3051_v16 = vmax.f32 %v3019_v34, %v2923_v37 }
 0x2c3   : > { %v3194_v12 = vpop.f32.mrf.mxu0 }
 0x2c4   : > { %v3968_v57 = vpop.eup %3967  ;;  %v3464_v49 = vmul.f32 1.442695, %v3421_v25  ;;  %v3255_v10 = vadd.f32 %v3194_v12, %v3065_v32  ;;  %v3099_v52 = vpack.c.bf16 %v3051_v16, %v3050_v46  ;;  %v882_v8 = vpop.f32.mrf.mxu1 }
 0x2c5   : > { %v3970_v39 = vpop.eup %3969  ;;  %v3516_v18 = vadd.f32 1.0, %v3968_v57  ;;  %v3318_v26 = vld [vmem:[#allocation3 + $0x60] sm:$0xff]  ;;  %921 = vst.msk [vmem:[#allocation3 + $0xe0] sm:$0xff] %vm892_vm3, %v882_v8 }
 0x2c6   : > { %v3579_v17 = vmul.f32 %v3970_v39, %v6175_v50  ;;  %3971 = vpow2.f32 %v3464_v49  ;;  %v3354_v36 = vmul.f32 %v5961_v45, %v3318_v26  ;;  %3287 = vst.msk [vmem:[#allocation3 + $0x68] sm:$0xff] %vm892_vm3, %v3255_v10  ;;  %v1664_v30 = vpop.f32.mrf.mxu2  ;;  %v2294_v50 = vld [vmem:[#allocation3 + $0x80] sm:$0xff]  ;;  %v2430_v23 = vpop.f32.mrf.mxu3 }
 0x2c7   : > { %3973 = vrcp.f32 %v3516_v18  ;;  %v1714_v27 = vadd.f32 %v1664_v30, %v1524_v19  ;;  %v2484_v21 = vadd.f32 %v2428_v3, %v2294_v50  ;;  %v2485_v51 = vadd.f32 %v2430_v23, %v2295_v6 }
 0x2c8   : > { %3611 = vst.msk [vmem:[%s6038_s30 + $0x48] sm:$0xff] %vm892_vm3, %v3579_v17  ;;  %v6230_v59 = vadd.f32 %v5968_v55, %v3354_v36  ;;  %v2297_v46 = vld [vmem:[#allocation3 + $0x98] sm:$0xff] }
 0x2c9   : > { %1746 = vst.msk [vmem:[#allocation3 + $0xa0] sm:$0xff] %vm892_vm3, %v1714_v27 }
 0x2ca   : > { %v3422_v45 = vsub.f32 0.0, %v6230_v59  ;;  %2516 = vst.msk [vmem:[#allocation3 + $0x80] sm:$0xff] %vm892_vm3, %v2484_v21 }
 0x2cb   : > { %v3197_v56 = vpop.f32.mrf.mxu0  ;;  %2517 = vst.msk [vmem:[#allocation3 + $0x88] sm:$0xff] %vm892_vm3, %v2485_v51 }
 0x2cc   : > { %v3972_v55 = vpop.eup %3971  ;;  %v3466_v29 = vmul.f32 1.442695, %v3422_v45  ;;  %v3256_v42 = vadd.f32 %v3197_v56, %v3066_v13  ;;  %v884_v41 = vpop.f32.mrf.mxu1 }
 0x2cd   : > { %v3974_v60 = vpop.eup %3973  ;;  %v3517_v40 = vadd.f32 1.0, %v3972_v55  ;;  %v3319_v0 = vld [vmem:[#allocation3 + $0x68] sm:$0xff]  ;;  %922 = vst.msk [vmem:[#allocation3 + $0xe8] sm:$0xff] %vm892_vm3, %v884_v41 }
 0x2ce   : > { %v3580_v28 = vmul.f32 %v3974_v60, %v6195_v1  ;;  %3975 = vpow2.f32 %v3466_v29  ;;  %v3355_v7 = vmul.f32 %v6240_v24, %v3319_v0  ;;  %3288 = vst.msk [vmem:[#allocation3 + $0x70] sm:$0xff] %vm892_vm3, %v3256_v42  ;;  %3780 = vmatmul.msk.bf16.gmra.mxu0 %vm329_vm1, %v3099_v52  ;;  %v1666_v11 = vpop.f32.mrf.mxu2  ;;  %v2433_v32 = vpop.f32.mrf.mxu3  ;;  %v1528_v0 = vld [vmem:[#allocation3 + $0xc0] sm:$0xff] }
 0x2cf   : > { %3977 = vrcp.f32 %v3517_v40  ;;  %v1715_v31 = vadd.f32 %v1666_v11, %v1525_v44  ;;  %v2486_v12 = vadd.f32 %v2433_v32, %v2296_v20 }
 0x2d0   : > { %3612 = vst.msk [vmem:[%s6038_s30 + $0x50] sm:$0xff] %vm892_vm3, %v3580_v28  ;;  %v6253_v1 = vadd.f32 %v6250_v54, %v3355_v7  ;;  %v2298_v8 = vld [vmem:[#allocation3 + $0xa0] sm:$0xff] }
 0x2d1   : > { %1747 = vst.msk [vmem:[#allocation3 + $0xa8] sm:$0xff] %vm892_vm3, %v1715_v31  ;;  %v3068_v35 = vld [vmem:[#allocation3 + $0x80] sm:$0xff] }
 0x2d2   : > { %v3423_v53 = vsub.f32 0.0, %v6253_v1  ;;  %2518 = vst.msk [vmem:[#allocation3 + $0x90] sm:$0xff] %vm892_vm3, %v2486_v12  ;;  %v3069_v50 = vld [vmem:[#allocation3 + $0x88] sm:$0xff] }
 0x2d3   : > { %v3199_v33 = vpop.f32.mrf.mxu0 }
 0x2d4   : > { %v3976_v47 = vpop.eup %3975  ;;  %v3468_v4 = vmul.f32 1.442695, %v3423_v53  ;;  %v3257_v43 = vadd.f32 %v3199_v33, %v3067_v61  ;;  %v887_v36 = vpop.f32.mrf.mxu1 }
 0x2d5   : > { %v3978_v58 = vpop.eup %3977  ;;  %v3518_v15 = vadd.f32 1.0, %v3976_v47  ;;  %v3320_v2 = vld [vmem:[#allocation3 + $0x70] sm:$0xff]  ;;  %923 = vst.msk [vmem:[#allocation3 + $0xf0] sm:$0xff] %vm892_vm3, %v887_v36 }
 0x2d6   : > { %v3581_v38 = vmul.f32 %v3978_v58, %v6215_v14  ;;  %3979 = vpow2.f32 %v3468_v4  ;;  %v3356_v63 = vmul.f32 %v6240_v24, %v3320_v2  ;;  %3289 = vst.msk [vmem:[#allocation3 + $0x78] sm:$0xff] %vm892_vm3, %v3257_v43  ;;  %v1669_v62 = vpop.f32.mrf.mxu2  ;;  %v2435_v16 = vpop.f32.mrf.mxu3 }
 0x2d7   : > { %3981 = vrcp.f32 %v3518_v15  ;;  %v1716_v25 = vadd.f32 %v1669_v62, %v1526_v5  ;;  %v2487_v27 = vadd.f32 %v2435_v16, %v2297_v46  ;;  %v1529_v15 = vld [vmem:[#allocation3 + $0xc8] sm:$0xff] }
 0x2d8   : > { %3613 = vst.msk [vmem:[%s6038_s30 + $0x58] sm:$0xff] %vm892_vm3, %v3581_v38  ;;  %v6265_v22 = vadd.f32 %v6250_v54, %v3356_v63  ;;  %v2299_v63 = vld [vmem:[#allocation3 + $0xa8] sm:$0xff] }
 0x2d9   : > { %1748 = vst.msk [vmem:[#allocation3 + $0xb0] sm:$0xff] %vm892_vm3, %v1716_v25  ;;  %v3070_v31 = vld [vmem:[#allocation3 + $0x90] sm:$0xff] }
 0x2da   : > { %v3424_v14 = vsub.f32 0.0, %v6265_v22  ;;  %2519 = vst.msk [vmem:[#allocation3 + $0x98] sm:$0xff] %vm892_vm3, %v2487_v27 }
 0x2db   : > { %v3202_v9 = vpop.f32.mrf.mxu0 }
 0x2dc   : > { %v3980_v57 = vpop.eup %3979  ;;  %v3470_v49 = vmul.f32 1.442695, %v3424_v14  ;;  %v3258_v10 = vadd.f32 %v3202_v9, %v3068_v35  ;;  %v889_v40 = vpop.f32.mrf.mxu1 }
 0x2dd   : > { %v3982_v37 = vpop.eup %3981  ;;  %v3519_v34 = vadd.f32 1.0, %v3980_v57  ;;  %v3321_v39 = vld [vmem:[#allocation3 + $0x78] sm:$0xff]  ;;  %924 = vst.msk [vmem:[#allocation3 + $0xf8] sm:$0xff] %vm892_vm3, %v889_v40 }
 0x2de   : > { %v3582_v18 = vmul.f32 %v3982_v37, %v6230_v59  ;;  %3983 = vpow2.f32 %v3470_v49  ;;  %v3357_v26 = vmul.f32 %v6240_v24, %v3321_v39  ;;  %3290 = vst.msk [vmem:[#allocation3 + $0x80] sm:$0xff] %vm892_vm3, %v3258_v10  ;;  %v1671_v19 = vpop.f32.mrf.mxu2  ;;  %v2438_v44 = vpop.f32.mrf.mxu3  ;;  %v1530_v37 = vld [vmem:[#allocation3 + $0xd0] sm:$0xff] }
 0x2df   : > { %3985 = vrcp.f32 %v3519_v34  ;;  %v1717_v30 = vadd.f32 %v1671_v19, %v1527_v48  ;;  %v2488_v11 = vadd.f32 %v2438_v44, %v2298_v8 }
 0x2e0   : > { %3614 = vst.msk [vmem:[%s6038_s30 + $0x60] sm:$0xff] %vm892_vm3, %v3582_v18  ;;  %v6277_v17 = vadd.f32 %v6250_v54, %v3357_v26  ;;  %v2300_v18 = vld [vmem:[#allocation3 + $0xb0] sm:$0xff] }
 0x2e1   : > { %1749 = vst.msk [vmem:[#allocation3 + $0xb8] sm:$0xff] %vm892_vm3, %v1717_v30 }
 0x2e2   : > { %v3425_v59 = vsub.f32 0.0, %v6277_v17  ;;  %2520 = vst.msk [vmem:[#allocation3 + $0xa0] sm:$0xff] %vm892_vm3, %v2488_v11 }
 0x2e3   : > { %v3204_v3 = vpop.f32.mrf.mxu0 }
 0x2e4   : > { %v3984_v45 = vpop.eup %3983  ;;  %v3472_v21 = vmul.f32 1.442695, %v3425_v59  ;;  %v3259_v13 = vadd.f32 %v3204_v3, %v3069_v50 }
 0x2e5   : > { %v3986_v56 = vpop.eup %3985  ;;  %v3520_v55 = vadd.f32 1.0, %v3984_v45  ;;  %v3322_v29 = vld [vmem:[#allocation3 + $0x80] sm:$0xff] }
 0x2e6   : > { %v3583_v42 = vmul.f32 %v3986_v56, %v6253_v1  ;;  %3987 = vpow2.f32 %v3472_v21  ;;  %v3358_v52 = vmul.f32 %v6240_v24, %v3322_v29  ;;  %3291 = vst.msk [vmem:[#allocation3 + $0x88] sm:$0xff] %vm892_vm3, %v3259_v13  ;;  %v1674_v28 = vpop.f32.mrf.mxu2  ;;  %v2440_v41 = vpop.f32.mrf.mxu3  ;;  %v1531_v13 = vld [vmem:[#allocation3 + $0xd8] sm:$0xff] }
 0x2e7   : > { %3989 = vrcp.f32 %v3520_v55  ;;  %v1718_v7 = vadd.f32 %v1674_v28, %v1528_v0  ;;  %v2489_v62 = vadd.f32 %v2440_v41, %v2299_v63 }
 0x2e8   : > { %3615 = vst.msk [vmem:[%s6038_s30 + $0x68] sm:$0xff] %vm892_vm3, %v3583_v42  ;;  %v6289_v60 = vadd.f32 %v6250_v54, %v3358_v52  ;;  %v2301_v29 = vld [vmem:[#allocation3 + $0xb8] sm:$0xff] }
 0x2e9   : > { %1750 = vst.msk [vmem:[#allocation3 + $0xc0] sm:$0xff] %vm892_vm3, %v1718_v7 }
 0x2ea   : > { %v3426_v1 = vsub.f32 0.0, %v6289_v60  ;;  %2521 = vst.msk [vmem:[#allocation3 + $0xa8] sm:$0xff] %vm892_vm3, %v2489_v62 }
 0x2eb   : > { %v3207_v6 = vpop.f32.mrf.mxu0 }
 0x2ec   : > { %v3988_v23 = vpop.eup %3987  ;;  %v3474_v53 = vmul.f32 1.442695, %v3426_v1  ;;  %v3260_v51 = vadd.f32 %v3207_v6, %v3070_v31 }
 0x2ed   : > { %v3990_v61 = vpop.eup %3989  ;;  %v3521_v33 = vadd.f32 1.0, %v3988_v23  ;;  %v3323_v47 = vld [vmem:[#allocation3 + $0x88] sm:$0xff] }
 0x2ee   : > { %v3584_v4 = vmul.f32 %v3990_v61, %v6265_v22  ;;  %3991 = vpow2.f32 %v3474_v53  ;;  %v3359_v43 = vmul.f32 %v6240_v24, %v3323_v47  ;;  %3292 = vst.msk [vmem:[#allocation3 + $0x90] sm:$0xff] %vm892_vm3, %v3260_v51  ;;  %v1676_v2 = vpop.f32.mrf.mxu2  ;;  %v3071_v22 = vld [vmem:[#allocation3 + $0x98] sm:$0xff]  ;;  %v2443_v26 = vpop.f32.mrf.mxu3  ;;  %v1532_v53 = vld [vmem:[#allocation3 + $0xe0] sm:$0xff] }
 0x2ef   : > { %3993 = vrcp.f32 %v3521_v33  ;;  %v1719_v38 = vadd.f32 %v1676_v2, %v1529_v15  ;;  %v2490_v48 = vadd.f32 %v2443_v26, %v2300_v18 }
 0x2f0   : > { %3616 = vst.msk [vmem:[%s6038_s30 + $0x70] sm:$0xff] %vm892_vm3, %v3584_v4  ;;  %v6301_v58 = vadd.f32 %v6250_v54, %v3359_v43  ;;  %v2302_v33 = vld [vmem:[#allocation3 + $0xc0] sm:$0xff] }
 0x2f1   : > { %1751 = vst.msk [vmem:[#allocation3 + $0xc8] sm:$0xff] %vm892_vm3, %v1719_v38 }
 0x2f2   : > { %v3427_v5 = vsub.f32 0.0, %v6301_v58  ;;  %2522 = vst.msk [vmem:[#allocation3 + $0xb0] sm:$0xff] %vm892_vm3, %v2490_v48 }
 0x2f3   : > { %v3209_v25 = vpop.f32.mrf.mxu0 }
 0x2f4   : > { %v3992_v20 = vpop.eup %3991  ;;  %v3476_v32 = vmul.f32 1.442695, %v3427_v5  ;;  %v3261_v14 = vadd.f32 %v3209_v25, %v3071_v22 }
 0x2f5   : > { %v3994_v12 = vpop.eup %3993  ;;  %v3522_v35 = vadd.f32 1.0, %v3992_v20  ;;  %v3324_v9 = vld [vmem:[#allocation3 + $0x90] sm:$0xff] }
 0x2f6   : > { %v3585_v57 = vmul.f32 %v3994_v12, %v6277_v17  ;;  %3995 = vpow2.f32 %v3476_v32  ;;  %v3360_v49 = vmul.f32 %v6240_v24, %v3324_v9  ;;  %3293 = vst.msk [vmem:[#allocation3 + $0x98] sm:$0xff] %vm892_vm3, %v3261_v14  ;;  %v1679_v34 = vpop.f32.mrf.mxu2  ;;  %v3072_v17 = vld [vmem:[#allocation3 + $0xa0] sm:$0xff]  ;;  %v2445_v42 = vpop.f32.mrf.mxu3  ;;  %v1533_v32 = vld [vmem:[#allocation3 + $0xe8] sm:$0xff] }
 0x2f7   : > { %3997 = vrcp.f32 %v3522_v35  ;;  %v1720_v39 = vadd.f32 %v1679_v34, %v1530_v37  ;;  %v2491_v40 = vadd.f32 %v2445_v42, %v2301_v29 }
 0x2f8   : > { %3617 = vst.msk [vmem:[%s6038_s30 + $0x78] sm:$0xff] %vm892_vm3, %v3585_v57  ;;  %v6312_v10 = vadd.f32 %v6250_v54, %v3360_v49  ;;  %v2303_v35 = vld [vmem:[#allocation3 + $0xc8] sm:$0xff] }
 0x2f9   : > { %1752 = vst.msk [vmem:[#allocation3 + $0xd0] sm:$0xff] %vm892_vm3, %v1720_v39 }
 0x2fa   : > { %v3428_v36 = vsub.f32 0.0, %v6312_v10  ;;  %2523 = vst.msk [vmem:[#allocation3 + $0xb8] sm:$0xff] %vm892_vm3, %v2491_v40 }
 0x2fb   : > { %v3212_v19 = vpop.f32.mrf.mxu0 }
 0x2fc   : > { %v3996_v30 = vpop.eup %3995  ;;  %v3478_v46 = vmul.f32 1.442695, %v3428_v36  ;;  %v3262_v16 = vadd.f32 %v3212_v19, %v3072_v17 }
 0x2fd   : > { %v3998_v59 = vpop.eup %3997  ;;  %v3523_v27 = vadd.f32 1.0, %v3996_v30  ;;  %v3325_v50 = vld [vmem:[#allocation3 + $0x98] sm:$0xff] }
 0x2fe   : > { %v3586_v3 = vmul.f32 %v3998_v59, %v6289_v60  ;;  %3999 = vpow2.f32 %v3478_v46  ;;  %v3361_v45 = vmul.f32 %v6240_v24, %v3325_v50  ;;  %3294 = vst.msk [vmem:[#allocation3 + $0xa0] sm:$0xff] %vm892_vm3, %v3262_v16  ;;  %v1681_v56 = vpop.f32.mrf.mxu2  ;;  %v3073_v60 = vld [vmem:[#allocation3 + $0xa8] sm:$0xff]  ;;  %v2448_v47 = vpop.f32.mrf.mxu3  ;;  %v1534_v46 = vld [vmem:[#allocation3 + $0xf0] sm:$0xff] }
 0x2ff   : > { %4001 = vrcp.f32 %v3523_v27  ;;  %v1721_v55 = vadd.f32 %v1681_v56, %v1531_v13  ;;  %v2492_v43 = vadd.f32 %v2448_v47, %v2302_v33 }
 0x300   : > { %3618 = vst.msk [vmem:[%s6038_s30 + $0x80] sm:$0xff] %vm892_vm3, %v3586_v3  ;;  %v6323_v21 = vadd.f32 %v6250_v54, %v3361_v45  ;;  %v2304_v27 = vld [vmem:[#allocation3 + $0xd0] sm:$0xff] }
 0x301   : > { %1753 = vst.msk [vmem:[#allocation3 + $0xd8] sm:$0xff] %vm892_vm3, %v1721_v55 }
 0x302   : > { %v3429_v52 = vsub.f32 0.0, %v6323_v21  ;;  %2524 = vst.msk [vmem:[#allocation3 + $0xc0] sm:$0xff] %vm892_vm3, %v2492_v43 }
 0x303   : > { %v3214_v0 = vpop.f32.mrf.mxu0 }
 0x304   : > { %v4000_v28 = vpop.eup %3999  ;;  %v3480_v7 = vmul.f32 1.442695, %v3429_v52  ;;  %v3263_v8 = vadd.f32 %v3214_v0, %v3073_v60 }
 0x305   : > { %v4002_v44 = vpop.eup %4001  ;;  %v3524_v1 = vadd.f32 1.0, %v4000_v28  ;;  %v3326_v11 = vld [vmem:[#allocation3 + $0xa0] sm:$0xff] }
 0x306   : > { %v3587_v31 = vmul.f32 %v4002_v44, %v6301_v58  ;;  %4003 = vpow2.f32 %v3480_v7  ;;  %v3362_v6 = vmul.f32 %v6240_v24, %v3326_v11  ;;  %3295 = vst.msk [vmem:[#allocation3 + $0xa8] sm:$0xff] %vm892_vm3, %v3263_v8  ;;  %v1684_v51 = vpop.f32.mrf.mxu2  ;;  %v3074_v58 = vld [vmem:[#allocation3 + $0xb0] sm:$0xff]  ;;  %v2450_v9 = vpop.f32.mrf.mxu3  ;;  %v1535_v7 = vld [vmem:[#allocation3 + $0xf8] sm:$0xff] }
 0x307   : > { %4005 = vrcp.f32 %v3524_v1  ;;  %v1722_v61 = vadd.f32 %v1684_v51, %v1532_v53  ;;  %v2493_v49 = vadd.f32 %v2450_v9, %v2303_v35 }
 0x308   : > { %3619 = vst.msk [vmem:[%s6038_s30 + $0x88] sm:$0xff] %vm892_vm3, %v3587_v31  ;;  %v6334_v23 = vadd.f32 %v6250_v54, %v3362_v6  ;;  %v2305_v1 = vld [vmem:[#allocation3 + $0xd8] sm:$0xff] }
 0x309   : > { %1754 = vst.msk [vmem:[#allocation3 + $0xe0] sm:$0xff] %vm892_vm3, %v1722_v61 }
 0x30a   : > { %v3430_v4 = vsub.f32 0.0, %v6334_v23  ;;  %2525 = vst.msk [vmem:[#allocation3 + $0xc8] sm:$0xff] %vm892_vm3, %v2493_v49 }
 0x30b   : > { %v3217_v15 = vpop.f32.mrf.mxu0 }
 0x30c   : > { %v4004_v2 = vpop.eup %4003  ;;  %v3482_v38 = vmul.f32 1.442695, %v3430_v4  ;;  %v3264_v63 = vadd.f32 %v3217_v15, %v3074_v58 }
 0x30d   : > { %v4006_v41 = vpop.eup %4005  ;;  %v3525_v5 = vadd.f32 1.0, %v4004_v2  ;;  %v3327_v62 = vld [vmem:[#allocation3 + $0xa8] sm:$0xff] }
 0x30e   : > { %v3588_v22 = vmul.f32 %v4006_v41, %v6312_v10  ;;  %4007 = vpow2.f32 %v3482_v38  ;;  %v3363_v25 = vmul.f32 %v6240_v24, %v3327_v62  ;;  %3296 = vst.msk [vmem:[#allocation3 + $0xb0] sm:$0xff] %vm892_vm3, %v3264_v63  ;;  %v1686_v14 = vpop.f32.mrf.mxu2  ;;  %v3075_v10 = vld [vmem:[#allocation3 + $0xb8] sm:$0xff]  ;;  %v2453_v50 = vpop.f32.mrf.mxu3 }
 0x30f   : > { %4009 = vrcp.f32 %v3525_v5  ;;  %v1723_v12 = vadd.f32 %v1686_v14, %v1533_v32  ;;  %v2494_v45 = vadd.f32 %v2453_v50, %v2304_v27 }
 0x310   : > { %3620 = vst.msk [vmem:[%s6038_s30 + $0x90] sm:$0xff] %vm892_vm3, %v3588_v22  ;;  %v6345_v20 = vadd.f32 %v6250_v54, %v3363_v25  ;;  %v2306_v38 = vld [vmem:[#allocation3 + $0xe0] sm:$0xff] }
 0x311   : > { %1755 = vst.msk [vmem:[#allocation3 + $0xe8] sm:$0xff] %vm892_vm3, %v1723_v12 }
 0x312   : > { %v3431_v57 = vsub.f32 0.0, %v6345_v20  ;;  %2526 = vst.msk [vmem:[#allocation3 + $0xd0] sm:$0xff] %vm892_vm3, %v2494_v45 }
 0x313   : > { %v3219_v37 = vpop.f32.mrf.mxu0 }
 0x314   : > { %v4008_v34 = vpop.eup %4007  ;;  %v3484_v39 = vmul.f32 1.442695, %v3431_v57  ;;  %v3265_v18 = vadd.f32 %v3219_v37, %v3075_v10 }
 0x315   : > { %v4010_v26 = vpop.eup %4009  ;;  %v3526_v36 = vadd.f32 1.0, %v4008_v34  ;;  %v3328_v48 = vld [vmem:[#allocation3 + $0xb0] sm:$0xff] }
 0x316   : > { %v3589_v17 = vmul.f32 %v4010_v26, %v6323_v21  ;;  %4011 = vpow2.f32 %v3484_v39  ;;  %v3364_v19 = vmul.f32 %v6240_v24, %v3328_v48  ;;  %3297 = vst.msk [vmem:[#allocation3 + $0xb8] sm:$0xff] %vm892_vm3, %v3265_v18  ;;  %v1689_v16 = vpop.f32.mrf.mxu2  ;;  %v3076_v21 = vld [vmem:[#allocation3 + $0xc0] sm:$0xff]  ;;  %v2455_v11 = vpop.f32.mrf.mxu3 }
 0x317   : > { %4013 = vrcp.f32 %v3526_v36  ;;  %v1724_v59 = vadd.f32 %v1689_v16, %v1534_v46  ;;  %v2495_v6 = vadd.f32 %v2455_v11, %v2305_v1 }
 0x318   : > { %3621 = vst.msk [vmem:[%s6038_s30 + $0x98] sm:$0xff] %vm892_vm3, %v3589_v17  ;;  %v3400_v30 = vadd.f32 %v6250_v54, %v3364_v19  ;;  %v2307_v10 = vld [vmem:[#allocation3 + $0xe8] sm:$0xff] }
 0x319   : > { %1756 = vst.msk [vmem:[#allocation3 + $0xf0] sm:$0xff] %vm892_vm3, %v1724_v59  ;;  %v3078_v62 = vld [vmem:[#allocation3 + $0xd0] sm:$0xff] }
 0x31a   : > { %v3432_v3 = vsub.f32 0.0, %v3400_v30  ;;  %2527 = vst.msk [vmem:[#allocation3 + $0xd8] sm:$0xff] %vm892_vm3, %v2495_v6 }
 0x31b   : > { %v3222_v13 = vpop.f32.mrf.mxu0 }
 0x31c   : > { %v4012_v56 = vpop.eup %4011  ;;  %v3486_v55 = vmul.f32 1.442695, %v3432_v3  ;;  %v3266_v29 = vadd.f32 %v3222_v13, %v3076_v21 }
 0x31d   : > { %v4014_v42 = vpop.eup %4013  ;;  %v3527_v52 = vadd.f32 1.0, %v4012_v56  ;;  %v3329_v40 = vld [vmem:[#allocation3 + $0xb8] sm:$0xff] }
 0x31e   : > { %v3590_v60 = vmul.f32 %v4014_v42, %v6334_v23  ;;  %4015 = vpow2.f32 %v3486_v55  ;;  %v3365_v0 = vmul.f32 %v6240_v24, %v3329_v40  ;;  %3298 = vst.msk [vmem:[#allocation3 + $0xc0] sm:$0xff] %vm892_vm3, %v3266_v29  ;;  %v1691_v8 = vpop.f32.mrf.mxu2  ;;  %v3077_v23 = vld [vmem:[#allocation3 + $0xc8] sm:$0xff]  ;;  %v2458_v63 = vpop.f32.mrf.mxu3 }
 0x31f   : > { %4017 = vrcp.f32 %v3527_v52  ;;  %v1725_v44 = vadd.f32 %v1691_v8, %v1535_v7  ;;  %v2496_v5 = vadd.f32 %v2458_v63, %v2306_v38 }
 0x320   : > { %3622 = vst.msk [vmem:[%s6038_s30 + $0xa0] sm:$0xff] %vm892_vm3, %v3590_v60  ;;  %v3401_v28 = vadd.f32 %v6250_v54, %v3365_v0  ;;  %v2308_v50 = vld [vmem:[#allocation3 + $0xf0] sm:$0xff] }
 0x321   : > { %1757 = vst.msk [vmem:[#allocation3 + $0xf8] sm:$0xff] %vm892_vm3, %v1725_v44  ;;  %v3079_v18 = vld [vmem:[#allocation3 + $0xd8] sm:$0xff] }
 0x322   : > { %v3433_v31 = vsub.f32 0.0, %v3401_v28  ;;  %2528 = vst.msk [vmem:[#allocation3 + $0xe0] sm:$0xff] %vm892_vm3, %v2496_v5 }
 0x323   : > { %v3224_v53 = vpop.f32.mrf.mxu0 }
 0x324   : > { %v4016_v51 = vpop.eup %4015  ;;  %v3488_v61 = vmul.f32 1.442695, %v3433_v31  ;;  %v3267_v33 = vadd.f32 %v3224_v53, %v3077_v23 }
 0x325   : > { %v4018_v47 = vpop.eup %4017  ;;  %v3528_v4 = vadd.f32 1.0, %v4016_v51  ;;  %v3330_v43 = vld [vmem:[#allocation3 + $0xc0] sm:$0xff] }
 0x326   : > { %v3591_v58 = vmul.f32 %v4018_v47, %v6345_v20  ;;  %4019 = vpow2.f32 %v3488_v61  ;;  %v3366_v15 = vmul.f32 %v6240_v24, %v3330_v43  ;;  %3299 = vst.msk [vmem:[#allocation3 + $0xc8] sm:$0xff] %vm892_vm3, %v3267_v33  ;;  %v2460_v37 = vpop.f32.mrf.mxu3 }
 0x327   : > { %4021 = vrcp.f32 %v3528_v4  ;;  %v2497_v39 = vadd.f32 %v2460_v37, %v2307_v10 }
 0x328   : > { %3623 = vst.msk [vmem:[%s6038_s30 + $0xa8] sm:$0xff] %vm892_vm3, %v3591_v58  ;;  %v3402_v2 = vadd.f32 %v6250_v54, %v3366_v15  ;;  %v2309_v8 = vld [vmem:[#allocation3 + $0xf8] sm:$0xff] }
 0x329   : > { %2529 = vst.msk [vmem:[#allocation3 + $0xe8] sm:$0xff] %vm892_vm3, %v2497_v39  ;;  %v3080_v13 = vld [vmem:[#allocation3 + $0xe0] sm:$0xff] }
 0x32a   : > { %v3434_v41 = vsub.f32 0.0, %v3402_v2 }
 0x32b   : > { %v3227_v22 = vpop.f32.mrf.mxu0 }
 0x32c   : > { %v4020_v25 = vpop.eup %4019  ;;  %v3490_v32 = vmul.f32 1.442695, %v3434_v41  ;;  %v3268_v20 = vadd.f32 %v3227_v22, %v3078_v62 }
 0x32d   : > { %v4022_v14 = vpop.eup %4021  ;;  %v3529_v12 = vadd.f32 1.0, %v4020_v25  ;;  %v3331_v35 = vld [vmem:[#allocation3 + $0xc8] sm:$0xff] }
 0x32e   : > { %v3592_v9 = vmul.f32 %v4022_v14, %v3400_v30  ;;  %4023 = vpow2.f32 %v3490_v32  ;;  %v3367_v57 = vmul.f32 %v6240_v24, %v3331_v35  ;;  %3300 = vst.msk [vmem:[#allocation3 + $0xd0] sm:$0xff] %vm892_vm3, %v3268_v20  ;;  %v2463_v3 = vpop.f32.mrf.mxu3 }
 0x32f   : > { %4025 = vrcp.f32 %v3529_v12  ;;  %v2498_v21 = vadd.f32 %v2463_v3, %v2308_v50 }
 0x330   : > { %3624 = vst.msk [vmem:[%s6038_s30 + $0xb0] sm:$0xff] %vm892_vm3, %v3592_v9  ;;  %v3403_v49 = vadd.f32 %v6250_v54, %v3367_v57  ;;  %v3081_v31 = vld [vmem:[#allocation3 + $0xe8] sm:$0xff] }
 0x331   : > { %2530 = vst.msk [vmem:[#allocation3 + $0xf0] sm:$0xff] %vm892_vm3, %v2498_v21 }
 0x332   : > { %v3435_v34 = vsub.f32 0.0, %v3403_v49 }
 0x333   : > { %v3229_v26 = vpop.f32.mrf.mxu0 }
 0x334   : > { %v4024_v36 = vpop.eup %4023  ;;  %v3492_v48 = vmul.f32 1.442695, %v3435_v34  ;;  %v3269_v17 = vadd.f32 %v3229_v26, %v3079_v18 }
 0x335   : > { %v4026_v19 = vpop.eup %4025  ;;  %v3530_v30 = vadd.f32 1.0, %v4024_v36  ;;  %v3332_v46 = vld [vmem:[#allocation3 + $0xd0] sm:$0xff] }
 0x336   : > { %v3593_v16 = vmul.f32 %v4026_v19, %v3401_v28  ;;  %4027 = vpow2.f32 %v3492_v48  ;;  %v3368_v59 = vmul.f32 %v6240_v24, %v3332_v46  ;;  %3301 = vst.msk [vmem:[#allocation3 + $0xd8] sm:$0xff] %vm892_vm3, %v3269_v17  ;;  %v2465_v44 = vpop.f32.mrf.mxu3 }
 0x337   : > { %4029 = vrcp.f32 %v3530_v30  ;;  %v2499_v11 = vadd.f32 %v2465_v44, %v2309_v8 }
 0x338   : > { %3625 = vst.msk [vmem:[%s6038_s30 + $0xb8] sm:$0xff] %vm892_vm3, %v3593_v16  ;;  %v3404_v27 = vadd.f32 %v6250_v54, %v3368_v59 }
 0x339   : > { %2531 = vst.msk [vmem:[#allocation3 + $0xf8] sm:$0xff] %vm892_vm3, %v2499_v11 }
 0x33a   : > { %v3436_v45 = vsub.f32 0.0, %v3404_v27 }
 0x33b   : > { %v3232_v56 = vpop.f32.mrf.mxu0 }
 0x33c   : > { %v4028_v55 = vpop.eup %4027  ;;  %v3494_v29 = vmul.f32 1.442695, %v3436_v45  ;;  %v3270_v42 = vadd.f32 %v3232_v56, %v3080_v13 }
 0x33d   : > { %v4030_v52 = vpop.eup %4029  ;;  %v3531_v40 = vadd.f32 1.0, %v4028_v55  ;;  %v3333_v60 = vld [vmem:[#allocation3 + $0xd8] sm:$0xff] }
 0x33e   : > { %v3594_v0 = vmul.f32 %v4030_v52, %v3402_v2  ;;  %4031 = vpow2.f32 %v3494_v29  ;;  %v3369_v28 = vmul.f32 %v6240_v24, %v3333_v60  ;;  %3302 = vst.msk [vmem:[#allocation3 + $0xe0] sm:$0xff] %vm892_vm3, %v3270_v42  ;;  %v3082_v2 = vld [vmem:[#allocation3 + $0xf0] sm:$0xff] }
 0x33f   : > { %4033 = vrcp.f32 %v3531_v40 }
 0x340   : > { %3626 = vst.msk [vmem:[%s6038_s30 + $0xc0] sm:$0xff] %vm892_vm3, %v3594_v0  ;;  %v3405_v7 = vadd.f32 %v6250_v54, %v3369_v28  ;;  %v3083_v35 = vld [vmem:[#allocation3 + $0xf8] sm:$0xff] }
 0x342   : > { %v3437_v1 = vsub.f32 0.0, %v3405_v7 }
 0x343   : > { %v3234_v6 = vpop.f32.mrf.mxu0 }
 0x344   : > { %v4032_v23 = vpop.eup %4031  ;;  %v3496_v53 = vmul.f32 1.442695, %v3437_v1  ;;  %v3271_v51 = vadd.f32 %v3234_v6, %v3081_v31 }
 0x345   : > { %v4034_v61 = vpop.eup %4033  ;;  %v3532_v33 = vadd.f32 1.0, %v4032_v23  ;;  %v3334_v47 = vld [vmem:[#allocation3 + $0xe0] sm:$0xff] }
 0x346   : > { %v3595_v4 = vmul.f32 %v4034_v61, %v3403_v49  ;;  %4035 = vpow2.f32 %v3496_v53  ;;  %v3370_v43 = vmul.f32 %v6240_v24, %v3334_v47  ;;  %3303 = vst.msk [vmem:[#allocation3 + $0xe8] sm:$0xff] %vm892_vm3, %v3271_v51 }
 0x347   : > { %4037 = vrcp.f32 %v3532_v33 }
 0x348   : > { %3627 = vst.msk [vmem:[%s6038_s30 + $0xc8] sm:$0xff] %vm892_vm3, %v3595_v4  ;;  %v3406_v58 = vadd.f32 %v6250_v54, %v3370_v43 }
 0x34a   : > { %v3438_v15 = vsub.f32 0.0, %v3406_v58 }
 0x34b   : > { %v3237_v38 = vpop.f32.mrf.mxu0 }
 0x34c   : > { %v4036_v63 = vpop.eup %4035  ;;  %v3498_v41 = vmul.f32 1.442695, %v3438_v15  ;;  %v3272_v5 = vadd.f32 %v3237_v38, %v3082_v2 }
 0x34d   : > { %v4038_v62 = vpop.eup %4037  ;;  %v3533_v22 = vadd.f32 1.0, %v4036_v63  ;;  %v3335_v25 = vld [vmem:[#allocation3 + $0xe8] sm:$0xff] }
 0x34e   : > { %v3596_v32 = vmul.f32 %v4038_v62, %v3404_v27  ;;  %4039 = vpow2.f32 %v3498_v41  ;;  %v3371_v20 = vmul.f32 %v6240_v24, %v3335_v25  ;;  %3304 = vst.msk [vmem:[#allocation3 + $0xf0] sm:$0xff] %vm892_vm3, %v3272_v5 }
 0x34f   : > { %4041 = vrcp.f32 %v3533_v22 }
 0x350   : > { %3628 = vst.msk [vmem:[%s6038_s30 + $0xd0] sm:$0xff] %vm892_vm3, %v3596_v32  ;;  %v3407_v14 = vadd.f32 %v6250_v54, %v3371_v20 }
 0x352   : > { %v3439_v12 = vsub.f32 0.0, %v3407_v14 }
 0x353   : > { %v3239_v9 = vpop.f32.mrf.mxu0 }
 0x354   : > { %v4040_v57 = vpop.eup %4039  ;;  %v3500_v49 = vmul.f32 1.442695, %v3439_v12  ;;  %v3273_v10 = vadd.f32 %v3239_v9, %v3083_v35 }
 0x355   : > { %v4042_v37 = vpop.eup %4041  ;;  %v3534_v34 = vadd.f32 1.0, %v4040_v57  ;;  %v3336_v39 = vld [vmem:[#allocation3 + $0xf0] sm:$0xff] }
 0x356   : > { %v3597_v18 = vmul.f32 %v4042_v37, %v3405_v7  ;;  %4043 = vpow2.f32 %v3500_v49  ;;  %v3372_v26 = vmul.f32 %v6240_v24, %v3336_v39  ;;  %3305 = vst.msk [vmem:[#allocation3 + $0xf8] sm:$0xff] %vm892_vm3, %v3273_v10 }
 0x357   : > { %4045 = vrcp.f32 %v3534_v34 }
 0x358   : > { %3629 = vst.msk [vmem:[%s6038_s30 + $0xd8] sm:$0xff] %vm892_vm3, %v3597_v18  ;;  %v3408_v36 = vadd.f32 %v6250_v54, %v3372_v26 }
 0x35a   : > { %v3440_v48 = vsub.f32 0.0, %v3408_v36 }
 0x35c   : > { %v4044_v17 = vpop.eup %4043  ;;  %v3502_v19 = vmul.f32 1.442695, %v3440_v48 }
 0x35d   : > { %v4046_v30 = vpop.eup %4045  ;;  %v3535_v46 = vadd.f32 1.0, %v4044_v17  ;;  %v3337_v16 = vld [vmem:[#allocation3 + $0xf8] sm:$0xff] }
 0x35e   : > { %v3598_v59 = vmul.f32 %v4046_v30, %v3406_v58  ;;  %4047 = vpow2.f32 %v3502_v19  ;;  %v3373_v27 = vmul.f32 %v6240_v24, %v3337_v16 }
 0x35f   : > { %4049 = vrcp.f32 %v3535_v46 }
 0x360   : > { %3630 = vst.msk [vmem:[%s6038_s30 + $0xe0] sm:$0xff] %vm892_vm3, %v3598_v59  ;;  %v3409_v50 = vadd.f32 %v6250_v54, %v3373_v27 }
 0x362   : > { %v3441_v3 = vsub.f32 0.0, %v3409_v50 }
 0x364   : > { %v4048_v45 = vpop.eup %4047  ;;  %v3504_v21 = vmul.f32 1.442695, %v3441_v3 }
 0x365   : > { %v4050_v13 = vpop.eup %4049  ;;  %v3536_v56 = vadd.f32 1.0, %v4048_v45 }
 0x366   : > { %v3599_v55 = vmul.f32 %v4050_v13, %v3407_v14  ;;  %4051 = vpow2.f32 %v3504_v21 }
 0x367   : > { %4053 = vrcp.f32 %v3536_v56 }
 0x368   : > { %3631 = vst.msk [vmem:[%s6038_s30 + $0xe8] sm:$0xff] %vm892_vm3, %v3599_v55 }
 0x36c   : > { %v4052_v29 = vpop.eup %4051 }
 0x36d   : > { %v4054_v42 = vpop.eup %4053  ;;  %v3537_v24 = vadd.f32 1.0, %v4052_v29 }
 0x36e   : > { %v3600_v52 = vmul.f32 %v4054_v42, %v3408_v36 }
 0x36f   : > { %4055 = vrcp.f32 %v3537_v24 }
 0x370   : > { %3632 = vst.msk [vmem:[%s6038_s30 + $0xf0] sm:$0xff] %vm892_vm3, %v3600_v52 }
 0x375   : > { %v4056_v40 = vpop.eup %4055 }
 0x376   : > { %v3601_v54 = vmul.f32 %v4056_v40, %v3409_v50 }
 0x378   : > { %3633 = vst.msk [vmem:[%s6038_s30 + $0xf8] sm:$0xff] %vm892_vm3, %v3601_v54 }
 0x379 PF: > { %s17_s24 = sadd.s32 1, %s4065_s24  }
 0x37a   : > { %p14_p4 = scmp.ge.s32.totalorder %s17_s24, 4  }
 0x37c   :  { %16 = sbr.rel (!%p14_p4) target bundleno = 1 (0x1), region = 83 }

</bundles_post_ra>
